<compile_context>
chip_gen: v5e
topology: v5e:2x2
jax: 0.10.0
libtpu: 0.0.40
codegen_flags: <defaults>
</compile_context>

<pallas_src>
import functools

import numpy as np

import jax
import jax.numpy as jnp
from jax.experimental import pallas as pl
from jax.experimental.pallas import tpu as pltpu


PAD_VALUE = -1.0   # PaddedConv2d(pad_value=-1)
C_HID = 64         # hidden channels of conv1/conv2
TAPS = 9           # 3x3 kernel -> 9 taps


# -----------------------------------------------------------------------------
# Fused Pallas kernel: conv1 -> relu -> conv2 -> relu -> conv3 -> relu -> linear
# -----------------------------------------------------------------------------
def _convnet_kernel(x_ref, mmul_ref, madd_ref,
                    w1_ref, b1_ref, w2_ref, b2_ref, w3_ref, b3_ref,
                    lwt_ref, lb_ref,
                    out_ref,
                    act_ref, patch_ref, obuf_ref,
                    *, n, bpb):
    hw = n * n
    chunk = bpb * hw   # lanes per grid step: all local batches folded together

    def conv_layer(load_act, cin, w_ref, b_ref):
        # Build the concatenated-K im2col matrix PATCH (9*cin, chunk) in VMEM.
        # Tap (kh, kw) is a lane rotation of the flattened (cin, chunk)
        # activation by dh*n + dw; out-of-image positions (and the harmless
        # cross-row / cross-batch wrap positions) are overwritten with the
        # pad value via precomputed multiplicative/additive masks.
        for t in range(TAPS):
            dh, dw = t // 3 - 1, t % 3 - 1
            s = dh * n + dw
            a = load_act()                                      # (cin, chunk)
            rolled = pltpu.roll(a, (-s) % chunk, axis=1) if s != 0 else a
            mm = mmul_ref[pl.ds(t, 1), :]                       # (1, chunk)
            ma = madd_ref[pl.ds(t, 1), :]                       # (1, chunk)
            patch_ref[pl.ds(t * cin, cin), :] = rolled * mm + ma
        k = TAPS * cin
        # ONE MXU matmul per conv layer: (cout, 9*cin) @ (9*cin, chunk)
        y = jnp.dot(w_ref[...], patch_ref[pl.ds(0, k), :],
                    preferred_element_type=jnp.float32)
        return jnp.maximum(y + b_ref[...], 0.0)

    # conv1 (Cin = 1): input block is (1, 1, chunk)
    act_ref[...] = conv_layer(lambda: x_ref[0], 1, w1_ref, b1_ref)
    # conv2 (Cin = Cout = 64), reusing the same VMEM activation buffer
    act_ref[...] = conv_layer(lambda: act_ref[...], C_HID, w2_ref, b2_ref)
    # conv3 (Cout = 1): lane-dense (1, chunk) row, stays on-chip
    a3 = conv_layer(lambda: act_ref[...], C_HID, w3_ref, b3_ref)

    # TODO(synk): nn.Dropout(0.2) is identity here (inference/eval semantics).

    # Final Linear fused in: per local batch, (1, HW) @ (HW, HW) + bias.
    for bl in range(bpb):
        flat = a3[:, bl * hw:(bl + 1) * hw]                     # (1, hw)
        obuf_ref[pl.ds(bl, 1), :] = (
            jnp.dot(flat, lwt_ref[...], preferred_element_type=jnp.float32)
            + lb_ref[...])
    # Single lane-dense store of this step's output rows.
    out_ref[0] = obuf_ref[...]


# -----------------------------------------------------------------------------
# Host-side helpers
# -----------------------------------------------------------------------------
def _make_tap_masks(n, bpb):
    """Per-tap validity masks (built with numpy at trace time -> constants)."""
    hw = n * n
    p = np.arange(hw)
    i, j = p // n, p % n
    mmul = np.zeros((TAPS, hw), np.float32)
    for t in range(TAPS):
        dh, dw = t // 3 - 1, t % 3 - 1
        mmul[t] = ((i + dh >= 0) & (i + dh < n) &
                   (j + dw >= 0) & (j + dw < n)).astype(np.float32)
    mmul = np.tile(mmul, (1, bpb))                 # (9, bpb*hw)
    madd = ((1.0 - mmul) * PAD_VALUE).astype(np.float32)
    return jnp.asarray(mmul), jnp.asarray(madd)


def prepare_params(params):
    """One-time weight layout prep (hoisted out of the per-call path)."""
    def conv_w(w):
        # (Cout, Cin, 3, 3) -> (Cout, 9*Cin), K index = (kh*3 + kw)*Cin + ci
        cout, cin = w.shape[0], w.shape[1]
        return jnp.transpose(w, (0, 2, 3, 1)).reshape(cout, TAPS * cin) \
                  .astype(jnp.float32)
    return {
        "w1": conv_w(params["conv1_w"]),                              # (64, 9)
        "b1": params["conv1_b"].reshape(-1, 1).astype(jnp.float32),   # (64, 1)
        "w2": conv_w(params["conv2_w"]),                              # (64, 576)
        "b2": params["conv2_b"].reshape(-1, 1).astype(jnp.float32),
        "w3": conv_w(params["conv3_w"]),                              # (1, 576)
        "b3": params["conv3_b"].reshape(1, 1).astype(jnp.float32),
        "lwt": jnp.transpose(params["lin_w"]).astype(jnp.float32),    # (in, out)
        "lb": params["lin_b"].reshape(1, -1).astype(jnp.float32),     # (1, out)
    }


@functools.partial(jax.jit, static_argnames=("num_blocks",))
def convnet_forward(prepped, x_nchw, num_blocks=None):
    """Forward pass of ConvNet. x_nchw: (B, 1, N, N) float32 -> (B, N*N)."""
    b, c, n, n2 = x_nchw.shape
    assert c == 1 and n == n2
    hw = n * n
    if num_blocks is None:
        num_blocks = 2 if b % 2 == 0 else 1      # feed both v7x TensorCores
    if b % num_blocks:
        num_blocks = 1
    bpb = b // num_blocks                        # batches folded per grid step
    chunk = bpb * hw

    x_flat = x_nchw.astype(jnp.float32).reshape(num_blocks, 1, chunk)
    mmul, madd = _make_tap_masks(n, bpb)

    kernel = functools.partial(_convnet_kernel, n=n, bpb=bpb)
    full = lambda i: (0, 0)   # weights/masks: same (whole-array) block each step

    out = pl.pallas_call(
        kernel,
        out_shape=jax.ShapeDtypeStruct((num_blocks, bpb, hw), jnp.float32),
        grid=(num_blocks,),
        in_specs=[
            pl.BlockSpec((1, 1, chunk), lambda i: (i, 0, 0)),   # x
            pl.BlockSpec((TAPS, chunk), full),                  # tap mul-mask
            pl.BlockSpec((TAPS, chunk), full),                  # tap add-mask
            pl.BlockSpec(prepped["w1"].shape, full),
            pl.BlockSpec(prepped["b1"].shape, full),
            pl.BlockSpec(prepped["w2"].shape, full),
            pl.BlockSpec(prepped["b2"].shape, full),
            pl.BlockSpec(prepped["w3"].shape, full),
            pl.BlockSpec(prepped["b3"].shape, full),
            pl.BlockSpec(prepped["lwt"].shape, full),
            pl.BlockSpec(prepped["lb"].shape, full),
        ],
        out_specs=pl.BlockSpec((1, bpb, hw), lambda i: (i, 0, 0)),
        scratch_shapes=[
            pltpu.VMEM((C_HID, chunk), jnp.float32),          # activation
            pltpu.VMEM((TAPS * C_HID, chunk), jnp.float32),   # concat-K patches
            pltpu.VMEM((bpb, hw), jnp.float32),               # output staging
        ],
        compiler_params=pltpu.CompilerParams(
            dimension_semantics=("parallel",)),
    )(x_flat, mmul, madd,
      prepped["w1"], prepped["b1"], prepped["w2"], prepped["b2"],
      prepped["w3"], prepped["b3"], prepped["lwt"], prepped["lb"])
    return out.reshape(b, hw)


# -----------------------------------------------------------------------------
# Synthetic params + pure-JAX reference (self-check only)
# -----------------------------------------------------------------------------
def init_params(n, key):
    ks = jax.random.split(key, 8)
    s = 0.1
    return {
        "conv1_w": s * jax.random.normal(ks[0], (64, 1, 3, 3), jnp.float32),
        "conv1_b": s * jax.random.normal(ks[1], (64,), jnp.float32),
        "conv2_w": s * jax.random.normal(ks[2], (64, 64, 3, 3), jnp.float32),
        "conv2_b": s * jax.random.normal(ks[3], (64,), jnp.float32),
        "conv3_w": s * jax.random.normal(ks[4], (1, 64, 3, 3), jnp.float32),
        "conv3_b": s * jax.random.normal(ks[5], (1,), jnp.float32),
        "lin_w": s * jax.random.normal(ks[6], (n * n, n * n), jnp.float32),
        "lin_b": s * jax.random.normal(ks[7], (n * n,), jnp.float32),
    }


def reference_forward(params, x):
    """Plain-XLA reference of the PyTorch ConvNet forward (eval mode)."""
    def pconv(h, w, bias):
        hp = jnp.pad(h, ((0, 0), (0, 0), (1, 1), (1, 1)),
                     constant_values=PAD_VALUE)
        y = jax.lax.conv_general_dilated(
            hp, w, window_strides=(1, 1), padding="VALID",
            dimension_numbers=("NCHW", "OIHW", "NCHW"),
            precision=jax.lax.Precision.HIGHEST)
        return y + bias.reshape(1, -1, 1, 1)
    h = jax.nn.relu(pconv(x, params["conv1_w"], params["conv1_b"]))
    h = jax.nn.relu(pconv(h, params["conv2_w"], params["conv2_b"]))
    h = jax.nn.relu(pconv(h, params["conv3_w"], params["conv3_b"]))
    h = h.reshape(h.shape[0], -1)
    return jnp.dot(h, params["lin_w"].T,
                   precision=jax.lax.Precision.HIGHEST) + params["lin_b"]


if __name__ == "__main__":
    N, B = 16, 2
    key = jax.random.PRNGKey(0)
    k_params, k_x = jax.random.split(key)
    params = init_params(N, k_params)
    prepped = prepare_params(params)        # weight layout prep: done once
    x = jax.random.normal(k_x, (B, 1, N, N), jnp.float32)

    out = jax.block_until_ready(convnet_forward(prepped, x))
    assert out.shape == (B, N * N), out.shape
    assert bool(jnp.all(jnp.isfinite(out)))

    ref = reference_forward(params, x)
    assert jnp.allclose(out, ref, rtol=5e-2, atol=5e-2), (
        float(jnp.max(jnp.abs(out - ref))))

    print("KERNEL_OK")
</pallas_src>

<mosaic_0001>
module attributes {stable_mosaic.version = 11 : i64} {
  func.func @_convnet_kernel(%arg0: i32, %arg1: memref<1x1x256xf32, #tpu.memory_space<vmem>>, %arg2: memref<9x256xf32, #tpu.memory_space<vmem>>, %arg3: memref<9x256xf32, #tpu.memory_space<vmem>>, %arg4: memref<64x9xf32, #tpu.memory_space<vmem>>, %arg5: memref<64x1xf32, #tpu.memory_space<vmem>>, %arg6: memref<64x576xf32, #tpu.memory_space<vmem>>, %arg7: memref<64x1xf32, #tpu.memory_space<vmem>>, %arg8: memref<1x576xf32, #tpu.memory_space<vmem>>, %arg9: memref<1x1xf32, #tpu.memory_space<vmem>>, %arg10: memref<256x256xf32, #tpu.memory_space<vmem>>, %arg11: memref<1x256xf32, #tpu.memory_space<vmem>>, %arg12: memref<1x1x256xf32, #tpu.memory_space<vmem>>, %arg13: memref<64x256xf32, #tpu.memory_space<vmem>>, %arg14: memref<576x256xf32, #tpu.memory_space<vmem>>, %arg15: memref<1x256xf32, #tpu.memory_space<vmem>>) attributes {dimension_semantics = [#tpu.dimension_semantics<parallel>], iteration_bounds = array<i64: 2>, scalar_prefetch = 0 : i64, scratch_operands = 3 : i64, tpu.core_type = #tpu.core_type<tc>, window_params = [{transform_indices = @transform_0, window_bounds = array<i64: 1, 1, 256>}, {pipeline_mode = #tpu.pipeline_mode<synchronous>, transform_indices = @transform_1, window_bounds = array<i64: 9, 256>}, {pipeline_mode = #tpu.pipeline_mode<synchronous>, transform_indices = @transform_2, window_bounds = array<i64: 9, 256>}, {pipeline_mode = #tpu.pipeline_mode<synchronous>, transform_indices = @transform_3, window_bounds = array<i64: 64, 9>}, {pipeline_mode = #tpu.pipeline_mode<synchronous>, transform_indices = @transform_4, window_bounds = array<i64: 64, 1>}, {pipeline_mode = #tpu.pipeline_mode<synchronous>, transform_indices = @transform_5, window_bounds = array<i64: 64, 576>}, {pipeline_mode = #tpu.pipeline_mode<synchronous>, transform_indices = @transform_6, window_bounds = array<i64: 64, 1>}, {pipeline_mode = #tpu.pipeline_mode<synchronous>, transform_indices = @transform_7, window_bounds = array<i64: 1, 576>}, {pipeline_mode = #tpu.pipeline_mode<synchronous>, transform_indices = @transform_8, window_bounds = array<i64: 1, 1>}, {pipeline_mode = #tpu.pipeline_mode<synchronous>, transform_indices = @transform_9, window_bounds = array<i64: 256, 256>}, {pipeline_mode = #tpu.pipeline_mode<synchronous>, transform_indices = @transform_10, window_bounds = array<i64: 1, 256>}, {transform_indices = @transform_11, window_bounds = array<i64: 1, 1, 256>}]} {
    %c0 = arith.constant 0 : index
    %c0_0 = arith.constant 0 : index
    %c0_1 = arith.constant 0 : index
    %0 = vector.load %arg1[%c0, %c0_0, %c0_1] : memref<1x1x256xf32, #tpu.memory_space<vmem>>, vector<1x1x256xf32>
    %1 = vector.shape_cast %0 : vector<1x1x256xf32> to vector<1x256xf32>
    %c17_i32 = arith.constant 17 : i32
    %2 = tpu.dynamic_rotate %1 by %c17_i32 dim 1 : vector<1x256xf32>, i32 -> vector<1x256xf32>
    %c0_2 = arith.constant 0 : index
    %c0_3 = arith.constant 0 : index
    %3 = vector.load %arg2[%c0_2, %c0_3] : memref<9x256xf32, #tpu.memory_space<vmem>>, vector<1x256xf32>
    %c0_4 = arith.constant 0 : index
    %c0_5 = arith.constant 0 : index
    %4 = vector.load %arg3[%c0_4, %c0_5] : memref<9x256xf32, #tpu.memory_space<vmem>>, vector<1x256xf32>
    %5 = arith.mulf %2, %3 : vector<1x256xf32>
    %6 = arith.addf %5, %4 : vector<1x256xf32>
    %c0_6 = arith.constant 0 : index
    %c0_7 = arith.constant 0 : index
    %7 = vector.load %arg14[%c0_6, %c0_7] : memref<576x256xf32, #tpu.memory_space<vmem>>, vector<1x256xf32>
    tpu.vector_store %arg14[%c0_6, %c0_7], %6 {strides = array<i32>} : memref<576x256xf32, #tpu.memory_space<vmem>>, vector<1x256xf32>,
    %c0_8 = arith.constant 0 : index
    %c0_9 = arith.constant 0 : index
    %c0_10 = arith.constant 0 : index
    %8 = vector.load %arg1[%c0_8, %c0_9, %c0_10] : memref<1x1x256xf32, #tpu.memory_space<vmem>>, vector<1x1x256xf32>
    %9 = vector.shape_cast %8 : vector<1x1x256xf32> to vector<1x256xf32>
    %c16_i32 = arith.constant 16 : i32
    %10 = tpu.dynamic_rotate %9 by %c16_i32 dim 1 : vector<1x256xf32>, i32 -> vector<1x256xf32>
    %c1 = arith.constant 1 : index
    %c0_11 = arith.constant 0 : index
    %11 = vector.load %arg2[%c1, %c0_11] : memref<9x256xf32, #tpu.memory_space<vmem>>, vector<1x256xf32>
    %c1_12 = arith.constant 1 : index
    %c0_13 = arith.constant 0 : index
    %12 = vector.load %arg3[%c1_12, %c0_13] : memref<9x256xf32, #tpu.memory_space<vmem>>, vector<1x256xf32>
    %13 = arith.mulf %10, %11 : vector<1x256xf32>
    %14 = arith.addf %13, %12 : vector<1x256xf32>
    %c1_14 = arith.constant 1 : index
    %c0_15 = arith.constant 0 : index
    %15 = vector.load %arg14[%c1_14, %c0_15] : memref<576x256xf32, #tpu.memory_space<vmem>>, vector<1x256xf32>
    tpu.vector_store %arg14[%c1_14, %c0_15], %14 {strides = array<i32>} : memref<576x256xf32, #tpu.memory_space<vmem>>, vector<1x256xf32>,
    %c0_16 = arith.constant 0 : index
    %c0_17 = arith.constant 0 : index
    %c0_18 = arith.constant 0 : index
    %16 = vector.load %arg1[%c0_16, %c0_17, %c0_18] : memref<1x1x256xf32, #tpu.memory_space<vmem>>, vector<1x1x256xf32>
    %17 = vector.shape_cast %16 : vector<1x1x256xf32> to vector<1x256xf32>
    %c15_i32 = arith.constant 15 : i32
    %18 = tpu.dynamic_rotate %17 by %c15_i32 dim 1 : vector<1x256xf32>, i32 -> vector<1x256xf32>
    %c2 = arith.constant 2 : index
    %c0_19 = arith.constant 0 : index
    %19 = vector.load %arg2[%c2, %c0_19] : memref<9x256xf32, #tpu.memory_space<vmem>>, vector<1x256xf32>
    %c2_20 = arith.constant 2 : index
    %c0_21 = arith.constant 0 : index
    %20 = vector.load %arg3[%c2_20, %c0_21] : memref<9x256xf32, #tpu.memory_space<vmem>>, vector<1x256xf32>
    %21 = arith.mulf %18, %19 : vector<1x256xf32>
    %22 = arith.addf %21, %20 : vector<1x256xf32>
    %c2_22 = arith.constant 2 : index
    %c0_23 = arith.constant 0 : index
    %23 = vector.load %arg14[%c2_22, %c0_23] : memref<576x256xf32, #tpu.memory_space<vmem>>, vector<1x256xf32>
    tpu.vector_store %arg14[%c2_22, %c0_23], %22 {strides = array<i32>} : memref<576x256xf32, #tpu.memory_space<vmem>>, vector<1x256xf32>,
    %c0_24 = arith.constant 0 : index
    %c0_25 = arith.constant 0 : index
    %c0_26 = arith.constant 0 : index
    %24 = vector.load %arg1[%c0_24, %c0_25, %c0_26] : memref<1x1x256xf32, #tpu.memory_space<vmem>>, vector<1x1x256xf32>
    %25 = vector.shape_cast %24 : vector<1x1x256xf32> to vector<1x256xf32>
    %c1_i32 = arith.constant 1 : i32
    %26 = tpu.dynamic_rotate %25 by %c1_i32 dim 1 : vector<1x256xf32>, i32 -> vector<1x256xf32>
    %c3 = arith.constant 3 : index
    %c0_27 = arith.constant 0 : index
    %27 = vector.load %arg2[%c3, %c0_27] : memref<9x256xf32, #tpu.memory_space<vmem>>, vector<1x256xf32>
    %c3_28 = arith.constant 3 : index
    %c0_29 = arith.constant 0 : index
    %28 = vector.load %arg3[%c3_28, %c0_29] : memref<9x256xf32, #tpu.memory_space<vmem>>, vector<1x256xf32>
    %29 = arith.mulf %26, %27 : vector<1x256xf32>
    %30 = arith.addf %29, %28 : vector<1x256xf32>
    %c3_30 = arith.constant 3 : index
    %c0_31 = arith.constant 0 : index
    %31 = vector.load %arg14[%c3_30, %c0_31] : memref<576x256xf32, #tpu.memory_space<vmem>>, vector<1x256xf32>
    tpu.vector_store %arg14[%c3_30, %c0_31], %30 {strides = array<i32>} : memref<576x256xf32, #tpu.memory_space<vmem>>, vector<1x256xf32>,
    %c0_32 = arith.constant 0 : index
    %c0_33 = arith.constant 0 : index
    %c0_34 = arith.constant 0 : index
    %32 = vector.load %arg1[%c0_32, %c0_33, %c0_34] : memref<1x1x256xf32, #tpu.memory_space<vmem>>, vector<1x1x256xf32>
    %33 = vector.shape_cast %32 : vector<1x1x256xf32> to vector<1x256xf32>
    %c4 = arith.constant 4 : index
    %c0_35 = arith.constant 0 : index
    %34 = vector.load %arg2[%c4, %c0_35] : memref<9x256xf32, #tpu.memory_space<vmem>>, vector<1x256xf32>
    %c4_36 = arith.constant 4 : index
    %c0_37 = arith.constant 0 : index
    %35 = vector.load %arg3[%c4_36, %c0_37] : memref<9x256xf32, #tpu.memory_space<vmem>>, vector<1x256xf32>
    %36 = arith.mulf %33, %34 : vector<1x256xf32>
    %37 = arith.addf %36, %35 : vector<1x256xf32>
    %c4_38 = arith.constant 4 : index
    %c0_39 = arith.constant 0 : index
    %38 = vector.load %arg14[%c4_38, %c0_39] : memref<576x256xf32, #tpu.memory_space<vmem>>, vector<1x256xf32>
    tpu.vector_store %arg14[%c4_38, %c0_39], %37 {strides = array<i32>} : memref<576x256xf32, #tpu.memory_space<vmem>>, vector<1x256xf32>,
    %c0_40 = arith.constant 0 : index
    %c0_41 = arith.constant 0 : index
    %c0_42 = arith.constant 0 : index
    %39 = vector.load %arg1[%c0_40, %c0_41, %c0_42] : memref<1x1x256xf32, #tpu.memory_space<vmem>>, vector<1x1x256xf32>
    %40 = vector.shape_cast %39 : vector<1x1x256xf32> to vector<1x256xf32>
    %c255_i32 = arith.constant 255 : i32
    %41 = tpu.dynamic_rotate %40 by %c255_i32 dim 1 : vector<1x256xf32>, i32 -> vector<1x256xf32>
    %c5 = arith.constant 5 : index
    %c0_43 = arith.constant 0 : index
    %42 = vector.load %arg2[%c5, %c0_43] : memref<9x256xf32, #tpu.memory_space<vmem>>, vector<1x256xf32>
    %c5_44 = arith.constant 5 : index
    %c0_45 = arith.constant 0 : index
    %43 = vector.load %arg3[%c5_44, %c0_45] : memref<9x256xf32, #tpu.memory_space<vmem>>, vector<1x256xf32>
    %44 = arith.mulf %41, %42 : vector<1x256xf32>
    %45 = arith.addf %44, %43 : vector<1x256xf32>
    %c5_46 = arith.constant 5 : index
    %c0_47 = arith.constant 0 : index
    %46 = vector.load %arg14[%c5_46, %c0_47] : memref<576x256xf32, #tpu.memory_space<vmem>>, vector<1x256xf32>
    tpu.vector_store %arg14[%c5_46, %c0_47], %45 {strides = array<i32>} : memref<576x256xf32, #tpu.memory_space<vmem>>, vector<1x256xf32>,
    %c0_48 = arith.constant 0 : index
    %c0_49 = arith.constant 0 : index
    %c0_50 = arith.constant 0 : index
    %47 = vector.load %arg1[%c0_48, %c0_49, %c0_50] : memref<1x1x256xf32, #tpu.memory_space<vmem>>, vector<1x1x256xf32>
    %48 = vector.shape_cast %47 : vector<1x1x256xf32> to vector<1x256xf32>
    %c241_i32 = arith.constant 241 : i32
    %49 = tpu.dynamic_rotate %48 by %c241_i32 dim 1 : vector<1x256xf32>, i32 -> vector<1x256xf32>
    %c6 = arith.constant 6 : index
    %c0_51 = arith.constant 0 : index
    %50 = vector.load %arg2[%c6, %c0_51] : memref<9x256xf32, #tpu.memory_space<vmem>>, vector<1x256xf32>
    %c6_52 = arith.constant 6 : index
    %c0_53 = arith.constant 0 : index
    %51 = vector.load %arg3[%c6_52, %c0_53] : memref<9x256xf32, #tpu.memory_space<vmem>>, vector<1x256xf32>
    %52 = arith.mulf %49, %50 : vector<1x256xf32>
    %53 = arith.addf %52, %51 : vector<1x256xf32>
    %c6_54 = arith.constant 6 : index
    %c0_55 = arith.constant 0 : index
    %54 = vector.load %arg14[%c6_54, %c0_55] : memref<576x256xf32, #tpu.memory_space<vmem>>, vector<1x256xf32>
    tpu.vector_store %arg14[%c6_54, %c0_55], %53 {strides = array<i32>} : memref<576x256xf32, #tpu.memory_space<vmem>>, vector<1x256xf32>,
    %c0_56 = arith.constant 0 : index
    %c0_57 = arith.constant 0 : index
    %c0_58 = arith.constant 0 : index
    %55 = vector.load %arg1[%c0_56, %c0_57, %c0_58] : memref<1x1x256xf32, #tpu.memory_space<vmem>>, vector<1x1x256xf32>
    %56 = vector.shape_cast %55 : vector<1x1x256xf32> to vector<1x256xf32>
    %c240_i32 = arith.constant 240 : i32
    %57 = tpu.dynamic_rotate %56 by %c240_i32 dim 1 : vector<1x256xf32>, i32 -> vector<1x256xf32>
    %c7 = arith.constant 7 : index
    %c0_59 = arith.constant 0 : index
    %58 = vector.load %arg2[%c7, %c0_59] : memref<9x256xf32, #tpu.memory_space<vmem>>, vector<1x256xf32>
    %c7_60 = arith.constant 7 : index
    %c0_61 = arith.constant 0 : index
    %59 = vector.load %arg3[%c7_60, %c0_61] : memref<9x256xf32, #tpu.memory_space<vmem>>, vector<1x256xf32>
    %60 = arith.mulf %57, %58 : vector<1x256xf32>
    %61 = arith.addf %60, %59 : vector<1x256xf32>
    %c7_62 = arith.constant 7 : index
    %c0_63 = arith.constant 0 : index
    %62 = vector.load %arg14[%c7_62, %c0_63] : memref<576x256xf32, #tpu.memory_space<vmem>>, vector<1x256xf32>
    tpu.vector_store %arg14[%c7_62, %c0_63], %61 {strides = array<i32>} : memref<576x256xf32, #tpu.memory_space<vmem>>, vector<1x256xf32>,
    %c0_64 = arith.constant 0 : index
    %c0_65 = arith.constant 0 : index
    %c0_66 = arith.constant 0 : index
    %63 = vector.load %arg1[%c0_64, %c0_65, %c0_66] : memref<1x1x256xf32, #tpu.memory_space<vmem>>, vector<1x1x256xf32>
    %64 = vector.shape_cast %63 : vector<1x1x256xf32> to vector<1x256xf32>
    %c239_i32 = arith.constant 239 : i32
    %65 = tpu.dynamic_rotate %64 by %c239_i32 dim 1 : vector<1x256xf32>, i32 -> vector<1x256xf32>
    %c8 = arith.constant 8 : index
    %c0_67 = arith.constant 0 : index
    %66 = vector.load %arg2[%c8, %c0_67] : memref<9x256xf32, #tpu.memory_space<vmem>>, vector<1x256xf32>
    %c8_68 = arith.constant 8 : index
    %c0_69 = arith.constant 0 : index
    %67 = vector.load %arg3[%c8_68, %c0_69] : memref<9x256xf32, #tpu.memory_space<vmem>>, vector<1x256xf32>
    %68 = arith.mulf %65, %66 : vector<1x256xf32>
    %69 = arith.addf %68, %67 : vector<1x256xf32>
    %c8_70 = arith.constant 8 : index
    %c0_71 = arith.constant 0 : index
    %70 = vector.load %arg14[%c8_70, %c0_71] : memref<576x256xf32, #tpu.memory_space<vmem>>, vector<1x256xf32>
    tpu.vector_store %arg14[%c8_70, %c0_71], %69 {strides = array<i32>} : memref<576x256xf32, #tpu.memory_space<vmem>>, vector<1x256xf32>,
    %c0_72 = arith.constant 0 : index
    %c0_73 = arith.constant 0 : index
    %71 = vector.load %arg4[%c0_72, %c0_73] : memref<64x9xf32, #tpu.memory_space<vmem>>, vector<64x9xf32>
    %c0_74 = arith.constant 0 : index
    %c0_75 = arith.constant 0 : index
    %72 = vector.load %arg14[%c0_74, %c0_75] : memref<576x256xf32, #tpu.memory_space<vmem>>, vector<9x256xf32>
    %cst = arith.constant dense<0.000000e+00> : vector<64x256xf32>
    %73 = tpu.matmul %71, %72, %cst {dimension_numbers = #tpu.dot_dimension_numbers<[1], [0], [0], [1], [0, 0, 1, 1], [], []>} : vector<64x9xf32>, vector<9x256xf32>, vector<64x256xf32> -> vector<64x256xf32>
    %c0_76 = arith.constant 0 : index
    %c0_77 = arith.constant 0 : index
    %74 = vector.load %arg5[%c0_76, %c0_77] : memref<64x1xf32, #tpu.memory_space<vmem>>, vector<64x1xf32>
    %75 = vector.broadcast %74 : vector<64x1xf32> to vector<64x256xf32>
    %76 = arith.addf %73, %75 : vector<64x256xf32>
    %cst_78 = arith.constant 0.000000e+00 : f32
    %77 = vector.broadcast %cst_78 : f32 to vector<64x256xf32>
    %78 = arith.maximumf %76, %77 : vector<64x256xf32>
    %c0_79 = arith.constant 0 : index
    %c0_80 = arith.constant 0 : index
    %79 = vector.load %arg13[%c0_79, %c0_80] : memref<64x256xf32, #tpu.memory_space<vmem>>, vector<64x256xf32>
    tpu.vector_store %arg13[%c0_79, %c0_80], %78 {strides = array<i32>} : memref<64x256xf32, #tpu.memory_space<vmem>>, vector<64x256xf32>,
    %c0_81 = arith.constant 0 : index
    %c0_82 = arith.constant 0 : index
    %80 = vector.load %arg13[%c0_81, %c0_82] : memref<64x256xf32, #tpu.memory_space<vmem>>, vector<64x256xf32>
    %c17_i32_83 = arith.constant 17 : i32
    %81 = tpu.dynamic_rotate %80 by %c17_i32_83 dim 1 : vector<64x256xf32>, i32 -> vector<64x256xf32>
    %c0_84 = arith.constant 0 : index
    %c0_85 = arith.constant 0 : index
    %82 = vector.load %arg2[%c0_84, %c0_85] : memref<9x256xf32, #tpu.memory_space<vmem>>, vector<1x256xf32>
    %c0_86 = arith.constant 0 : index
    %c0_87 = arith.constant 0 : index
    %83 = vector.load %arg3[%c0_86, %c0_87] : memref<9x256xf32, #tpu.memory_space<vmem>>, vector<1x256xf32>
    %84 = vector.broadcast %82 : vector<1x256xf32> to vector<64x256xf32>
    %85 = arith.mulf %81, %84 : vector<64x256xf32>
    %86 = vector.broadcast %83 : vector<1x256xf32> to vector<64x256xf32>
    %87 = arith.addf %85, %86 : vector<64x256xf32>
    %c0_88 = arith.constant 0 : index
    %c0_89 = arith.constant 0 : index
    %88 = vector.load %arg14[%c0_88, %c0_89] : memref<576x256xf32, #tpu.memory_space<vmem>>, vector<64x256xf32>
    tpu.vector_store %arg14[%c0_88, %c0_89], %87 {strides = array<i32>} : memref<576x256xf32, #tpu.memory_space<vmem>>, vector<64x256xf32>,
    %c0_90 = arith.constant 0 : index
    %c0_91 = arith.constant 0 : index
    %89 = vector.load %arg13[%c0_90, %c0_91] : memref<64x256xf32, #tpu.memory_space<vmem>>, vector<64x256xf32>
    %c16_i32_92 = arith.constant 16 : i32
    %90 = tpu.dynamic_rotate %89 by %c16_i32_92 dim 1 : vector<64x256xf32>, i32 -> vector<64x256xf32>
    %c1_93 = arith.constant 1 : index
    %c0_94 = arith.constant 0 : index
    %91 = vector.load %arg2[%c1_93, %c0_94] : memref<9x256xf32, #tpu.memory_space<vmem>>, vector<1x256xf32>
    %c1_95 = arith.constant 1 : index
    %c0_96 = arith.constant 0 : index
    %92 = vector.load %arg3[%c1_95, %c0_96] : memref<9x256xf32, #tpu.memory_space<vmem>>, vector<1x256xf32>
    %93 = vector.broadcast %91 : vector<1x256xf32> to vector<64x256xf32>
    %94 = arith.mulf %90, %93 : vector<64x256xf32>
    %95 = vector.broadcast %92 : vector<1x256xf32> to vector<64x256xf32>
    %96 = arith.addf %94, %95 : vector<64x256xf32>
    %c64 = arith.constant 64 : index
    %c0_97 = arith.constant 0 : index
    %97 = vector.load %arg14[%c64, %c0_97] : memref<576x256xf32, #tpu.memory_space<vmem>>, vector<64x256xf32>
    tpu.vector_store %arg14[%c64, %c0_97], %96 {strides = array<i32>} : memref<576x256xf32, #tpu.memory_space<vmem>>, vector<64x256xf32>,
    %c0_98 = arith.constant 0 : index
    %c0_99 = arith.constant 0 : index
    %98 = vector.load %arg13[%c0_98, %c0_99] : memref<64x256xf32, #tpu.memory_space<vmem>>, vector<64x256xf32>
    %c15_i32_100 = arith.constant 15 : i32
    %99 = tpu.dynamic_rotate %98 by %c15_i32_100 dim 1 : vector<64x256xf32>, i32 -> vector<64x256xf32>
    %c2_101 = arith.constant 2 : index
    %c0_102 = arith.constant 0 : index
    %100 = vector.load %arg2[%c2_101, %c0_102] : memref<9x256xf32, #tpu.memory_space<vmem>>, vector<1x256xf32>
    %c2_103 = arith.constant 2 : index
    %c0_104 = arith.constant 0 : index
    %101 = vector.load %arg3[%c2_103, %c0_104] : memref<9x256xf32, #tpu.memory_space<vmem>>, vector<1x256xf32>
    %102 = vector.broadcast %100 : vector<1x256xf32> to vector<64x256xf32>
    %103 = arith.mulf %99, %102 : vector<64x256xf32>
    %104 = vector.broadcast %101 : vector<1x256xf32> to vector<64x256xf32>
    %105 = arith.addf %103, %104 : vector<64x256xf32>
    %c128 = arith.constant 128 : index
    %c0_105 = arith.constant 0 : index
    %106 = vector.load %arg14[%c128, %c0_105] : memref<576x256xf32, #tpu.memory_space<vmem>>, vector<64x256xf32>
    tpu.vector_store %arg14[%c128, %c0_105], %105 {strides = array<i32>} : memref<576x256xf32, #tpu.memory_space<vmem>>, vector<64x256xf32>,
    %c0_106 = arith.constant 0 : index
    %c0_107 = arith.constant 0 : index
    %107 = vector.load %arg13[%c0_106, %c0_107] : memref<64x256xf32, #tpu.memory_space<vmem>>, vector<64x256xf32>
    %c1_i32_108 = arith.constant 1 : i32
    %108 = tpu.dynamic_rotate %107 by %c1_i32_108 dim 1 : vector<64x256xf32>, i32 -> vector<64x256xf32>
    %c3_109 = arith.constant 3 : index
    %c0_110 = arith.constant 0 : index
    %109 = vector.load %arg2[%c3_109, %c0_110] : memref<9x256xf32, #tpu.memory_space<vmem>>, vector<1x256xf32>
    %c3_111 = arith.constant 3 : index
    %c0_112 = arith.constant 0 : index
    %110 = vector.load %arg3[%c3_111, %c0_112] : memref<9x256xf32, #tpu.memory_space<vmem>>, vector<1x256xf32>
    %111 = vector.broadcast %109 : vector<1x256xf32> to vector<64x256xf32>
    %112 = arith.mulf %108, %111 : vector<64x256xf32>
    %113 = vector.broadcast %110 : vector<1x256xf32> to vector<64x256xf32>
    %114 = arith.addf %112, %113 : vector<64x256xf32>
    %c192 = arith.constant 192 : index
    %c0_113 = arith.constant 0 : index
    %115 = vector.load %arg14[%c192, %c0_113] : memref<576x256xf32, #tpu.memory_space<vmem>>, vector<64x256xf32>
    tpu.vector_store %arg14[%c192, %c0_113], %114 {strides = array<i32>} : memref<576x256xf32, #tpu.memory_space<vmem>>, vector<64x256xf32>,
    %c0_114 = arith.constant 0 : index
    %c0_115 = arith.constant 0 : index
    %116 = vector.load %arg13[%c0_114, %c0_115] : memref<64x256xf32, #tpu.memory_space<vmem>>, vector<64x256xf32>
    %c4_116 = arith.constant 4 : index
    %c0_117 = arith.constant 0 : index
    %117 = vector.load %arg2[%c4_116, %c0_117] : memref<9x256xf32, #tpu.memory_space<vmem>>, vector<1x256xf32>
    %c4_118 = arith.constant 4 : index
    %c0_119 = arith.constant 0 : index
    %118 = vector.load %arg3[%c4_118, %c0_119] : memref<9x256xf32, #tpu.memory_space<vmem>>, vector<1x256xf32>
    %119 = vector.broadcast %117 : vector<1x256xf32> to vector<64x256xf32>
    %120 = arith.mulf %116, %119 : vector<64x256xf32>
    %121 = vector.broadcast %118 : vector<1x256xf32> to vector<64x256xf32>
    %122 = arith.addf %120, %121 : vector<64x256xf32>
    %c256 = arith.constant 256 : index
    %c0_120 = arith.constant 0 : index
    %123 = vector.load %arg14[%c256, %c0_120] : memref<576x256xf32, #tpu.memory_space<vmem>>, vector<64x256xf32>
    tpu.vector_store %arg14[%c256, %c0_120], %122 {strides = array<i32>} : memref<576x256xf32, #tpu.memory_space<vmem>>, vector<64x256xf32>,
    %c0_121 = arith.constant 0 : index
    %c0_122 = arith.constant 0 : index
    %124 = vector.load %arg13[%c0_121, %c0_122] : memref<64x256xf32, #tpu.memory_space<vmem>>, vector<64x256xf32>
    %c255_i32_123 = arith.constant 255 : i32
    %125 = tpu.dynamic_rotate %124 by %c255_i32_123 dim 1 : vector<64x256xf32>, i32 -> vector<64x256xf32>
    %c5_124 = arith.constant 5 : index
    %c0_125 = arith.constant 0 : index
    %126 = vector.load %arg2[%c5_124, %c0_125] : memref<9x256xf32, #tpu.memory_space<vmem>>, vector<1x256xf32>
    %c5_126 = arith.constant 5 : index
    %c0_127 = arith.constant 0 : index
    %127 = vector.load %arg3[%c5_126, %c0_127] : memref<9x256xf32, #tpu.memory_space<vmem>>, vector<1x256xf32>
    %128 = vector.broadcast %126 : vector<1x256xf32> to vector<64x256xf32>
    %129 = arith.mulf %125, %128 : vector<64x256xf32>
    %130 = vector.broadcast %127 : vector<1x256xf32> to vector<64x256xf32>
    %131 = arith.addf %129, %130 : vector<64x256xf32>
    %c320 = arith.constant 320 : index
    %c0_128 = arith.constant 0 : index
    %132 = vector.load %arg14[%c320, %c0_128] : memref<576x256xf32, #tpu.memory_space<vmem>>, vector<64x256xf32>
    tpu.vector_store %arg14[%c320, %c0_128], %131 {strides = array<i32>} : memref<576x256xf32, #tpu.memory_space<vmem>>, vector<64x256xf32>,
    %c0_129 = arith.constant 0 : index
    %c0_130 = arith.constant 0 : index
    %133 = vector.load %arg13[%c0_129, %c0_130] : memref<64x256xf32, #tpu.memory_space<vmem>>, vector<64x256xf32>
    %c241_i32_131 = arith.constant 241 : i32
    %134 = tpu.dynamic_rotate %133 by %c241_i32_131 dim 1 : vector<64x256xf32>, i32 -> vector<64x256xf32>
    %c6_132 = arith.constant 6 : index
    %c0_133 = arith.constant 0 : index
    %135 = vector.load %arg2[%c6_132, %c0_133] : memref<9x256xf32, #tpu.memory_space<vmem>>, vector<1x256xf32>
    %c6_134 = arith.constant 6 : index
    %c0_135 = arith.constant 0 : index
    %136 = vector.load %arg3[%c6_134, %c0_135] : memref<9x256xf32, #tpu.memory_space<vmem>>, vector<1x256xf32>
    %137 = vector.broadcast %135 : vector<1x256xf32> to vector<64x256xf32>
    %138 = arith.mulf %134, %137 : vector<64x256xf32>
    %139 = vector.broadcast %136 : vector<1x256xf32> to vector<64x256xf32>
    %140 = arith.addf %138, %139 : vector<64x256xf32>
    %c384 = arith.constant 384 : index
    %c0_136 = arith.constant 0 : index
    %141 = vector.load %arg14[%c384, %c0_136] : memref<576x256xf32, #tpu.memory_space<vmem>>, vector<64x256xf32>
    tpu.vector_store %arg14[%c384, %c0_136], %140 {strides = array<i32>} : memref<576x256xf32, #tpu.memory_space<vmem>>, vector<64x256xf32>,
    %c0_137 = arith.constant 0 : index
    %c0_138 = arith.constant 0 : index
    %142 = vector.load %arg13[%c0_137, %c0_138] : memref<64x256xf32, #tpu.memory_space<vmem>>, vector<64x256xf32>
    %c240_i32_139 = arith.constant 240 : i32
    %143 = tpu.dynamic_rotate %142 by %c240_i32_139 dim 1 : vector<64x256xf32>, i32 -> vector<64x256xf32>
    %c7_140 = arith.constant 7 : index
    %c0_141 = arith.constant 0 : index
    %144 = vector.load %arg2[%c7_140, %c0_141] : memref<9x256xf32, #tpu.memory_space<vmem>>, vector<1x256xf32>
    %c7_142 = arith.constant 7 : index
    %c0_143 = arith.constant 0 : index
    %145 = vector.load %arg3[%c7_142, %c0_143] : memref<9x256xf32, #tpu.memory_space<vmem>>, vector<1x256xf32>
    %146 = vector.broadcast %144 : vector<1x256xf32> to vector<64x256xf32>
    %147 = arith.mulf %143, %146 : vector<64x256xf32>
    %148 = vector.broadcast %145 : vector<1x256xf32> to vector<64x256xf32>
    %149 = arith.addf %147, %148 : vector<64x256xf32>
    %c448 = arith.constant 448 : index
    %c0_144 = arith.constant 0 : index
    %150 = vector.load %arg14[%c448, %c0_144] : memref<576x256xf32, #tpu.memory_space<vmem>>, vector<64x256xf32>
    tpu.vector_store %arg14[%c448, %c0_144], %149 {strides = array<i32>} : memref<576x256xf32, #tpu.memory_space<vmem>>, vector<64x256xf32>,
    %c0_145 = arith.constant 0 : index
    %c0_146 = arith.constant 0 : index
    %151 = vector.load %arg13[%c0_145, %c0_146] : memref<64x256xf32, #tpu.memory_space<vmem>>, vector<64x256xf32>
    %c239_i32_147 = arith.constant 239 : i32
    %152 = tpu.dynamic_rotate %151 by %c239_i32_147 dim 1 : vector<64x256xf32>, i32 -> vector<64x256xf32>
    %c8_148 = arith.constant 8 : index
    %c0_149 = arith.constant 0 : index
    %153 = vector.load %arg2[%c8_148, %c0_149] : memref<9x256xf32, #tpu.memory_space<vmem>>, vector<1x256xf32>
    %c8_150 = arith.constant 8 : index
    %c0_151 = arith.constant 0 : index
    %154 = vector.load %arg3[%c8_150, %c0_151] : memref<9x256xf32, #tpu.memory_space<vmem>>, vector<1x256xf32>
    %155 = vector.broadcast %153 : vector<1x256xf32> to vector<64x256xf32>
    %156 = arith.mulf %152, %155 : vector<64x256xf32>
    %157 = vector.broadcast %154 : vector<1x256xf32> to vector<64x256xf32>
    %158 = arith.addf %156, %157 : vector<64x256xf32>
    %c512 = arith.constant 512 : index
    %c0_152 = arith.constant 0 : index
    %159 = vector.load %arg14[%c512, %c0_152] : memref<576x256xf32, #tpu.memory_space<vmem>>, vector<64x256xf32>
    tpu.vector_store %arg14[%c512, %c0_152], %158 {strides = array<i32>} : memref<576x256xf32, #tpu.memory_space<vmem>>, vector<64x256xf32>,
    %c0_153 = arith.constant 0 : index
    %c0_154 = arith.constant 0 : index
    %160 = vector.load %arg6[%c0_153, %c0_154] : memref<64x576xf32, #tpu.memory_space<vmem>>, vector<64x576xf32>
    %c0_155 = arith.constant 0 : index
    %c0_156 = arith.constant 0 : index
    %161 = vector.load %arg14[%c0_155, %c0_156] : memref<576x256xf32, #tpu.memory_space<vmem>>, vector<576x256xf32>
    %cst_157 = arith.constant dense<0.000000e+00> : vector<64x256xf32>
    %162 = tpu.matmul %160, %161, %cst_157 {dimension_numbers = #tpu.dot_dimension_numbers<[1], [0], [0], [1], [0, 0, 1, 1], [], []>} : vector<64x576xf32>, vector<576x256xf32>, vector<64x256xf32> -> vector<64x256xf32>
    %c0_158 = arith.constant 0 : index
    %c0_159 = arith.constant 0 : index
    %163 = vector.load %arg7[%c0_158, %c0_159] : memref<64x1xf32, #tpu.memory_space<vmem>>, vector<64x1xf32>
    %164 = vector.broadcast %163 : vector<64x1xf32> to vector<64x256xf32>
    %165 = arith.addf %162, %164 : vector<64x256xf32>
    %cst_160 = arith.constant 0.000000e+00 : f32
    %166 = vector.broadcast %cst_160 : f32 to vector<64x256xf32>
    %167 = arith.maximumf %165, %166 : vector<64x256xf32>
    %c0_161 = arith.constant 0 : index
    %c0_162 = arith.constant 0 : index
    %168 = vector.load %arg13[%c0_161, %c0_162] : memref<64x256xf32, #tpu.memory_space<vmem>>, vector<64x256xf32>
    tpu.vector_store %arg13[%c0_161, %c0_162], %167 {strides = array<i32>} : memref<64x256xf32, #tpu.memory_space<vmem>>, vector<64x256xf32>,
    %c0_163 = arith.constant 0 : index
    %c0_164 = arith.constant 0 : index
    %169 = vector.load %arg13[%c0_163, %c0_164] : memref<64x256xf32, #tpu.memory_space<vmem>>, vector<64x256xf32>
    %c17_i32_165 = arith.constant 17 : i32
    %170 = tpu.dynamic_rotate %169 by %c17_i32_165 dim 1 : vector<64x256xf32>, i32 -> vector<64x256xf32>
    %c0_166 = arith.constant 0 : index
    %c0_167 = arith.constant 0 : index
    %171 = vector.load %arg2[%c0_166, %c0_167] : memref<9x256xf32, #tpu.memory_space<vmem>>, vector<1x256xf32>
    %c0_168 = arith.constant 0 : index
    %c0_169 = arith.constant 0 : index
    %172 = vector.load %arg3[%c0_168, %c0_169] : memref<9x256xf32, #tpu.memory_space<vmem>>, vector<1x256xf32>
    %173 = vector.broadcast %171 : vector<1x256xf32> to vector<64x256xf32>
    %174 = arith.mulf %170, %173 : vector<64x256xf32>
    %175 = vector.broadcast %172 : vector<1x256xf32> to vector<64x256xf32>
    %176 = arith.addf %174, %175 : vector<64x256xf32>
    %c0_170 = arith.constant 0 : index
    %c0_171 = arith.constant 0 : index
    %177 = vector.load %arg14[%c0_170, %c0_171] : memref<576x256xf32, #tpu.memory_space<vmem>>, vector<64x256xf32>
    tpu.vector_store %arg14[%c0_170, %c0_171], %176 {strides = array<i32>} : memref<576x256xf32, #tpu.memory_space<vmem>>, vector<64x256xf32>,
    %c0_172 = arith.constant 0 : index
    %c0_173 = arith.constant 0 : index
    %178 = vector.load %arg13[%c0_172, %c0_173] : memref<64x256xf32, #tpu.memory_space<vmem>>, vector<64x256xf32>
    %c16_i32_174 = arith.constant 16 : i32
    %179 = tpu.dynamic_rotate %178 by %c16_i32_174 dim 1 : vector<64x256xf32>, i32 -> vector<64x256xf32>
    %c1_175 = arith.constant 1 : index
    %c0_176 = arith.constant 0 : index
    %180 = vector.load %arg2[%c1_175, %c0_176] : memref<9x256xf32, #tpu.memory_space<vmem>>, vector<1x256xf32>
    %c1_177 = arith.constant 1 : index
    %c0_178 = arith.constant 0 : index
    %181 = vector.load %arg3[%c1_177, %c0_178] : memref<9x256xf32, #tpu.memory_space<vmem>>, vector<1x256xf32>
    %182 = vector.broadcast %180 : vector<1x256xf32> to vector<64x256xf32>
    %183 = arith.mulf %179, %182 : vector<64x256xf32>
    %184 = vector.broadcast %181 : vector<1x256xf32> to vector<64x256xf32>
    %185 = arith.addf %183, %184 : vector<64x256xf32>
    %c64_179 = arith.constant 64 : index
    %c0_180 = arith.constant 0 : index
    %186 = vector.load %arg14[%c64_179, %c0_180] : memref<576x256xf32, #tpu.memory_space<vmem>>, vector<64x256xf32>
    tpu.vector_store %arg14[%c64_179, %c0_180], %185 {strides = array<i32>} : memref<576x256xf32, #tpu.memory_space<vmem>>, vector<64x256xf32>,
    %c0_181 = arith.constant 0 : index
    %c0_182 = arith.constant 0 : index
    %187 = vector.load %arg13[%c0_181, %c0_182] : memref<64x256xf32, #tpu.memory_space<vmem>>, vector<64x256xf32>
    %c15_i32_183 = arith.constant 15 : i32
    %188 = tpu.dynamic_rotate %187 by %c15_i32_183 dim 1 : vector<64x256xf32>, i32 -> vector<64x256xf32>
    %c2_184 = arith.constant 2 : index
    %c0_185 = arith.constant 0 : index
    %189 = vector.load %arg2[%c2_184, %c0_185] : memref<9x256xf32, #tpu.memory_space<vmem>>, vector<1x256xf32>
    %c2_186 = arith.constant 2 : index
    %c0_187 = arith.constant 0 : index
    %190 = vector.load %arg3[%c2_186, %c0_187] : memref<9x256xf32, #tpu.memory_space<vmem>>, vector<1x256xf32>
    %191 = vector.broadcast %189 : vector<1x256xf32> to vector<64x256xf32>
    %192 = arith.mulf %188, %191 : vector<64x256xf32>
    %193 = vector.broadcast %190 : vector<1x256xf32> to vector<64x256xf32>
    %194 = arith.addf %192, %193 : vector<64x256xf32>
    %c128_188 = arith.constant 128 : index
    %c0_189 = arith.constant 0 : index
    %195 = vector.load %arg14[%c128_188, %c0_189] : memref<576x256xf32, #tpu.memory_space<vmem>>, vector<64x256xf32>
    tpu.vector_store %arg14[%c128_188, %c0_189], %194 {strides = array<i32>} : memref<576x256xf32, #tpu.memory_space<vmem>>, vector<64x256xf32>,
    %c0_190 = arith.constant 0 : index
    %c0_191 = arith.constant 0 : index
    %196 = vector.load %arg13[%c0_190, %c0_191] : memref<64x256xf32, #tpu.memory_space<vmem>>, vector<64x256xf32>
    %c1_i32_192 = arith.constant 1 : i32
    %197 = tpu.dynamic_rotate %196 by %c1_i32_192 dim 1 : vector<64x256xf32>, i32 -> vector<64x256xf32>
    %c3_193 = arith.constant 3 : index
    %c0_194 = arith.constant 0 : index
    %198 = vector.load %arg2[%c3_193, %c0_194] : memref<9x256xf32, #tpu.memory_space<vmem>>, vector<1x256xf32>
    %c3_195 = arith.constant 3 : index
    %c0_196 = arith.constant 0 : index
    %199 = vector.load %arg3[%c3_195, %c0_196] : memref<9x256xf32, #tpu.memory_space<vmem>>, vector<1x256xf32>
    %200 = vector.broadcast %198 : vector<1x256xf32> to vector<64x256xf32>
    %201 = arith.mulf %197, %200 : vector<64x256xf32>
    %202 = vector.broadcast %199 : vector<1x256xf32> to vector<64x256xf32>
    %203 = arith.addf %201, %202 : vector<64x256xf32>
    %c192_197 = arith.constant 192 : index
    %c0_198 = arith.constant 0 : index
    %204 = vector.load %arg14[%c192_197, %c0_198] : memref<576x256xf32, #tpu.memory_space<vmem>>, vector<64x256xf32>
    tpu.vector_store %arg14[%c192_197, %c0_198], %203 {strides = array<i32>} : memref<576x256xf32, #tpu.memory_space<vmem>>, vector<64x256xf32>,
    %c0_199 = arith.constant 0 : index
    %c0_200 = arith.constant 0 : index
    %205 = vector.load %arg13[%c0_199, %c0_200] : memref<64x256xf32, #tpu.memory_space<vmem>>, vector<64x256xf32>
    %c4_201 = arith.constant 4 : index
    %c0_202 = arith.constant 0 : index
    %206 = vector.load %arg2[%c4_201, %c0_202] : memref<9x256xf32, #tpu.memory_space<vmem>>, vector<1x256xf32>
    %c4_203 = arith.constant 4 : index
    %c0_204 = arith.constant 0 : index
    %207 = vector.load %arg3[%c4_203, %c0_204] : memref<9x256xf32, #tpu.memory_space<vmem>>, vector<1x256xf32>
    %208 = vector.broadcast %206 : vector<1x256xf32> to vector<64x256xf32>
    %209 = arith.mulf %205, %208 : vector<64x256xf32>
    %210 = vector.broadcast %207 : vector<1x256xf32> to vector<64x256xf32>
    %211 = arith.addf %209, %210 : vector<64x256xf32>
    %c256_205 = arith.constant 256 : index
    %c0_206 = arith.constant 0 : index
    %212 = vector.load %arg14[%c256_205, %c0_206] : memref<576x256xf32, #tpu.memory_space<vmem>>, vector<64x256xf32>
    tpu.vector_store %arg14[%c256_205, %c0_206], %211 {strides = array<i32>} : memref<576x256xf32, #tpu.memory_space<vmem>>, vector<64x256xf32>,
    %c0_207 = arith.constant 0 : index
    %c0_208 = arith.constant 0 : index
    %213 = vector.load %arg13[%c0_207, %c0_208] : memref<64x256xf32, #tpu.memory_space<vmem>>, vector<64x256xf32>
    %c255_i32_209 = arith.constant 255 : i32
    %214 = tpu.dynamic_rotate %213 by %c255_i32_209 dim 1 : vector<64x256xf32>, i32 -> vector<64x256xf32>
    %c5_210 = arith.constant 5 : index
    %c0_211 = arith.constant 0 : index
    %215 = vector.load %arg2[%c5_210, %c0_211] : memref<9x256xf32, #tpu.memory_space<vmem>>, vector<1x256xf32>
    %c5_212 = arith.constant 5 : index
    %c0_213 = arith.constant 0 : index
    %216 = vector.load %arg3[%c5_212, %c0_213] : memref<9x256xf32, #tpu.memory_space<vmem>>, vector<1x256xf32>
    %217 = vector.broadcast %215 : vector<1x256xf32> to vector<64x256xf32>
    %218 = arith.mulf %214, %217 : vector<64x256xf32>
    %219 = vector.broadcast %216 : vector<1x256xf32> to vector<64x256xf32>
    %220 = arith.addf %218, %219 : vector<64x256xf32>
    %c320_214 = arith.constant 320 : index
    %c0_215 = arith.constant 0 : index
    %221 = vector.load %arg14[%c320_214, %c0_215] : memref<576x256xf32, #tpu.memory_space<vmem>>, vector<64x256xf32>
    tpu.vector_store %arg14[%c320_214, %c0_215], %220 {strides = array<i32>} : memref<576x256xf32, #tpu.memory_space<vmem>>, vector<64x256xf32>,
    %c0_216 = arith.constant 0 : index
    %c0_217 = arith.constant 0 : index
    %222 = vector.load %arg13[%c0_216, %c0_217] : memref<64x256xf32, #tpu.memory_space<vmem>>, vector<64x256xf32>
    %c241_i32_218 = arith.constant 241 : i32
    %223 = tpu.dynamic_rotate %222 by %c241_i32_218 dim 1 : vector<64x256xf32>, i32 -> vector<64x256xf32>
    %c6_219 = arith.constant 6 : index
    %c0_220 = arith.constant 0 : index
    %224 = vector.load %arg2[%c6_219, %c0_220] : memref<9x256xf32, #tpu.memory_space<vmem>>, vector<1x256xf32>
    %c6_221 = arith.constant 6 : index
    %c0_222 = arith.constant 0 : index
    %225 = vector.load %arg3[%c6_221, %c0_222] : memref<9x256xf32, #tpu.memory_space<vmem>>, vector<1x256xf32>
    %226 = vector.broadcast %224 : vector<1x256xf32> to vector<64x256xf32>
    %227 = arith.mulf %223, %226 : vector<64x256xf32>
    %228 = vector.broadcast %225 : vector<1x256xf32> to vector<64x256xf32>
    %229 = arith.addf %227, %228 : vector<64x256xf32>
    %c384_223 = arith.constant 384 : index
    %c0_224 = arith.constant 0 : index
    %230 = vector.load %arg14[%c384_223, %c0_224] : memref<576x256xf32, #tpu.memory_space<vmem>>, vector<64x256xf32>
    tpu.vector_store %arg14[%c384_223, %c0_224], %229 {strides = array<i32>} : memref<576x256xf32, #tpu.memory_space<vmem>>, vector<64x256xf32>,
    %c0_225 = arith.constant 0 : index
    %c0_226 = arith.constant 0 : index
    %231 = vector.load %arg13[%c0_225, %c0_226] : memref<64x256xf32, #tpu.memory_space<vmem>>, vector<64x256xf32>
    %c240_i32_227 = arith.constant 240 : i32
    %232 = tpu.dynamic_rotate %231 by %c240_i32_227 dim 1 : vector<64x256xf32>, i32 -> vector<64x256xf32>
    %c7_228 = arith.constant 7 : index
    %c0_229 = arith.constant 0 : index
    %233 = vector.load %arg2[%c7_228, %c0_229] : memref<9x256xf32, #tpu.memory_space<vmem>>, vector<1x256xf32>
    %c7_230 = arith.constant 7 : index
    %c0_231 = arith.constant 0 : index
    %234 = vector.load %arg3[%c7_230, %c0_231] : memref<9x256xf32, #tpu.memory_space<vmem>>, vector<1x256xf32>
    %235 = vector.broadcast %233 : vector<1x256xf32> to vector<64x256xf32>
    %236 = arith.mulf %232, %235 : vector<64x256xf32>
    %237 = vector.broadcast %234 : vector<1x256xf32> to vector<64x256xf32>
    %238 = arith.addf %236, %237 : vector<64x256xf32>
    %c448_232 = arith.constant 448 : index
    %c0_233 = arith.constant 0 : index
    %239 = vector.load %arg14[%c448_232, %c0_233] : memref<576x256xf32, #tpu.memory_space<vmem>>, vector<64x256xf32>
    tpu.vector_store %arg14[%c448_232, %c0_233], %238 {strides = array<i32>} : memref<576x256xf32, #tpu.memory_space<vmem>>, vector<64x256xf32>,
    %c0_234 = arith.constant 0 : index
    %c0_235 = arith.constant 0 : index
    %240 = vector.load %arg13[%c0_234, %c0_235] : memref<64x256xf32, #tpu.memory_space<vmem>>, vector<64x256xf32>
    %c239_i32_236 = arith.constant 239 : i32
    %241 = tpu.dynamic_rotate %240 by %c239_i32_236 dim 1 : vector<64x256xf32>, i32 -> vector<64x256xf32>
    %c8_237 = arith.constant 8 : index
    %c0_238 = arith.constant 0 : index
    %242 = vector.load %arg2[%c8_237, %c0_238] : memref<9x256xf32, #tpu.memory_space<vmem>>, vector<1x256xf32>
    %c8_239 = arith.constant 8 : index
    %c0_240 = arith.constant 0 : index
    %243 = vector.load %arg3[%c8_239, %c0_240] : memref<9x256xf32, #tpu.memory_space<vmem>>, vector<1x256xf32>
    %244 = vector.broadcast %242 : vector<1x256xf32> to vector<64x256xf32>
    %245 = arith.mulf %241, %244 : vector<64x256xf32>
    %246 = vector.broadcast %243 : vector<1x256xf32> to vector<64x256xf32>
    %247 = arith.addf %245, %246 : vector<64x256xf32>
    %c512_241 = arith.constant 512 : index
    %c0_242 = arith.constant 0 : index
    %248 = vector.load %arg14[%c512_241, %c0_242] : memref<576x256xf32, #tpu.memory_space<vmem>>, vector<64x256xf32>
    tpu.vector_store %arg14[%c512_241, %c0_242], %247 {strides = array<i32>} : memref<576x256xf32, #tpu.memory_space<vmem>>, vector<64x256xf32>,
    %c0_243 = arith.constant 0 : index
    %c0_244 = arith.constant 0 : index
    %249 = vector.load %arg8[%c0_243, %c0_244] : memref<1x576xf32, #tpu.memory_space<vmem>>, vector<1x576xf32>
    %c0_245 = arith.constant 0 : index
    %c0_246 = arith.constant 0 : index
    %250 = vector.load %arg14[%c0_245, %c0_246] : memref<576x256xf32, #tpu.memory_space<vmem>>, vector<576x256xf32>
    %cst_247 = arith.constant dense<0.000000e+00> : vector<1x256xf32>
    %251 = tpu.matmul %249, %250, %cst_247 {dimension_numbers = #tpu.dot_dimension_numbers<[1], [0], [0], [1], [0, 0, 1, 1], [], []>} : vector<1x576xf32>, vector<576x256xf32>, vector<1x256xf32> -> vector<1x256xf32>
    %c0_248 = arith.constant 0 : index
    %c0_249 = arith.constant 0 : index
    %252 = vector.load %arg9[%c0_248, %c0_249] : memref<1x1xf32, #tpu.memory_space<vmem>>, vector<1x1xf32>
    %253 = vector.broadcast %252 : vector<1x1xf32> to vector<1x256xf32>
    %254 = arith.addf %251, %253 : vector<1x256xf32>
    %cst_250 = arith.constant 0.000000e+00 : f32
    %255 = vector.broadcast %cst_250 : f32 to vector<1x256xf32>
    %256 = arith.maximumf %254, %255 : vector<1x256xf32>
    %c0_251 = arith.constant 0 : index
    %c0_252 = arith.constant 0 : index
    %257 = vector.load %arg10[%c0_251, %c0_252] : memref<256x256xf32, #tpu.memory_space<vmem>>, vector<256x256xf32>
    %cst_253 = arith.constant dense<0.000000e+00> : vector<1x256xf32>
    %258 = tpu.matmul %256, %257, %cst_253 {dimension_numbers = #tpu.dot_dimension_numbers<[1], [0], [0], [1], [0, 0, 1, 1], [], []>} : vector<1x256xf32>, vector<256x256xf32>, vector<1x256xf32> -> vector<1x256xf32>
    %c0_254 = arith.constant 0 : index
    %c0_255 = arith.constant 0 : index
    %259 = vector.load %arg11[%c0_254, %c0_255] : memref<1x256xf32, #tpu.memory_space<vmem>>, vector<1x256xf32>
    %260 = arith.addf %258, %259 : vector<1x256xf32>
    %c0_256 = arith.constant 0 : index
    %c0_257 = arith.constant 0 : index
    %261 = vector.load %arg15[%c0_256, %c0_257] : memref<1x256xf32, #tpu.memory_space<vmem>>, vector<1x256xf32>
    tpu.vector_store %arg15[%c0_256, %c0_257], %260 {strides = array<i32>} : memref<1x256xf32, #tpu.memory_space<vmem>>, vector<1x256xf32>,
    %c0_258 = arith.constant 0 : index
    %c0_259 = arith.constant 0 : index
    %262 = vector.load %arg15[%c0_258, %c0_259] : memref<1x256xf32, #tpu.memory_space<vmem>>, vector<1x256xf32>
    %c0_260 = arith.constant 0 : index
    %c0_261 = arith.constant 0 : index
    %c0_262 = arith.constant 0 : index
    %263 = vector.load %arg12[%c0_260, %c0_261, %c0_262] : memref<1x1x256xf32, #tpu.memory_space<vmem>>, vector<1x1x256xf32>
    %264 = vector.shape_cast %263 : vector<1x1x256xf32> to vector<1x256xf32>
    %265 = vector.shape_cast %262 : vector<1x256xf32> to vector<1x1x256xf32>
    tpu.vector_store %arg12[%c0_260, %c0_261, %c0_262], %265 {strides = array<i32>} : memref<1x1x256xf32, #tpu.memory_space<vmem>>, vector<1x1x256xf32>,
    return
  }
  func.func @transform_0(%arg0: i32) -> (i32, i32, i32) {
    %c0_i32 = arith.constant 0 : i32
    %c0_i32_0 = arith.constant 0 : i32
    %c0_i32_1 = arith.constant 0 : i32
    return %arg0, %c0_i32, %c0_i32_0 : i32, i32, i32
  }
  func.func @transform_1(%arg0: i32) -> (i32, i32) {
    %c0_i32 = arith.constant 0 : i32
    %c0_i32_0 = arith.constant 0 : i32
    %c0_i32_1 = arith.constant 0 : i32
    return %c0_i32, %c0_i32_0 : i32, i32
  }
  func.func @transform_2(%arg0: i32) -> (i32, i32) {
    %c0_i32 = arith.constant 0 : i32
    %c0_i32_0 = arith.constant 0 : i32
    %c0_i32_1 = arith.constant 0 : i32
    return %c0_i32, %c0_i32_0 : i32, i32
  }
  func.func @transform_3(%arg0: i32) -> (i32, i32) {
    %c0_i32 = arith.constant 0 : i32
    %c0_i32_0 = arith.constant 0 : i32
    %c0_i32_1 = arith.constant 0 : i32
    return %c0_i32, %c0_i32_0 : i32, i32
  }
  func.func @transform_4(%arg0: i32) -> (i32, i32) {
    %c0_i32 = arith.constant 0 : i32
    %c0_i32_0 = arith.constant 0 : i32
    %c0_i32_1 = arith.constant 0 : i32
    return %c0_i32, %c0_i32_0 : i32, i32
  }
  func.func @transform_5(%arg0: i32) -> (i32, i32) {
    %c0_i32 = arith.constant 0 : i32
    %c0_i32_0 = arith.constant 0 : i32
    %c0_i32_1 = arith.constant 0 : i32
    return %c0_i32, %c0_i32_0 : i32, i32
  }
  func.func @transform_6(%arg0: i32) -> (i32, i32) {
    %c0_i32 = arith.constant 0 : i32
    %c0_i32_0 = arith.constant 0 : i32
    %c0_i32_1 = arith.constant 0 : i32
    return %c0_i32, %c0_i32_0 : i32, i32
  }
  func.func @transform_7(%arg0: i32) -> (i32, i32) {
    %c0_i32 = arith.constant 0 : i32
    %c0_i32_0 = arith.constant 0 : i32
    %c0_i32_1 = arith.constant 0 : i32
    return %c0_i32, %c0_i32_0 : i32, i32
  }
  func.func @transform_8(%arg0: i32) -> (i32, i32) {
    %c0_i32 = arith.constant 0 : i32
    %c0_i32_0 = arith.constant 0 : i32
    %c0_i32_1 = arith.constant 0 : i32
    return %c0_i32, %c0_i32_0 : i32, i32
  }
  func.func @transform_9(%arg0: i32) -> (i32, i32) {
    %c0_i32 = arith.constant 0 : i32
    %c0_i32_0 = arith.constant 0 : i32
    %c0_i32_1 = arith.constant 0 : i32
    return %c0_i32, %c0_i32_0 : i32, i32
  }
  func.func @transform_10(%arg0: i32) -> (i32, i32) {
    %c0_i32 = arith.constant 0 : i32
    %c0_i32_0 = arith.constant 0 : i32
    %c0_i32_1 = arith.constant 0 : i32
    return %c0_i32, %c0_i32_0 : i32, i32
  }
  func.func @transform_11(%arg0: i32) -> (i32, i32, i32) {
    %c0_i32 = arith.constant 0 : i32
    %c0_i32_0 = arith.constant 0 : i32
    %c0_i32_1 = arith.constant 0 : i32
    return %arg0, %c0_i32, %c0_i32_0 : i32, i32, i32
  }
}

</mosaic_0001>

<bundles_post_ra>
// kernel: convnet_forward.1
= control target key start
LH: loop header
LB: loop body
LE: loop exit
PB: predicated region body
PF: predicated region fallthrough
CT: control target
= control target key end

     0   :  { %s8132_s0 = inlined_call_operand.vmem [shape: f32[2,1,256], index: 0, kind: input, shape index: {}]   ;;  %s8133_s1 = inlined_call_operand.vmem [shape: f32[9,256], index: 1, kind: input, shape index: {}]   ;;  %s8134_s2 = inlined_call_operand.vmem [shape: f32[9,256], index: 2, kind: input, shape index: {}]   ;;  %s8135_s3 = inlined_call_operand.vmem [shape: f32[64,9], index: 3, kind: input, shape index: {}]   ;;  %s8136_s4 = inlined_call_operand.vmem [shape: f32[64,1], index: 4, kind: input, shape index: {}]   ;;  %s8137_s5 = inlined_call_operand.hbm [shape: f32[64,576], index: 5, kind: input, shape index: {}]   ;;  %s8138_s6 = inlined_call_operand.vmem [shape: f32[64,1], index: 6, kind: input, shape index: {}]   ;;  %s8139_s7 = inlined_call_operand.vmem [shape: f32[1,576], index: 7, kind: input, shape index: {}]   ;;  %s8140_s8 = inlined_call_operand.<no memory space> [shape: f32[1,1], index: 8, kind: input, shape index: {}]   ;;  %s8141_s9 = inlined_call_operand.hbm [shape: f32[256,256], index: 9, kind: input, shape index: {}]   ;;  %s8142_s10 = inlined_call_operand.vmem [shape: f32[1,256], index: 10, kind: input, shape index: {}]   ;;  %s8143_s11 = inlined_call_operand.vmem [shape: f32[2,1,256], index: 11, kind: output, shape index: {}]  }
   0x1   :  { %v16_v0 = vstv %s8140_s8 }
   0x2   :  { %17 = vst [vmem:[#allocation5] sm:$0x1] %v16_v0 }
   0x3   :  { %18 = vsyncpa [#allocation7], 0 }
   0x4   :  { %19 = vsyncpa [#allocation9], 0  ;;  %s4697_s19 = smov 0  }
   0x5 LB: > { %s315_s22 = sshll.u32 %s8137_s5, 4  ;;  %s4383_s23 = sadd.s32 4294967295, %s4617_s19   ;;  %s4617_s19 = sphi %s4697_s19, %s25_s19   ;;  %s316_s22 = int_to_ptr.hbm [resolvable:$true] %s315_s22 }
   0x6   : > { %p4385_p0 = scmp.ge.s32.totalorder %s4617_s19, 1  ;;  %p292_p1 = scmp.lt.s32.totalorder %s4617_s19, 3 }
   0x7   : > { %p4495_p2 = scmp.eq.s32.totalorder %s4383_s23, 0  ;;  %s4619_s24 = smov [#allocation6]  }
   0x8   : > { %p4708_p3 = pnand %p4385_p0, %p292_p1  ;;  %s317_s25 = sshll.u32 %s4619_s24, 4  ;;  %s318_s25 = int_to_ptr.vmem [resolvable:$true] %s317_s25 }
   0x9   : > { %s338_s28 = sshll.u32 %s8141_s9, 4  ;;  %s4620_s29 = smov [#allocation8]   ;;  %s339_s28 = int_to_ptr.hbm [resolvable:$true] %s338_s28 }
   0xa   : > { %p4488_p4 = pneg %p4708_p3  ;;  %s340_s30 = sshll.u32 %s4620_s29, 4  ;;  %s341_s30 = int_to_ptr.vmem [resolvable:$true] %s340_s30 }
   0xb   : > { %s4621_s12 = smov 640   ;;  %s4622_s13 = smov 40  }
   0xc   : > { %p4489_p5 = pnand %p4495_p2, %p4488_p4  ;;  %s4623_s14 = smov 256  }
   0xd   : > { %s4624_s15 = smov 16   ;;  %366 = sbr.rel (%p4708_p3) target bundleno = 1696 (0x6a0), region = 64 }
   0xe   : > { %4491 = dma.hbm_to_vmem [thread:$0]  (!%p4489_p5), %s316_s22, 5120, %s318_s25, [#allocation7], %s4621_s12, %s4621_s12, %s4622_s13  }
   0xf   : > { %4494 = dma.hbm_to_vmem [thread:$0]  (!%p4489_p5), %s339_s28, 8192, %s341_s30, [#allocation9], %s4623_s14, %s4623_s14, %s4624_s15  }
  0x12   : > { %4608 = dma.done.wait (%p4495_p2), [#allocation7], 5120  }
  0x13   : > { %4610 = vsyncadd (%p4495_p2), [#allocation7], 4294962176 }
  0x14   : > { %4612 = dma.done.wait (%p4495_p2), [#allocation9], 8192  }
  0x15   : > { %4614 = vsyncadd (%p4495_p2), [#allocation9], 4294959104  ;;  %p410_p6 = scmp.lt.s32.totalorder %s4383_s23, 1  ;;  %s4625_s21 = smov 111   ;;  %v428_v25 = vlaneseq  ;;  %vm452_vm1 = vcmask 1040384   ;;  %v8250_v41 = vmov 0 }
  0x16   : > { %s4626_s22 = smov 17   ;;  %s4627_s8 = smov 16   ;;  %v4394_v28 = vld [vmem:[%s8133_s1 + $0x1] ss:$8 sm:$0x3]  ;;  %vm804_vm10 = vcmask 72704  }
  0x17   : > { %s8501_s23 = smov (!%p410_p6, %s4383_s23), 1  ;;  %s4628_s24 = smov 15   ;;  %v4758_v27 = vand.u32 127, %v428_v25  ;;  %v4395_v29 = vld [vmem:[%s8134_s2 + $0x1] ss:$8 sm:$0x3] }
  0x18   : > { %s4392_s16 = sshll.u32 %s8501_s23, 1  ;;  %s4629_s25 = smov 1   ;;  %v479_v30 = vperm.slane %v4394_v28, 0  ;;  %v480_v31 = vperm.slane %v4394_v28, 1  ;;  %v486_v32 = vperm.slane %v4395_v29, 0  ;;  %v487_v33 = vperm.slane %v4395_v29, 1 }
  0x19   : > { %s4732_s20 = scalar_lea.vmem %s8132_s0, %s4392_s16  ;;  %s4630_s26 = smov 127   ;;  %vm471_vm0 = vcmp.lt.s32.totalorder %v4758_v27, 16  ;;  %vm4771_vm2 = vcmp.lt.s32.totalorder %v428_v25, 256  ;;  %v4408_v46 = vld [vmem:[%s8133_s1 + $0x10] ss:$8 sm:$0x3] }
  0x1a   : > { %v705_v1 = vld [vmem:[%s4732_s20] sm:$0x3]  ;;  %s4631_s27 = smov 113   ;;  %s4632_s28 = smov 112   ;;  %v8251_v41 = vsel %vm4771_vm2, 4294967295, %v8250_v41  ;;  %vm430_vm3 = vcmp.lt.s32.totalorder %v4758_v27, 17 }
  0x1b   : > { %v418_v2 = vld [vmem:[%s4732_s20] sm:$0x3]  ;;  %v707_v3 = vperm.slane %v705_v1, 0  ;;  %v708_v7 = vperm.slane %v705_v1, 1  ;;  %8252 = vst [vmem:[#allocation12_spill] sm:$0xff] %v8251_v41  ;;  %vm715_vm4 = vcmp.lt.s32.totalorder %v4758_v27, 111  ;;  %s417_s17 = scalar_lea.vmem %s8143_s11, %s4392_s16 }
  0x1c   : > { %v420_v4 = vperm.slane %v418_v2, 0  ;;  %v461_v5 = vld [vmem:[%s4732_s20] sm:$0x3]  ;;  %v421_v8 = vperm.slane %v418_v2, 1  ;;  %v723_v50 = vperm.slane %v4408_v46, 0  ;;  %v724_v51 = vperm.slane %v4408_v46, 1 }
  0x1d   : > { %v463_v6 = vperm.slane %v461_v5, 0  ;;  %711 = vrot.lane.b32.xlu0 %v707_v3, %s4625_s21  ;;  %v464_v9 = vperm.slane %v461_v5, 1  ;;  %v500_v10 = vld [vmem:[%s4732_s20] sm:$0x3]  ;;  %vm510_vm5 = vcmp.lt.s32.totalorder %v4758_v27, 15  ;;  %vm549_vm6 = vcmp.lt.s32.totalorder %v4758_v27, 1 }
  0x1e   : > { %424 = vrot.lane.b32.xlu1 %v420_v4, %s4626_s22  ;;  %v502_v11 = vperm.slane %v500_v10, 0  ;;  %v503_v12 = vperm.slane %v500_v10, 1  ;;  %v539_v13 = vld [vmem:[%s4732_s20] sm:$0x3]  ;;  %vm598_vm7 = vcmp.lt.s32.totalorder %v4758_v27, 127  ;;  %vm637_vm8 = vcmp.lt.s32.totalorder %v4758_v27, 113 }
  0x1f   : > { %467 = vrot.lane.b32.xlu2 %v463_v6, %s4627_s8  ;;  %v541_v14 = vperm.slane %v539_v13, 0  ;;  %v588_v15 = vld [vmem:[%s4732_s20] sm:$0x3]  ;;  %v542_v16 = vperm.slane %v539_v13, 1  ;;  %vm676_vm9 = vcmp.lt.s32.totalorder %v4758_v27, 112  ;;  %vm2249_vm11 = vcmask 523264  }
  0x20   : > { %v590_v17 = vperm.slane %v588_v15, 0  ;;  %v591_v18 = vperm.slane %v588_v15, 1  ;;  %v627_v19 = vld [vmem:[%s4732_s20] sm:$0x3] }
  0x21   : > { %v629_v20 = vperm.slane %v627_v19, 0  ;;  %v630_v21 = vperm.slane %v627_v19, 1  ;;  %v666_v22 = vld [vmem:[%s4732_s20] sm:$0x3] }
  0x22   : > { %v668_v23 = vperm.slane %v666_v22, 0  ;;  %v669_v24 = vperm.slane %v666_v22, 1  ;;  %v433_v47 = vld [vmem:[%s8133_s1] ss:$8 sm:$0x3] }
  0x23   : > { %v4409_v48 = vld [vmem:[%s8134_s2 + $0x10] ss:$8 sm:$0x3]  ;;  %v434_v49 = vld [vmem:[%s8134_s2] ss:$8 sm:$0x3] }
  0x24   : > { %v436_v52 = vperm.slane %v433_v47, 0  ;;  %v437_v53 = vperm.slane %v433_v47, 1  ;;  %v730_v54 = vperm.slane %v4409_v48, 0  ;;  %v731_v55 = vperm.slane %v4409_v48, 1  ;;  %v756_v29 = vld [vmem:[%s8136_s4] sm:$0xff] }
  0x25   : > { %713 = vrot.lane.b32.xlu0 %v708_v7, %s4625_s21  ;;  %v443_v57 = vperm.slane %v434_v49, 0  ;;  %v444_v58 = vperm.slane %v434_v49, 1  ;;  %v4396_v0 = vld [vmem:[%s8133_s1 + $0x2] ss:$8 sm:$0x3] }
  0x26   : > { %426 = vrot.lane.b32.xlu1 %v421_v8, %s4626_s22  ;;  %v4397_v7 = vld [vmem:[%s8134_s2 + $0x2] ss:$8 sm:$0x3]  ;;  %v518_v8 = vperm.slane %v4396_v0, 0  ;;  %v519_v10 = vperm.slane %v4396_v0, 1 }
  0x27   : > { %469 = vrot.lane.b32.xlu2 %v464_v9, %s4627_s8  ;;  %v4400_v13 = vld [vmem:[%s8133_s1 + $0x4] ss:$8 sm:$0x3]  ;;  %v526_v22 = vperm.slane %v4397_v7, 1  ;;  %v525_v25 = vperm.slane %v4397_v7, 0 }
  0x28   : > { %v4404_v0 = vld [vmem:[%s8133_s1 + $0x6] ss:$8 sm:$0x3] }
  0x29   : > { %v645_v7 = vperm.slane %v4404_v0, 0 }
  0x2d   : > { %506 = vrot.lane.b32.xlu0 %v502_v11, %s4628_s24 }
  0x2e   : > { %508 = vrot.lane.b32.xlu1 %v503_v12, %s4628_s24  ;;  %v578_v12 = vld [vmem:[%s4732_s20] sm:$0x3] }
  0x2f   : > { %545 = vrot.lane.b32.xlu2 %v541_v14, %s4629_s25 }
  0x35   : > { %547 = vrot.lane.b32.xlu0 %v542_v16, %s4629_s25 }
  0x36   : > { %594 = vrot.lane.b32.xlu1 %v590_v17, %s4630_s26  ;;  %v583_v17 = vmul.f32 %v4400_v13, %v578_v12 }
  0x37   : > { %596 = vrot.lane.b32.xlu2 %v591_v18, %s4630_s26  ;;  %v4401_v18 = vld [vmem:[%s8134_s2 + $0x4] ss:$8 sm:$0x3] }
  0x3d   : > { %633 = vrot.lane.b32.xlu0 %v629_v20, %s4631_s27 }
  0x3e   : > { %635 = vrot.lane.b32.xlu1 %v630_v21, %s4631_s27 }
  0x3f   : > { %672 = vrot.lane.b32.xlu2 %v668_v23, %s4632_s28 }
  0x45   : > { %674 = vrot.lane.b32.xlu0 %v669_v24, %s4632_s28  ;;  %v584_v24 = vadd.f32 %v4401_v18, %v583_v17 }
  0x47   : > { %586 = vst.msk [vmem:[#allocation3 + $0x4] ss:$8 sm:$0x3] %vm4771_vm2, %v584_v24 }
  0x79   : > { %v468_v26 = vpop.permute.xlu2 %467 }
  0x81   : > { %v470_v34 = vpop.permute.xlu2 %469 }
  0x82   : > { %v472_v35 = vsel %vm471_vm0, %v468_v26, %v470_v34  ;;  %v473_v36 = vsel %vm471_vm0, %v470_v34, %v468_v26 }
  0x83   : > { %v483_v37 = vmul.f32 %v479_v30, %v473_v36  ;;  %v484_v38 = vmul.f32 %v480_v31, %v472_v35  ;;  %v4399_v35 = vld [vmem:[%s8134_s2 + $0x3] ss:$8 sm:$0x3]  ;;  %v4402_v36 = vld [vmem:[%s8133_s1 + $0x5] ss:$8 sm:$0x3] }
  0x84   : > { %v607_v46 = vperm.slane %v4402_v36, 1 }
  0x85   : > { %v490_v39 = vadd.f32 %v486_v32, %v483_v37  ;;  %v491_v40 = vadd.f32 %v487_v33, %v484_v38  ;;  %v4398_v32 = vld [vmem:[%s8133_s1 + $0x3] ss:$8 sm:$0x3]  ;;  %v4633_v33 = vmov 0  }
  0x86   : > { %4522 = vset.pattern.permute.xlu1 %v4633_v33  ;;  %4523 = vset.pattern.permute.xlu2 %v4633_v33  ;;  %v557_v37 = vperm.slane %v4398_v32, 0  ;;  %v4403_v38 = vld [vmem:[%s8134_s2 + $0x5] ss:$8 sm:$0x3] }
  0x87   : > { %v494_v42 = vrot.slane %v491_v40, 7  ;;  %766 = vperm.xlu1 %4522, %v756_v29   ;;  %4524 = vset.pattern.permute.xlu0 %v4633_v33 }
  0x89   : > { %v495_v43 = vsel %vm452_vm1, %v490_v39, %v494_v42  ;;  %v546_v11 = vpop.permute.xlu2 %545  ;;  %v558_v42 = vperm.slane %v4398_v32, 1 }
  0x8a   : > { %498 = vst.msk [vmem:[#allocation3 + $0x1] ss:$8 sm:$0x3] %vm4771_vm2, %v495_v43  ;;  %v606_v43 = vperm.slane %v4402_v36, 0 }
  0x8f   : > { %v712_v44 = vpop.permute.xlu0 %711 }
  0x90   : > { %v425_v45 = vpop.permute.xlu1 %424 }
  0x91   : > { %v597_v47 = vpop.permute.xlu2 %596 }
  0x97   : > { %v714_v56 = vpop.permute.xlu0 %713 }
  0x98   : > { %v427_v59 = vpop.permute.xlu1 %426  ;;  %v716_v60 = vsel %vm715_vm4, %v712_v44, %v714_v56  ;;  %v717_v61 = vsel %vm715_vm4, %v714_v56, %v712_v44  ;;  %v564_v44 = vperm.slane %v4399_v35, 0 }
  0x99   : > { %v431_v62 = vsel %vm430_vm3, %v425_v45, %v427_v59  ;;  %v432_v63 = vsel %vm430_vm3, %v427_v59, %v425_v45  ;;  %v727_v1 = vmul.f32 %v723_v50, %v716_v60  ;;  %v728_v2 = vmul.f32 %v724_v51, %v717_v61  ;;  %v673_v29 = vpop.permute.xlu2 %672 }
  0x9a   : > { %v440_v3 = vmul.f32 %v436_v52, %v432_v63  ;;  %v441_v4 = vmul.f32 %v437_v53, %v431_v62  ;;  %v565_v45 = vperm.slane %v4399_v35, 1  ;;  %v613_v53 = vperm.slane %v4403_v38, 0  ;;  %v759_v62 = vld [vmem:[%s8136_s4 + $0x18] sm:$0xff] }
  0x9b   : > { %v735_v5 = vadd.f32 %v731_v55, %v728_v2  ;;  %v734_v9 = vadd.f32 %v730_v54, %v727_v1  ;;  %v614_v54 = vperm.slane %v4403_v38, 1  ;;  %781 = vperm.xlu1 %4522, %v759_v62   ;;  %v4435_v62 = vld [vmem:[%s8134_s2 + $0x4] ss:$8 sm:$0x3] }
  0x9c   : > { %v448_v6 = vadd.f32 %v444_v58, %v441_v4  ;;  %v447_v15 = vadd.f32 %v443_v57, %v440_v3  ;;  %v4405_v4 = vld [vmem:[%s8134_s2 + $0x6] ss:$8 sm:$0x3] }
  0x9d   : > { %v738_v14 = vrot.slane %v735_v5, 7  ;;  %v653_v12 = vperm.slane %v4405_v4, 1  ;;  %v652_v17 = vperm.slane %v4405_v4, 0  ;;  %v4963_v4 = vperm.slane %v4435_v62, 1 }
  0x9e   : > { %v451_v16 = vrot.slane %v448_v6, 7 }
  0x9f   : > { %v739_v19 = vsel %vm452_vm1, %v734_v9, %v738_v14  ;;  %v507_v21 = vpop.permute.xlu0 %506 }
  0xa0   : > { %v453_v20 = vsel %vm452_vm1, %v447_v15, %v451_v16  ;;  %v509_v23 = vpop.permute.xlu1 %508  ;;  %742 = vst.msk [vmem:[#allocation3 + $0x10] ss:$8 sm:$0x3] %vm4771_vm2, %v739_v19 }
  0xa1   : > { %v511_v26 = vsel %vm510_vm5, %v507_v21, %v509_v23  ;;  %v512_v28 = vsel %vm510_vm5, %v509_v23, %v507_v21  ;;  %459 = vst.msk [vmem:[#allocation3] ss:$8 sm:$0x3] %vm4771_vm2, %v453_v20  ;;  %v763_v20 = vld [vmem:[%s8136_s4 + $0x38] sm:$0xff] }
  0xa2   : > { %v522_v30 = vmul.f32 %v518_v8, %v512_v28  ;;  %v523_v31 = vmul.f32 %v519_v10, %v511_v26  ;;  %v646_v8 = vperm.slane %v4404_v0, 1  ;;  %v4406_v21 = vld [vmem:[%s8133_s1 + $0x7] ss:$8 sm:$0x3] }
  0xa3   : > { %801 = vperm.xlu1 %4522, %v763_v20   ;;  %v4407_v23 = vld [vmem:[%s8134_s2 + $0x7] ss:$8 sm:$0x3]  ;;  %v684_v26 = vperm.slane %v4406_v21, 0  ;;  %v685_v28 = vperm.slane %v4406_v21, 1 }
  0xa4   : > { %v530_v34 = vadd.f32 %v526_v22, %v523_v31  ;;  %v529_v39 = vadd.f32 %v525_v25, %v522_v30  ;;  %v692_v32 = vperm.slane %v4407_v23, 1  ;;  %v691_v35 = vperm.slane %v4407_v23, 0 }
  0xa6   : > { %v533_v40 = vrot.slane %v530_v34, 7 }
  0xa7   : > { %v548_v49 = vpop.permute.xlu0 %547  ;;  %v754_v51 = vld [vmem:[#allocation3 + $0x10] sm:$0x1]  ;;  %v755_v52 = vld [vmem:[#allocation3 + $0x18] sm:$0x1] }
  0xa8   : > { %v534_v48 = vsel %vm452_vm1, %v529_v39, %v533_v40  ;;  %v595_v50 = vpop.permute.xlu1 %594  ;;  %v550_v55 = vsel %vm549_vm6, %v546_v11, %v548_v49  ;;  %v551_v56 = vsel %vm549_vm6, %v548_v49, %v546_v11  ;;  %4410 = vmatpush.msk.msra.mxu0 %vm452_vm1, %v754_v51  ;;  %4419 = vmatpush.msk.msra.mxu1 %vm452_vm1, %v755_v52  ;;  %v760_v49 = vld [vmem:[%s8136_s4 + $0x20] sm:$0xff]  ;;  %v762_v51 = vld [vmem:[%s8136_s4 + $0x30] sm:$0xff] }
  0xa9   : > { %537 = vst.msk [vmem:[#allocation3 + $0x2] ss:$8 sm:$0x3] %vm4771_vm2, %v534_v48  ;;  %v599_v57 = vsel %vm598_vm7, %v595_v50, %v597_v47  ;;  %v561_v58 = vmul.f32 %v557_v37, %v551_v56  ;;  %v562_v59 = vmul.f32 %v558_v42, %v550_v55  ;;  %v600_v60 = vsel %vm598_vm7, %v597_v47, %v595_v50  ;;  %v757_v47 = vld [vmem:[%s8136_s4 + $0x8] sm:$0xff]  ;;  %v746_v48 = vld [vmem:[%s8135_s3 + $0x10] sm:$0xff]  ;;  %v747_v50 = vld [vmem:[%s8135_s3 + $0x18] sm:$0xff] }
  0xaa   : > { %v610_v61 = vmul.f32 %v606_v43, %v599_v57  ;;  %v611_v63 = vmul.f32 %v607_v46, %v600_v60  ;;  %v744_v43 = vld [vmem:[%s8135_s3] sm:$0xff]  ;;  %v745_v46 = vld [vmem:[%s8135_s3 + $0x8] sm:$0xff]  ;;  %771 = vperm.xlu2 %4523, %v757_v47   ;;  %v758_v52 = vld [vmem:[%s8136_s4 + $0x10] sm:$0xff] }
  0xab   : > { %v569_v1 = vadd.f32 %v565_v45, %v562_v59  ;;  %v568_v5 = vadd.f32 %v564_v44, %v561_v58  ;;  %776 = vperm.xlu0 %4524, %v758_v52   ;;  %v749_v55 = vld [vmem:[%s8135_s3 + $0x28] sm:$0xff]  ;;  %v750_v56 = vld [vmem:[%s8135_s3 + $0x30] sm:$0xff]  ;;  %v751_v57 = vld [vmem:[%s8135_s3 + $0x38] sm:$0xff] }
  0xac   : > { %v617_v2 = vadd.f32 %v613_v53, %v610_v61  ;;  %v618_v3 = vadd.f32 %v614_v54, %v611_v63  ;;  %v748_v53 = vld [vmem:[%s8135_s3 + $0x20] sm:$0xff]  ;;  %v761_v54 = vld [vmem:[%s8136_s4 + $0x28] sm:$0xff] }
  0xad   : > { %v572_v6 = vrot.slane %v569_v1, 7  ;;  %v4434_v58 = vld [vmem:[%s8133_s1 + $0x4] ss:$8 sm:$0x3] }
  0xae   : > { %v621_v9 = vrot.slane %v618_v3, 7  ;;  %v4957_v1 = vperm.slane %v4434_v58, 1 }
  0xaf   : > { %v573_v10 = vsel %vm452_vm1, %v568_v5, %v572_v6  ;;  %v634_v11 = vpop.permute.xlu0 %633 }
  0xb0   : > { %v636_v13 = vpop.permute.xlu1 %635  ;;  %576 = vst.msk [vmem:[#allocation3 + $0x3] ss:$8 sm:$0x3] %vm4771_vm2, %v573_v10  ;;  %v622_v14 = vsel %vm452_vm1, %v617_v2, %v621_v9 }
  0xb1   : > { %v638_v15 = vsel %vm637_vm8, %v634_v11, %v636_v13  ;;  %v639_v16 = vsel %vm637_vm8, %v636_v13, %v634_v11  ;;  %625 = vst.msk [vmem:[#allocation3 + $0x5] ss:$8 sm:$0x3] %vm4771_vm2, %v622_v14 }
  0xb2   : > { %v649_v18 = vmul.f32 %v645_v7, %v638_v15  ;;  %v650_v19 = vmul.f32 %v646_v8, %v639_v16  ;;  %786 = vperm.xlu2 %4523, %v760_v49  }
  0xb3   : > { %791 = vperm.xlu0 %4524, %v761_v54  }
  0xb4   : > { %v657_v22 = vadd.f32 %v653_v12, %v650_v19  ;;  %v656_v24 = vadd.f32 %v652_v17, %v649_v18 }
  0xb6   : > { %v660_v25 = vrot.slane %v657_v22, 7 }
  0xb7   : > { %v675_v31 = vpop.permute.xlu0 %674 }
  0xb8   : > { %v661_v30 = vsel %vm452_vm1, %v656_v24, %v660_v25  ;;  %v677_v33 = vsel %vm676_vm9, %v673_v29, %v675_v31  ;;  %v678_v34 = vsel %vm676_vm9, %v675_v31, %v673_v29 }
  0xb9   : > { %664 = vst.msk [vmem:[#allocation3 + $0x6] ss:$8 sm:$0x3] %vm4771_vm2, %v661_v30  ;;  %v688_v36 = vmul.f32 %v684_v26, %v677_v33  ;;  %v689_v37 = vmul.f32 %v685_v28, %v678_v34 }
  0xba   : > { %796 = vperm.xlu2 %4523, %v762_v51  }
  0xbb   : > { %v696_v38 = vadd.f32 %v692_v32, %v689_v37  ;;  %v695_v39 = vadd.f32 %v691_v35, %v688_v36 }
  0xbd   : > { %v699_v40 = vrot.slane %v696_v38, 7 }
  0xbf   : > { %v700_v42 = vsel %vm452_vm1, %v695_v39, %v699_v40 }
  0xc0   : > { %703 = vst.msk [vmem:[#allocation3 + $0x7] ss:$8 sm:$0x3] %vm4771_vm2, %v700_v42 }
  0xc7   : > { %v752_v44 = vld [vmem:[#allocation3] sm:$0xff]  ;;  %v753_v45 = vld [vmem:[#allocation3 + $0x8] sm:$0xff] }
  0xc8   : > { %850 = vmatpush.msra.mxu0 %v752_v44  ;;  %891 = vmatpush.msra.mxu1 %v753_v45 }
  0xc9   : > { %4411 = vmatmul.msk.f32.vlgmr.msra.gmra.mxu0 %vm804_vm10, %v744_v43  ;;  %4420 = vmatmul.msk.f32.vlgmr.msra.gmra.mxu1 %vm804_vm10, %v744_v43 }
  0xd1   : > { %4412 = vmatmul.msk.f32.gmra.mxu0 %vm804_vm10, %v745_v46  ;;  %4421 = vmatmul.msk.f32.gmra.mxu1 %vm804_vm10, %v745_v46 }
  0xd9   : > { %4413 = vmatmul.msk.f32.gmra.mxu0 %vm804_vm10, %v746_v48  ;;  %4422 = vmatmul.msk.f32.gmra.mxu1 %vm804_vm10, %v746_v48 }
  0xe1   : > { %4414 = vmatmul.msk.f32.gmra.mxu0 %vm804_vm10, %v747_v50  ;;  %4423 = vmatmul.msk.f32.gmra.mxu1 %vm804_vm10, %v747_v50 }
  0xe9   : > { %4415 = vmatmul.msk.f32.gmra.mxu0 %vm804_vm10, %v748_v53  ;;  %4424 = vmatmul.msk.f32.gmra.mxu1 %vm804_vm10, %v748_v53 }
  0xf1   : > { %4416 = vmatmul.msk.f32.gmra.mxu0 %vm804_vm10, %v749_v55  ;;  %4425 = vmatmul.msk.f32.gmra.mxu1 %vm804_vm10, %v749_v55 }
  0xf9   : > { %4417 = vmatmul.msk.f32.gmra.mxu0 %vm804_vm10, %v750_v56  ;;  %4426 = vmatmul.msk.f32.gmra.mxu1 %vm804_vm10, %v750_v56  ;;  %v767_v59 = vpop.permute.xlu1 %766 }
 0x101   : > { %4418 = vmatmul.msk.f32.gmra.mxu0 %vm804_vm10, %v751_v57  ;;  %4427 = vmatmul.msk.f32.gmra.mxu1 %vm804_vm10, %v751_v57 }
 0x104   : > { %v772_v7 = vpop.permute.xlu2 %771 }
 0x10c   : > { %v5013_v25 = vpop.permute.xlu2 %786 }
 0x10d   : > { %v4997_v17 = vpop.permute.xlu1 %781 }
 0x114   : > { %v5052_v44 = vpop.permute.xlu2 %796 }
 0x115   : > { %v5070_v51 = vpop.permute.xlu1 %801 }
 0x11d   : > { %v777_v22 = vpop.permute.xlu0 %776 }
 0x125   : > { %v5028_v32 = vpop.permute.xlu0 %791 }
 0x146   : > { %v852_v60 = vpop.f32.mrf.mxu0  ;;  %v893_v61 = vpop.f32.mrf.mxu1 }
 0x147   : > { %v853_v63 = vadd.f32 %v852_v60, %v767_v59  ;;  %v894_v0 = vadd.f32 %v893_v61, %v767_v59 }
 0x149   : > { %v4959_v2 = vmax.f32 %v853_v63, 0.0  ;;  %v4961_v3 = vmax.f32 %v894_v0, 0.0 }
 0x14b   : > { %981 = vrot.lane.b32.xlu0 %v4961_v3, %s4626_s22  ;;  %1105 = vrot.lane.b32.xlu2 %v4961_v3, %s4627_s8  ;;  %v1469_v5 = vmul.f32 %v4957_v1, %v4961_v3 }
 0x14c   : > { %965 = vrot.lane.b32.xlu1 %v4959_v2, %s4626_s22 }
 0x14d   : > { %v4974_v6 = vadd.f32 %v4963_v4, %v1469_v5  ;;  %v1014_v5 = vld [vmem:[%s8134_s2] ss:$8 sm:$0x3] }
 0x14e   : > { %v896_v8 = vpop.f32.mrf.mxu1  ;;  %v855_v11 = vpop.f32.mrf.mxu0 }
 0x14f   : > { %8253 = vst [vmem:[#allocation13_spill] sm:$0xff] %v4974_v6  ;;  %v897_v9 = vadd.f32 %v896_v8, %v772_v7  ;;  %v856_v12 = vadd.f32 %v855_v11, %v772_v7 }
 0x151   : > { %v4976_v10 = vmax.f32 %v897_v9, 0.0  ;;  %v4989_v16 = vmax.f32 %v856_v12, 0.0  ;;  %v5148_v12 = vperm.slane %v1014_v5, 0 }
 0x153   : > { %1353 = vrot.lane.b32.xlu2 %v4961_v3, %s4629_s25  ;;  %1213 = vrot.lane.b32.xlu0 %v4959_v2, %s4628_s24  ;;  %v1471_v13 = vmul.f32 %v4957_v1, %v4976_v10  ;;  %8255 = vst [vmem:[#allocation15_spill] sm:$0xff] %v4989_v16 }
 0x154   : > { %1089 = vrot.lane.b32.xlu1 %v4959_v2, %s4627_s8  ;;  %8266 = vst [vmem:[#allocation26_spill] sm:$0xff] %v5148_v12 }
 0x155   : > { %v4987_v14 = vadd.f32 %v4963_v4, %v1471_v13  ;;  %v5150_v13 = vperm.slane %v1014_v5, 1 }
 0x156   : > { %v899_v15 = vpop.f32.mrf.mxu1  ;;  %v858_v39 = vpop.f32.mrf.mxu0 }
 0x157   : > { %8254 = vst [vmem:[#allocation14_spill] sm:$0xff] %v4987_v14  ;;  %v900_v23 = vadd.f32 %v899_v15, %v777_v22  ;;  %v859_v40 = vadd.f32 %v858_v39, %v777_v22  ;;  %v4428_v22 = vld [vmem:[%s8133_s1 + $0x1] ss:$8 sm:$0x3] }
 0x158   : > { %8267 = vst [vmem:[#allocation27_spill] sm:$0xff] %v5150_v13 }
 0x159   : > { %v5018_v30 = vmax.f32 %v900_v23, 0.0  ;;  %v5054_v46 = vmax.f32 %v859_v40, 0.0 }
 0x15b   : > { %1553 = vrot.lane.b32.xlu2 %v4961_v3, %s4630_s26  ;;  %1091 = vrot.lane.b32.xlu0 %v4989_v16, %s4627_s8  ;;  %v1473_v34 = vmul.f32 %v4957_v1, %v5018_v30  ;;  %8260 = vst [vmem:[#allocation20_spill] sm:$0xff] %v5054_v46 }
 0x15c   : > { %1337 = vrot.lane.b32.xlu1 %v4959_v2, %s4629_s25 }
 0x15d   : > { %v5037_v37 = vadd.f32 %v4963_v4, %v1473_v34 }
 0x15e   : > { %v902_v18 = vpop.f32.mrf.mxu1  ;;  %v861_v57 = vpop.f32.mrf.mxu0 }
 0x15f   : > { %v903_v19 = vadd.f32 %v902_v18, %v4997_v17  ;;  %8258 = vst [vmem:[#allocation18_spill] sm:$0xff] %v5037_v37  ;;  %v862_v59 = vadd.f32 %v861_v57, %v4997_v17  ;;  %v4433_v57 = vld [vmem:[%s8134_s2 + $0x3] ss:$8 sm:$0x3] }
 0x160   : > { %v5212_v5 = vperm.slane %v4433_v57, 1 }
 0x161   : > { %v5000_v20 = vmax.f32 %v903_v19, 0.0  ;;  %v5111_v60 = vmax.f32 %v862_v59, 0.0 }
 0x162   : > { %8271 = vst [vmem:[#allocation31_spill] sm:$0xff] %v5212_v5 }
 0x163   : > { %1801 = vrot.lane.b32.xlu2 %v4961_v3, %s4632_s28  ;;  %1339 = vrot.lane.b32.xlu0 %v4989_v16, %s4629_s25  ;;  %v1475_v21 = vmul.f32 %v4957_v1, %v5000_v20  ;;  %8263 = vst [vmem:[#allocation23_spill] sm:$0xff] %v5111_v60 }
 0x164   : > { %1229 = vrot.lane.b32.xlu1 %v4961_v3, %s4628_s24 }
 0x165   : > { %v5011_v24 = vadd.f32 %v4963_v4, %v1475_v21 }
 0x166   : > { %v905_v26 = vpop.f32.mrf.mxu1  ;;  %v864_v62 = vpop.f32.mrf.mxu0 }
 0x167   : > { %8256 = vst [vmem:[#allocation16_spill] sm:$0xff] %v5011_v24  ;;  %v906_v28 = vadd.f32 %v905_v26, %v5013_v25  ;;  %v865_v63 = vadd.f32 %v864_v62, %v5013_v25  ;;  %v4429_v26 = vld [vmem:[%s8134_s2 + $0x1] ss:$8 sm:$0x3] }
 0x168   : > { %v5180_v39 = vperm.slane %v4429_v26, 1 }
 0x169   : > { %v5016_v29 = vmax.f32 %v906_v28, 0.0  ;;  %v5172_v28 = vperm.slane %v4428_v22, 0 }
 0x16a   : > { %8269 = vst [vmem:[#allocation29_spill] sm:$0xff] %v5180_v39 }
 0x16b   : > { %967 = vrot.lane.b32.xlu2 %v4989_v16, %s4626_s22  ;;  %983 = vrot.lane.b32.xlu0 %v4976_v10, %s4626_s22  ;;  %v1477_v31 = vmul.f32 %v4957_v1, %v5016_v29 }
 0x16c   : > { %1537 = vrot.lane.b32.xlu1 %v4959_v2, %s4630_s26 }
 0x16d   : > { %v5031_v33 = vadd.f32 %v4963_v4, %v1477_v31  ;;  %v5174_v31 = vperm.slane %v4428_v22, 1 }
 0x16e   : > { %v908_v35 = vpop.f32.mrf.mxu1 }
 0x16f   : > { %8257 = vst [vmem:[#allocation17_spill] sm:$0xff] %v5031_v33  ;;  %v909_v36 = vadd.f32 %v908_v35, %v5028_v32 }
 0x170   : > { %8268 = vst [vmem:[#allocation28_spill] sm:$0xff] %v5174_v31 }
 0x171   : > { %v5039_v38 = vmax.f32 %v909_v36, 0.0  ;;  %v5178_v36 = vperm.slane %v4429_v26, 0 }
 0x173   : > { %1231 = vrot.lane.b32.xlu2 %v4976_v10, %s4628_s24  ;;  %1539 = vrot.lane.b32.xlu0 %v4989_v16, %s4630_s26  ;;  %v1479_v42 = vmul.f32 %v4957_v1, %v5039_v38 }
 0x174   : > { %1785 = vrot.lane.b32.xlu1 %v4959_v2, %s4632_s28 }
 0x175   : > { %v5050_v43 = vadd.f32 %v4963_v4, %v1479_v42 }
 0x176   : > { %v911_v45 = vpop.f32.mrf.mxu1 }
 0x177   : > { %8259 = vst [vmem:[#allocation19_spill] sm:$0xff] %v5050_v43  ;;  %v912_v47 = vadd.f32 %v911_v45, %v5052_v44 }
 0x179   : > { %v5057_v48 = vmax.f32 %v912_v47, 0.0 }
 0x17b   : > { %1093 = vrot.lane.b32.xlu2 %v5054_v46, %s4627_s8  ;;  %1787 = vrot.lane.b32.xlu0 %v4989_v16, %s4632_s28  ;;  %v1481_v49 = vmul.f32 %v4957_v1, %v5057_v48 }
 0x17c   : > { %1107 = vrot.lane.b32.xlu1 %v4976_v10, %s4627_s8 }
 0x17d   : > { %v5068_v50 = vadd.f32 %v4963_v4, %v1481_v49 }
 0x17e   : > { %v914_v52 = vpop.f32.mrf.mxu1 }
 0x17f   : > { %8261 = vst [vmem:[#allocation21_spill] sm:$0xff] %v5068_v50  ;;  %v915_v53 = vadd.f32 %v914_v52, %v5070_v51  ;;  %v4432_v52 = vld [vmem:[%s8133_s1 + $0x3] ss:$8 sm:$0x3] }
 0x180   : > { %v5204_v59 = vperm.slane %v4432_v52, 1 }
 0x181   : > { %v5073_v54 = vmax.f32 %v915_v53, 0.0 }
 0x182   : > { %8270 = vst [vmem:[#allocation30_spill] sm:$0xff] %v5204_v59 }
 0x183   : > { %1341 = vrot.lane.b32.xlu2 %v5054_v46, %s4629_s25  ;;  %969 = vrot.lane.b32.xlu0 %v5054_v46, %s4626_s22  ;;  %v1483_v55 = vmul.f32 %v4957_v1, %v5073_v54  ;;  %v5128_v1 = vmax.f32 %v865_v63, 0.0 }
 0x184   : > { %1355 = vrot.lane.b32.xlu1 %v4976_v10, %s4629_s25 }
 0x185   : > { %v5084_v56 = vadd.f32 %v4963_v4, %v1483_v55  ;;  %8264 = vst [vmem:[#allocation24_spill] sm:$0xff] %v5128_v1  ;;  %v1013_v4 = vld [vmem:[%s8133_s1] ss:$8 sm:$0x3] }
 0x186   : > { %v5142_v7 = vperm.slane %v1013_v4, 0  ;;  %v5144_v8 = vperm.slane %v1013_v4, 1  ;;  %v5210_v4 = vperm.slane %v4433_v57, 0 }
 0x187   : > { %8262 = vst [vmem:[#allocation22_spill] sm:$0xff] %v5084_v56 }
 0x188   : > { %8265 = vst [vmem:[#allocation25_spill] sm:$0xff] %v5144_v8 }
 0x18b   : > { %1233 = vrot.lane.b32.xlu2 %v5018_v30, %s4628_s24  ;;  %1109 = vrot.lane.b32.xlu0 %v5018_v30, %s4627_s8 }
 0x18c   : > { %1215 = vrot.lane.b32.xlu1 %v4989_v16, %s4628_s24 }
 0x193   : > { %1541 = vrot.lane.b32.xlu2 %v5054_v46, %s4630_s26  ;;  %1357 = vrot.lane.b32.xlu0 %v5018_v30, %s4629_s25 }
 0x194   : > { %1555 = vrot.lane.b32.xlu1 %v4976_v10, %s4630_s26 }
 0x19b   : > { %1789 = vrot.lane.b32.xlu2 %v5054_v46, %s4632_s28  ;;  %985 = vrot.lane.b32.xlu0 %v5018_v30, %s4626_s22 }
 0x19c   : > { %1803 = vrot.lane.b32.xlu1 %v4976_v10, %s4632_s28 }
 0x1a3   : > { %1557 = vrot.lane.b32.xlu0 %v5018_v30, %s4630_s26  ;;  %1111 = vrot.lane.b32.xlu2 %v5000_v20, %s4627_s8 }
 0x1a4   : > { %1217 = vrot.lane.b32.xlu1 %v5054_v46, %s4628_s24 }
 0x1a5   : > { %v1106_v58 = vpop.permute.xlu2 %1105 }
 0x1ab   : > { %1805 = vrot.lane.b32.xlu0 %v5018_v30, %s4632_s28  ;;  %1359 = vrot.lane.b32.xlu2 %v5000_v20, %s4629_s25 }
 0x1ac   : > { %971 = vrot.lane.b32.xlu1 %v5111_v60, %s4626_s22 }
 0x1ad   : > { %v1354_v61 = vpop.permute.xlu2 %1353 }
 0x1b3   : > { %987 = vrot.lane.b32.xlu0 %v5000_v20, %s4626_s22  ;;  %1235 = vrot.lane.b32.xlu2 %v5000_v20, %s4628_s24 }
 0x1b4   : > { %1095 = vrot.lane.b32.xlu1 %v5111_v60, %s4627_s8 }
 0x1b5   : > { %v5126_v0 = vpop.permute.xlu2 %1553 }
 0x1bb   : > { %1097 = vrot.lane.b32.xlu0 %v5128_v1, %s4627_s8  ;;  %1559 = vrot.lane.b32.xlu2 %v5000_v20, %s4630_s26 }
 0x1bc   : > { %1343 = vrot.lane.b32.xlu1 %v5111_v60, %s4629_s25 }
 0x1bd   : > { %v982_v9 = vpop.permute.xlu0 %981  ;;  %v5146_v11 = vpop.permute.xlu2 %1801 }
 0x1be   : > { %v966_v15 = vpop.permute.xlu1 %965 }
 0x1bf   : > { %v997_v17 = vsel %vm430_vm3, %v966_v15, %v982_v9  ;;  %v1005_v18 = vsel %vm430_vm3, %v982_v9, %v966_v15 }
 0x1c0   : > { %v1020_v19 = vmul.f32 %v5142_v7, %v1005_v18  ;;  %v1021_v21 = vmul.f32 %v5144_v8, %v997_v17 }
 0x1c2   : > { %v1041_v23 = vadd.f32 %v5148_v12, %v1020_v19  ;;  %v1042_v25 = vadd.f32 %v5150_v13, %v1021_v21  ;;  %v4430_v21 = vld [vmem:[%s8133_s1 + $0x2] ss:$8 sm:$0x3] }
 0x1c3   : > { %1345 = vrot.lane.b32.xlu0 %v5128_v1, %s4629_s25  ;;  %1807 = vrot.lane.b32.xlu2 %v5000_v20, %s4632_s28  ;;  %v5234_v26 = vperm.slane %v4430_v21, 0 }
 0x1c4   : > { %1057 = vst [vmem:[#allocation3] sm:$0xff] %v1041_v23  ;;  %1219 = vrot.lane.b32.xlu1 %v5111_v60, %s4628_s24 }
 0x1c5   : > { %1058 = vst [vmem:[#allocation3 + $0x8] sm:$0xff] %v1042_v25  ;;  %v5176_v34 = vpop.permute.xlu2 %967  ;;  %v1214_v35 = vpop.permute.xlu0 %1213 }
 0x1c6   : > { %v1090_v40 = vpop.permute.xlu1 %1089  ;;  %v867_v25 = vpop.f32.mrf.mxu0  ;;  %8272 = vst [vmem:[#allocation32_spill] sm:$0xff] %v5234_v26 }
 0x1c7   : > { %v1121_v42 = vsel %vm471_vm0, %v1090_v40, %v1106_v58  ;;  %v1129_v45 = vsel %vm471_vm0, %v1106_v58, %v1090_v40  ;;  %v5202_v58 = vperm.slane %v4432_v52, 0  ;;  %v5236_v40 = vperm.slane %v4430_v21, 1 }
 0x1c8   : > { %v1144_v47 = vmul.f32 %v5172_v28, %v1129_v45  ;;  %v1145_v49 = vmul.f32 %v5174_v31, %v1121_v42  ;;  %v868_v42 = vadd.f32 %v867_v25, %v5028_v32 }
 0x1c9   : > { %8273 = vst [vmem:[#allocation33_spill] sm:$0xff] %v5236_v40 }
 0x1ca   : > { %v1165_v53 = vadd.f32 %v5178_v36, %v1144_v47  ;;  %v1166_v55 = vadd.f32 %v5180_v39, %v1145_v49 }
 0x1cb   : > { %989 = vrot.lane.b32.xlu0 %v5016_v29, %s4626_s22  ;;  %973 = vrot.lane.b32.xlu2 %v5128_v1, %s4626_s22 }
 0x1cc   : > { %1181 = vst [vmem:[#allocation3 + $0x80] sm:$0xff] %v1165_v53  ;;  %1543 = vrot.lane.b32.xlu1 %v5111_v60, %s4630_s26 }
 0x1cd   : > { %1182 = vst [vmem:[#allocation3 + $0x88] sm:$0xff] %v1166_v55  ;;  %v5206_v62 = vpop.permute.xlu2 %1231  ;;  %v5208_v63 = vpop.permute.xlu0 %1091 }
 0x1ce   : > { %v1338_v9 = vpop.permute.xlu1 %1337 }
 0x1cf   : > { %v1369_v15 = vsel %vm549_vm6, %v1338_v9, %v1354_v61  ;;  %v1377_v17 = vsel %vm549_vm6, %v1354_v61, %v1338_v9  ;;  %v4431_v61 = vld [vmem:[%s8134_s2 + $0x2] ss:$8 sm:$0x3] }
 0x1d0   : > { %v1392_v18 = vmul.f32 %v5202_v58, %v1377_v17  ;;  %v1393_v19 = vmul.f32 %v5204_v59, %v1369_v15  ;;  %v5243_v49 = vperm.slane %v4431_v61, 0  ;;  %v5245_v52 = vperm.slane %v4431_v61, 1  ;;  %v4436_v17 = vld [vmem:[%s8133_s1 + $0x5] ss:$8 sm:$0x3] }
 0x1d1   : > { %v5253_v15 = vmax.f32 %v868_v42, 0.0  ;;  %v5269_v21 = vperm.slane %v4436_v17, 0 }
 0x1d2   : > { %v1413_v22 = vadd.f32 %v5210_v4, %v1392_v18  ;;  %v1414_v23 = vadd.f32 %v5212_v5, %v1393_v19  ;;  %8274 = vst [vmem:[#allocation34_spill] sm:$0xff] %v5243_v49 }
 0x1d3   : > { %1545 = vrot.lane.b32.xlu0 %v5128_v1, %s4630_s26  ;;  %1237 = vrot.lane.b32.xlu2 %v5016_v29, %s4628_s24  ;;  %8275 = vst [vmem:[#allocation35_spill] sm:$0xff] %v5245_v52 }
 0x1d4   : > { %1429 = vst [vmem:[#allocation3 + $0x180] sm:$0xff] %v1413_v22  ;;  %1791 = vrot.lane.b32.xlu1 %v5111_v60, %s4632_s28  ;;  %v5271_v22 = vperm.slane %v4436_v17, 1 }
 0x1d5   : > { %1430 = vst [vmem:[#allocation3 + $0x188] sm:$0xff] %v1414_v23  ;;  %v5239_v45 = vpop.permute.xlu2 %1093  ;;  %v5241_v47 = vpop.permute.xlu0 %1339 }
 0x1d6   : > { %v1230_v53 = vpop.permute.xlu1 %1229  ;;  %8276 = vst [vmem:[#allocation36_spill] sm:$0xff] %v5253_v15 }
 0x1d7   : > { %v1245_v55 = vsel %vm510_vm5, %v1214_v35, %v1230_v53  ;;  %v1253_v57 = vsel %vm510_vm5, %v1230_v53, %v1214_v35  ;;  %v4437_v35 = vld [vmem:[%s8134_s2 + $0x5] ss:$8 sm:$0x3]  ;;  %8277 = vst [vmem:[#allocation37_spill] sm:$0xff] %v5271_v22 }
 0x1d8   : > { %v1268_v9 = vmul.f32 %v5234_v26, %v1253_v57  ;;  %v1269_v32 = vmul.f32 %v5236_v40, %v1245_v55  ;;  %v5281_v53 = vperm.slane %v4437_v35, 0  ;;  %v5283_v55 = vperm.slane %v4437_v35, 1 }
 0x1da   : > { %v1289_v18 = vadd.f32 %v5243_v49, %v1268_v9  ;;  %v1290_v19 = vadd.f32 %v5245_v52, %v1269_v32  ;;  %8278 = vst [vmem:[#allocation38_spill] sm:$0xff] %v5283_v55 }
 0x1db   : > { %1793 = vrot.lane.b32.xlu0 %v5128_v1, %s4632_s28  ;;  %1099 = vrot.lane.b32.xlu2 %v5253_v15, %s4627_s8 }
 0x1dc   : > { %1305 = vst [vmem:[#allocation3 + $0x100] sm:$0xff] %v1289_v18  ;;  %1113 = vrot.lane.b32.xlu1 %v5016_v29, %s4627_s8 }
 0x1dd   : > { %1306 = vst [vmem:[#allocation3 + $0x108] sm:$0xff] %v1290_v19  ;;  %v5273_v23 = vpop.permute.xlu2 %1341  ;;  %v984_v61 = vpop.permute.xlu0 %983 }
 0x1de   : > { %v998_v25 = vsel %vm430_vm3, %v5176_v34, %v984_v61  ;;  %v1006_v42 = vsel %vm430_vm3, %v984_v61, %v5176_v34  ;;  %v1538_v57 = vpop.permute.xlu1 %1537 }
 0x1df   : > { %v1022_v9 = vmul.f32 %v5142_v7, %v1006_v42  ;;  %v1023_v32 = vmul.f32 %v5144_v8, %v998_v25  ;;  %v1569_v17 = vsel %vm598_vm7, %v1538_v57, %v5126_v0  ;;  %v1577_v18 = vsel %vm598_vm7, %v5126_v0, %v1538_v57  ;;  %v4440_v25 = vld [vmem:[%s8133_s1 + $0x7] ss:$8 sm:$0x3] }
 0x1e0   : > { %v1592_v19 = vmul.f32 %v5269_v21, %v1569_v17  ;;  %v1593_v34 = vmul.f32 %v5271_v22, %v1577_v18  ;;  %v4441_v0 = vld [vmem:[%s8134_s2 + $0x7] ss:$8 sm:$0x3]  ;;  %v5311_v57 = vperm.slane %v4440_v25, 0 }
 0x1e1   : > { %v1043_v35 = vadd.f32 %v5148_v12, %v1022_v9  ;;  %v1044_v61 = vadd.f32 %v5150_v13, %v1023_v32  ;;  %v5313_v9 = vperm.slane %v4440_v25, 1  ;;  %v5319_v18 = vperm.slane %v4441_v0, 0  ;;  %v870_v12 = vpop.f32.mrf.mxu0 }
 0x1e2   : > { %v1613_v42 = vadd.f32 %v5281_v53, %v1592_v19  ;;  %v1614_v41 = vadd.f32 %v5283_v55, %v1593_v34  ;;  %8279 = vst [vmem:[#allocation39_spill] sm:$0xff] %v5311_v57  ;;  %v5321_v19 = vperm.slane %v4441_v0, 1 }
 0x1e3   : > { %1059 = vst [vmem:[#allocation3 + $0x10] sm:$0xff] %v1043_v35  ;;  %975 = vrot.lane.b32.xlu0 %v5253_v15, %s4626_s22  ;;  %1347 = vrot.lane.b32.xlu2 %v5253_v15, %s4629_s25 }
 0x1e4   : > { %1060 = vst [vmem:[#allocation3 + $0x18] sm:$0xff] %v1044_v61  ;;  %1361 = vrot.lane.b32.xlu1 %v5016_v29, %s4629_s25 }
 0x1e5   : > { %8280 = vst [vmem:[#allocation40_spill] sm:$0xff] %v5313_v9  ;;  %v5315_v32 = vpop.permute.xlu2 %1233  ;;  %v5317_v17 = vpop.permute.xlu0 %1539 }
 0x1e6   : > { %1629 = vst [vmem:[#allocation3 + $0x280] sm:$0xff] %v1613_v42  ;;  %v1786_v34 = vpop.permute.xlu1 %1785 }
 0x1e7   : > { %1630 = vst [vmem:[#allocation3 + $0x288] sm:$0xff] %v1614_v41  ;;  %v1817_v35 = vsel %vm676_vm9, %v1786_v34, %v5146_v11  ;;  %v1825_v61 = vsel %vm676_vm9, %v5146_v11, %v1786_v34 }
 0x1e8   : > { %8281 = vst [vmem:[#allocation41_spill] sm:$0xff] %v5319_v18  ;;  %v1840_v25 = vmul.f32 %v5311_v57, %v1817_v35  ;;  %v1841_v42 = vmul.f32 %v5313_v9, %v1825_v61 }
 0x1e9   : > { %8282 = vst [vmem:[#allocation42_spill] sm:$0xff] %v5321_v19 }
 0x1ea   : > { %v1861_v6 = vadd.f32 %v5319_v18, %v1840_v25  ;;  %v1862_v41 = vadd.f32 %v5321_v19, %v1841_v42 }
 0x1eb   : > { %1115 = vrot.lane.b32.xlu0 %v5039_v38, %s4627_s8  ;;  %1239 = vrot.lane.b32.xlu2 %v5039_v38, %s4628_s24 }
 0x1ec   : > { %1877 = vst [vmem:[#allocation3 + $0x380] sm:$0xff] %v1861_v6  ;;  %1221 = vrot.lane.b32.xlu1 %v5128_v1, %s4628_s24 }
 0x1ed   : > { %1878 = vst [vmem:[#allocation3 + $0x388] sm:$0xff] %v1862_v41  ;;  %v5339_v11 = vpop.permute.xlu2 %1541  ;;  %v5341_v0 = vpop.permute.xlu0 %1787 }
 0x1ee   : > { %8283 = vst [vmem:[#allocation43_spill] sm:$0xff] %v5339_v11  ;;  %v5343_v34 = vpop.permute.xlu1 %1107 }
 0x1ef   : > { %v1122_v35 = vsel %vm471_vm0, %v5208_v63, %v5343_v34 }
 0x1f0   : > { %v1147_v61 = vmul.f32 %v5174_v31, %v1122_v35 }
 0x1f2   : > { %v1168_v25 = vadd.f32 %v5180_v39, %v1147_v61 }
 0x1f3   : > { %1363 = vrot.lane.b32.xlu0 %v5039_v38, %s4629_s25  ;;  %1547 = vrot.lane.b32.xlu2 %v5253_v15, %s4630_s26 }
 0x1f4   : > { %1184 = vst [vmem:[#allocation3 + $0x98] sm:$0xff] %v1168_v25  ;;  %1561 = vrot.lane.b32.xlu1 %v5016_v29, %s4630_s26 }
 0x1f5   : > { %v5357_v6 = vpop.permute.xlu2 %1789  ;;  %v5359_v42 = vpop.permute.xlu0 %969 }
 0x1f6   : > { %v1356_v41 = vpop.permute.xlu1 %1355 }
 0x1f7   : > { %v1370_v35 = vsel %vm549_vm6, %v5241_v47, %v1356_v41  ;;  %v1378_v61 = vsel %vm549_vm6, %v1356_v41, %v5241_v47 }
 0x1f8   : > { %v1394_v14 = vmul.f32 %v5202_v58, %v1378_v61  ;;  %v1395_v25 = vmul.f32 %v5204_v59, %v1370_v35 }
 0x1fa   : > { %v1415_v37 = vadd.f32 %v5210_v4, %v1394_v14  ;;  %v1416_v24 = vadd.f32 %v5212_v5, %v1395_v25 }
 0x1fb   : > { %991 = vrot.lane.b32.xlu0 %v5039_v38, %s4626_s22  ;;  %1795 = vrot.lane.b32.xlu2 %v5253_v15, %s4632_s28 }
 0x1fc   : > { %1431 = vst [vmem:[#allocation3 + $0x190] sm:$0xff] %v1415_v37  ;;  %1809 = vrot.lane.b32.xlu1 %v5016_v29, %s4632_s28 }
 0x1fd   : > { %1432 = vst [vmem:[#allocation3 + $0x198] sm:$0xff] %v1416_v24  ;;  %v5377_v47 = vpop.permute.xlu0 %1109  ;;  %v5379_v41 = vpop.permute.xlu2 %1111 }
 0x1fe   : > { %v1123_v14 = vsel %vm471_vm0, %v5239_v45, %v5377_v47  ;;  %v1216_v35 = vpop.permute.xlu1 %1215 }
 0x1ff   : > { %v1149_v61 = vmul.f32 %v5174_v31, %v1123_v14  ;;  %v1246_v37 = vsel %vm510_vm5, %v1216_v35, %v5206_v62  ;;  %v1254_v24 = vsel %vm510_vm5, %v5206_v62, %v1216_v35  ;;  %v871_v35 = vadd.f32 %v870_v12, %v5052_v44 }
 0x200   : > { %v1270_v25 = vmul.f32 %v5234_v26, %v1254_v24  ;;  %v1271_v33 = vmul.f32 %v5236_v40, %v1246_v37 }
 0x201   : > { %v1170_v43 = vadd.f32 %v5180_v39, %v1149_v61 }
 0x202   : > { %v1291_v50 = vadd.f32 %v5243_v49, %v1270_v25  ;;  %v1292_v56 = vadd.f32 %v5245_v52, %v1271_v33 }
 0x203   : > { %1186 = vst [vmem:[#allocation3 + $0xa8] sm:$0xff] %v1170_v43  ;;  %1563 = vrot.lane.b32.xlu0 %v5039_v38, %s4630_s26  ;;  %1117 = vrot.lane.b32.xlu2 %v5057_v48, %s4627_s8 }
 0x204   : > { %1307 = vst [vmem:[#allocation3 + $0x110] sm:$0xff] %v1291_v50  ;;  %1223 = vrot.lane.b32.xlu1 %v5253_v15, %s4628_s24 }
 0x205   : > { %1308 = vst [vmem:[#allocation3 + $0x118] sm:$0xff] %v1292_v56  ;;  %v1358_v62 = vpop.permute.xlu0 %1357  ;;  %v5403_v14 = vpop.permute.xlu2 %1359 }
 0x206   : > { %8284 = vst [vmem:[#allocation44_spill] sm:$0xff] %v5403_v14  ;;  %v1371_v33 = vsel %vm549_vm6, %v5273_v23, %v1358_v62  ;;  %v1379_v43 = vsel %vm549_vm6, %v1358_v62, %v5273_v23  ;;  %v1556_v61 = vpop.permute.xlu1 %1555  ;;  %v5424_v62 = vmax.f32 %v871_v35, 0.0 }
 0x207   : > { %v1396_v50 = vmul.f32 %v5202_v58, %v1379_v43  ;;  %v1397_v37 = vmul.f32 %v5204_v59, %v1371_v33  ;;  %v1570_v56 = vsel %vm598_vm7, %v5317_v17, %v1556_v61  ;;  %v1578_v44 = vsel %vm598_vm7, %v1556_v61, %v5317_v17 }
 0x208   : > { %v1594_v12 = vmul.f32 %v5269_v21, %v1570_v56  ;;  %v1595_v24 = vmul.f32 %v5271_v22, %v1578_v44  ;;  %8285 = vst [vmem:[#allocation45_spill] sm:$0xff] %v5424_v62 }
 0x209   : > { %v1417_v25 = vadd.f32 %v5210_v4, %v1396_v50  ;;  %v1418_v23 = vadd.f32 %v5212_v5, %v1397_v37 }
 0x20a   : > { %v1615_v33 = vadd.f32 %v5281_v53, %v1594_v12  ;;  %v1616_v43 = vadd.f32 %v5283_v55, %v1595_v24 }
 0x20b   : > { %1433 = vst [vmem:[#allocation3 + $0x1a0] sm:$0xff] %v1417_v25  ;;  %1811 = vrot.lane.b32.xlu0 %v5039_v38, %s4632_s28  ;;  %1365 = vrot.lane.b32.xlu2 %v5057_v48, %s4629_s25 }
 0x20c   : > { %1434 = vst [vmem:[#allocation3 + $0x1a8] sm:$0xff] %v1418_v23  ;;  %977 = vrot.lane.b32.xlu1 %v5424_v62, %s4626_s22 }
 0x20d   : > { %1631 = vst [vmem:[#allocation3 + $0x290] sm:$0xff] %v1615_v33  ;;  %v5434_v17 = vpop.permute.xlu0 %985  ;;  %v5436_v35 = vpop.permute.xlu2 %1235 }
 0x20e   : > { %8286 = vst [vmem:[#allocation46_spill] sm:$0xff] %v5436_v35  ;;  %v999_v61 = vsel %vm430_vm3, %v5359_v42, %v5434_v17  ;;  %v1804_v50 = vpop.permute.xlu1 %1803 }
 0x20f   : > { %1632 = vst [vmem:[#allocation3 + $0x298] sm:$0xff] %v1616_v43  ;;  %v1025_v37 = vmul.f32 %v5144_v8, %v999_v61  ;;  %v1818_v56 = vsel %vm676_vm9, %v5341_v0, %v1804_v50  ;;  %v1826_v44 = vsel %vm676_vm9, %v1804_v50, %v5341_v0 }
 0x210   : > { %v1842_v12 = vmul.f32 %v5311_v57, %v1818_v56  ;;  %v1843_v24 = vmul.f32 %v5313_v9, %v1826_v44 }
 0x211   : > { %v1046_v25 = vadd.f32 %v5150_v13, %v1025_v37 }
 0x212   : > { %v1863_v23 = vadd.f32 %v5319_v18, %v1842_v12  ;;  %v1864_v33 = vadd.f32 %v5321_v19, %v1843_v24 }
 0x213   : > { %1062 = vst [vmem:[#allocation3 + $0x28] sm:$0xff] %v1046_v25  ;;  %993 = vrot.lane.b32.xlu0 %v5057_v48, %s4626_s22  ;;  %1241 = vrot.lane.b32.xlu2 %v5057_v48, %s4628_s24 }
 0x214   : > { %1879 = vst [vmem:[#allocation3 + $0x390] sm:$0xff] %v1863_v23  ;;  %1101 = vrot.lane.b32.xlu1 %v5424_v62, %s4627_s8 }
 0x215   : > { %1880 = vst [vmem:[#allocation3 + $0x398] sm:$0xff] %v1864_v33  ;;  %v5460_v0 = vpop.permute.xlu0 %1557  ;;  %v5462_v43 = vpop.permute.xlu2 %1559 }
 0x216   : > { %8287 = vst [vmem:[#allocation47_spill] sm:$0xff] %v5460_v0  ;;  %v1579_v61 = vsel %vm598_vm7, %v5460_v0, %v5339_v11  ;;  %v1218_v50 = vpop.permute.xlu1 %1217 }
 0x217   : > { %v1597_v37 = vmul.f32 %v5271_v22, %v1579_v61  ;;  %v1247_v56 = vsel %vm510_vm5, %v1218_v50, %v5315_v32  ;;  %v1255_v44 = vsel %vm510_vm5, %v5315_v32, %v1218_v50 }
 0x218   : > { %v1272_v12 = vmul.f32 %v5234_v26, %v1255_v44  ;;  %v1273_v24 = vmul.f32 %v5236_v40, %v1247_v56 }
 0x219   : > { %v1618_v25 = vadd.f32 %v5283_v55, %v1597_v37 }
 0x21a   : > { %v1293_v23 = vadd.f32 %v5243_v49, %v1272_v12  ;;  %v1294_v33 = vadd.f32 %v5245_v52, %v1273_v24 }
 0x21b   : > { %1634 = vst [vmem:[#allocation3 + $0x2a8] sm:$0xff] %v1618_v25  ;;  %1921 = vrot.lane.b32.xlu0 %v5424_v62, %s4625_s21  ;;  %1565 = vrot.lane.b32.xlu2 %v5057_v48, %s4630_s26 }
 0x21c   : > { %1309 = vst [vmem:[#allocation3 + $0x120] sm:$0xff] %v1293_v23  ;;  %1349 = vrot.lane.b32.xlu1 %v5424_v62, %s4629_s25  ;;  %v873_v23 = vpop.f32.mrf.mxu0 }
 0x21d   : > { %1310 = vst [vmem:[#allocation3 + $0x128] sm:$0xff] %v1294_v33  ;;  %v1806_v32 = vpop.permute.xlu0 %1805  ;;  %v5486_v61 = vpop.permute.xlu2 %1807 }
 0x21e   : > { %8288 = vst [vmem:[#allocation48_spill] sm:$0xff] %v5486_v61  ;;  %v1819_v50 = vsel %vm676_vm9, %v5357_v6, %v1806_v32  ;;  %v1827_v37 = vsel %vm676_vm9, %v1806_v32, %v5357_v6  ;;  %v5494_v56 = vpop.permute.xlu1 %971  ;;  %v874_v6 = vadd.f32 %v873_v23, %v5070_v51 }
 0x21f   : > { %v1844_v44 = vmul.f32 %v5311_v57, %v1819_v50  ;;  %v1845_v12 = vmul.f32 %v5313_v9, %v1827_v37 }
 0x221   : > { %v1865_v24 = vadd.f32 %v5319_v18, %v1844_v44  ;;  %v1866_v25 = vadd.f32 %v5321_v19, %v1845_v12 }
 0x223   : > { %1881 = vst [vmem:[#allocation3 + $0x3a0] sm:$0xff] %v1865_v24  ;;  %1813 = vrot.lane.b32.xlu2 %v5057_v48, %s4632_s28  ;;  %1119 = vrot.lane.b32.xlu0 %v5073_v54, %s4627_s8  ;;  %v5523_v24 = vmax.f32 %v874_v6, 0.0 }
 0x224   : > { %1882 = vst [vmem:[#allocation3 + $0x3a8] sm:$0xff] %v1866_v25  ;;  %1225 = vrot.lane.b32.xlu1 %v5424_v62, %s4628_s24 }
 0x225   : > { %v5507_v33 = vpop.permute.xlu0 %987  ;;  %v5509_v32 = vpop.permute.xlu2 %973  ;;  %8289 = vst [vmem:[#allocation49_spill] sm:$0xff] %v5523_v24 }
 0x226   : > { %v1000_v50 = vsel %vm430_vm3, %v5494_v56, %v5507_v33  ;;  %v5515_v37 = vpop.permute.xlu1 %1095 }
 0x227   : > { %v1027_v44 = vmul.f32 %v5144_v8, %v1000_v50  ;;  %v1124_v12 = vsel %vm471_vm0, %v5515_v37, %v5379_v41 }
 0x228   : > { %v1151_v51 = vmul.f32 %v5174_v31, %v1124_v12 }
 0x229   : > { %v1048_v25 = vadd.f32 %v5150_v13, %v1027_v44 }
 0x22a   : > { %v1172_v23 = vadd.f32 %v5180_v39, %v1151_v51 }
 0x22b   : > { %1064 = vst [vmem:[#allocation3 + $0x38] sm:$0xff] %v1048_v25  ;;  %1351 = vrot.lane.b32.xlu0 %v5523_v24, %s4629_s25  ;;  %1103 = vrot.lane.b32.xlu2 %v5523_v24, %s4627_s8 }
 0x22c   : > { %1188 = vst [vmem:[#allocation3 + $0xb8] sm:$0xff] %v1172_v23  ;;  %1549 = vrot.lane.b32.xlu1 %v5424_v62, %s4630_s26 }
 0x22d   : > { %v5533_v50 = vpop.permute.xlu0 %1097  ;;  %v5535_v12 = vpop.permute.xlu2 %1237 }
 0x22e   : > { %8290 = vst [vmem:[#allocation50_spill] sm:$0xff] %v5535_v12  ;;  %v5537_v6 = vpop.permute.xlu1 %1343 }
 0x22f   : > { %8291 = vst [vmem:[#allocation51_spill] sm:$0xff] %v5537_v6  ;;  %v1372_v44 = vsel %vm549_vm6, %v5537_v6, %v5403_v14 }
 0x230   : > { %v1399_v51 = vmul.f32 %v5204_v59, %v1372_v44 }
 0x232   : > { %v1420_v25 = vadd.f32 %v5212_v5, %v1399_v51 }
 0x233   : > { %995 = vrot.lane.b32.xlu0 %v5073_v54, %s4626_s22  ;;  %979 = vrot.lane.b32.xlu2 %v5523_v24, %s4626_s22 }
 0x234   : > { %1436 = vst [vmem:[#allocation3 + $0x1b8] sm:$0xff] %v1420_v25  ;;  %1797 = vrot.lane.b32.xlu1 %v5424_v62, %s4632_s28 }
 0x235   : > { %v5551_v23 = vpop.permute.xlu0 %1345  ;;  %v5553_v39 = vpop.permute.xlu2 %1099 }
 0x236   : > { %8292 = vst [vmem:[#allocation52_spill] sm:$0xff] %v5553_v39  ;;  %v5555_v31 = vpop.permute.xlu1 %1219 }
 0x237   : > { %8293 = vst [vmem:[#allocation53_spill] sm:$0xff] %v5555_v31  ;;  %v1248_v44 = vsel %vm510_vm5, %v5555_v31, %v5436_v35 }
 0x238   : > { %v1275_v51 = vmul.f32 %v5236_v40, %v1248_v44 }
 0x23a   : > { %v1296_v5 = vadd.f32 %v5245_v52, %v1275_v51 }
 0x23b   : > { %1567 = vrot.lane.b32.xlu0 %v5073_v54, %s4630_s26  ;;  %1243 = vrot.lane.b32.xlu2 %v5073_v54, %s4628_s24 }
 0x23c   : > { %1312 = vst [vmem:[#allocation3 + $0x138] sm:$0xff] %v1296_v5  ;;  %1367 = vrot.lane.b32.xlu1 %v5073_v54, %s4629_s25 }
 0x23d   : > { %v5569_v25 = vpop.permute.xlu0 %989  ;;  %v5571_v59 = vpop.permute.xlu2 %1347 }
 0x23e   : > { %v1001_v44 = vsel %vm430_vm3, %v5509_v32, %v5569_v25  ;;  %v5577_v51 = vpop.permute.xlu1 %1543 }
 0x23f   : > { %v1029_v18 = vmul.f32 %v5144_v8, %v1001_v44  ;;  %v1580_v5 = vsel %vm598_vm7, %v5462_v43, %v5577_v51 }
 0x240   : > { %v1599_v57 = vmul.f32 %v5271_v22, %v1580_v5 }
 0x241   : > { %v1050_v35 = vadd.f32 %v5150_v13, %v1029_v18 }
 0x242   : > { %v1620_v31 = vadd.f32 %v5283_v55, %v1599_v57 }
 0x243   : > { %1066 = vst [vmem:[#allocation3 + $0x48] sm:$0xff] %v1050_v35  ;;  %1799 = vrot.lane.b32.xlu0 %v5523_v24, %s4632_s28  ;;  %1551 = vrot.lane.b32.xlu2 %v5523_v24, %s4630_s26 }
 0x244   : > { %1636 = vst [vmem:[#allocation3 + $0x2b8] sm:$0xff] %v1620_v31  ;;  %1937 = vrot.lane.b32.xlu1 %v5057_v48, %s4625_s21 }
 0x245   : > { %v5593_v44 = vpop.permute.xlu0 %1545  ;;  %v5595_v49 = vpop.permute.xlu2 %1239 }
 0x246   : > { %8294 = vst [vmem:[#allocation54_spill] sm:$0xff] %v5595_v49  ;;  %v5597_v5 = vpop.permute.xlu1 %1791 }
 0x247   : > { %8295 = vst [vmem:[#allocation55_spill] sm:$0xff] %v5597_v5  ;;  %v1828_v57 = vsel %vm676_vm9, %v5486_v61, %v5597_v5 }
 0x248   : > { %v1847_v18 = vmul.f32 %v5313_v9, %v1828_v57 }
 0x24a   : > { %v1868_v35 = vadd.f32 %v5321_v19, %v1847_v18 }
 0x24b   : > { %1939 = vrot.lane.b32.xlu0 %v5073_v54, %s4625_s21  ;;  %1923 = vrot.lane.b32.xlu2 %v5523_v24, %s4625_s21 }
 0x24c   : > { %1884 = vst [vmem:[#allocation3 + $0x3b8] sm:$0xff] %v1868_v35  ;;  %1227 = vrot.lane.b32.xlu1 %v5523_v24, %s4628_s24 }
 0x24d   : > { %v5611_v31 = vpop.permute.xlu0 %1793  ;;  %v5613_v26 = vpop.permute.xlu2 %1547 }
 0x24e   : > { %8296 = vst [vmem:[#allocation56_spill] sm:$0xff] %v5611_v31  ;;  %v5615_v49 = vpop.permute.xlu1 %1113 }
 0x253   : > { %1691 = vrot.lane.b32.xlu0 %v5073_v54, %s4631_s27  ;;  %1675 = vrot.lane.b32.xlu2 %v5523_v24, %s4631_s27 }
 0x254   : > { %1815 = vrot.lane.b32.xlu1 %v5073_v54, %s4632_s28 }
 0x255   : > { %v5623_v57 = vpop.permute.xlu0 %975  ;;  %v5625_v18 = vpop.permute.xlu2 %1795 }
 0x256   : > { %8297 = vst [vmem:[#allocation57_spill] sm:$0xff] %v5625_v18  ;;  %v5627_v35 = vpop.permute.xlu1 %1361 }
 0x25b   : > { %1673 = vrot.lane.b32.xlu0 %v5424_v62, %s4631_s27  ;;  %1935 = vrot.lane.b32.xlu2 %v5039_v38, %s4625_s21 }
 0x25c   : > { %1919 = vrot.lane.b32.xlu1 %v5253_v15, %s4625_s21 }
 0x25d   : > { %v5635_v5 = vpop.permute.xlu0 %1115  ;;  %v5637_v61 = vpop.permute.xlu2 %1117 }
 0x25e   : > { %8298 = vst [vmem:[#allocation58_spill] sm:$0xff] %v5637_v61  ;;  %v5639_v54 = vpop.permute.xlu1 %1221 }
 0x25f   : > { %v1249_v24 = vsel %vm510_vm5, %v5639_v54, %v5535_v12 }
 0x260   : > { %v1277_v14 = vmul.f32 %v5236_v40, %v1249_v24 }
 0x262   : > { %v1298_v62 = vadd.f32 %v5245_v52, %v1277_v14 }
 0x263   : > { %1933 = vrot.lane.b32.xlu0 %v5016_v29, %s4625_s21  ;;  %1917 = vrot.lane.b32.xlu2 %v5128_v1, %s4625_s21 }
 0x264   : > { %1314 = vst [vmem:[#allocation3 + $0x148] sm:$0xff] %v1298_v62  ;;  %1689 = vrot.lane.b32.xlu1 %v5057_v48, %s4631_s27 }
 0x265   : > { %v5653_v6 = vpop.permute.xlu0 %1363  ;;  %v5655_v11 = vpop.permute.xlu2 %1365 }
 0x266   : > { %v5657_v0 = vpop.permute.xlu1 %1561 }
 0x267   : > { %v1581_v14 = vsel %vm598_vm7, %v5657_v0, %v5593_v44 }
 0x268   : > { %v1601_v24 = vmul.f32 %v5271_v22, %v1581_v14 }
 0x26a   : > { %v1622_v52 = vadd.f32 %v5283_v55, %v1601_v24 }
 0x26b   : > { %1915 = vrot.lane.b32.xlu0 %v5111_v60, %s4625_s21  ;;  %1687 = vrot.lane.b32.xlu2 %v5039_v38, %s4631_s27 }
 0x26c   : > { %1638 = vst [vmem:[#allocation3 + $0x2c8] sm:$0xff] %v1622_v52  ;;  %1671 = vrot.lane.b32.xlu1 %v5253_v15, %s4631_s27 }
 0x26d   : > { %v5671_v48 = vpop.permute.xlu0 %991  ;;  %v5673_v62 = vpop.permute.xlu2 %1241 }
 0x26e   : > { %v1002_v14 = vsel %vm430_vm3, %v5623_v57, %v5671_v48  ;;  %v5679_v24 = vpop.permute.xlu1 %1809 }
 0x26f   : > { %8299 = vst [vmem:[#allocation59_spill] sm:$0xff] %v5679_v24  ;;  %v1031_v40 = vmul.f32 %v5144_v8, %v1002_v14  ;;  %v1829_v38 = vsel %vm676_vm9, %v5679_v24, %v5611_v31 }
 0x270   : > { %v1849_v52 = vmul.f32 %v5313_v9, %v1829_v38 }
 0x271   : > { %v1052_v15 = vadd.f32 %v5150_v13, %v1031_v40 }
 0x272   : > { %v1870_v12 = vadd.f32 %v5321_v19, %v1849_v52 }
 0x273   : > { %1068 = vst [vmem:[#allocation3 + $0x58] sm:$0xff] %v1052_v15  ;;  %1685 = vrot.lane.b32.xlu0 %v5016_v29, %s4631_s27  ;;  %1669 = vrot.lane.b32.xlu2 %v5128_v1, %s4631_s27 }
 0x274   : > { %1886 = vst [vmem:[#allocation3 + $0x3c8] sm:$0xff] %v1870_v12  ;;  %1931 = vrot.lane.b32.xlu1 %v5000_v20, %s4625_s21 }
 0x275   : > { %v5695_v14 = vpop.permute.xlu0 %1563  ;;  %v5697_v8 = vpop.permute.xlu2 %1565 }
 0x276   : > { %v1582_v40 = vsel %vm598_vm7, %v5695_v14, %v5613_v26  ;;  %v5703_v15 = vpop.permute.xlu1 %1223 }
 0x277   : > { %v1603_v29 = vmul.f32 %v5271_v22, %v1582_v40 }
 0x279   : > { %v1624_v38 = vadd.f32 %v5283_v55, %v1603_v29 }
 0x27b   : > { %1640 = vst [vmem:[#allocation3 + $0x2d8] sm:$0xff] %v1624_v38  ;;  %1667 = vrot.lane.b32.xlu0 %v5111_v60, %s4631_s27  ;;  %1929 = vrot.lane.b32.xlu2 %v5018_v30, %s4625_s21 }
 0x27c   : > { %1913 = vrot.lane.b32.xlu1 %v5054_v46, %s4625_s21 }
 0x27d   : > { %v5713_v12 = vpop.permute.xlu0 %1811  ;;  %v5715_v52 = vpop.permute.xlu2 %1813 }
 0x27e   : > { %8300 = vst [vmem:[#allocation60_spill] sm:$0xff] %v5713_v12  ;;  %v1830_v40 = vsel %vm676_vm9, %v5713_v12, %v5625_v18  ;;  %v5721_v29 = vpop.permute.xlu1 %977 }
 0x27f   : > { %v1851_v38 = vmul.f32 %v5313_v9, %v1830_v40 }
 0x281   : > { %v1872_v13 = vadd.f32 %v5321_v19, %v1851_v38 }
 0x283   : > { %1888 = vst [vmem:[#allocation3 + $0x3d8] sm:$0xff] %v1872_v13  ;;  %1927 = vrot.lane.b32.xlu0 %v4976_v10, %s4625_s21  ;;  %1911 = vrot.lane.b32.xlu2 %v4989_v16, %s4625_s21 }
 0x284   : > { %1683 = vrot.lane.b32.xlu1 %v5000_v20, %s4631_s27 }
 0x285   : > { %v5731_v31 = vpop.permute.xlu0 %993  ;;  %v5733_v24 = vpop.permute.xlu2 %1103 }
 0x286   : > { %8301 = vst [vmem:[#allocation61_spill] sm:$0xff] %v5733_v24  ;;  %v5735_v18 = vpop.permute.xlu1 %1101 }
 0x287   : > { %8302 = vst [vmem:[#allocation62_spill] sm:$0xff] %v5735_v18 }
 0x28b   : > { %1909 = vrot.lane.b32.xlu0 %v4959_v2, %s4625_s21  ;;  %1681 = vrot.lane.b32.xlu2 %v5018_v30, %s4631_s27  ;;  %v1135_v30 = vsel %vm471_vm0, %v5637_v61, %v5735_v18  ;;  %v2208_v61 = vld [vmem:[%s8138_s6 + $0x38] sm:$0xff] }
 0x28c   : > { %1665 = vrot.lane.b32.xlu1 %v5054_v46, %s4631_s27  ;;  %v1156_v18 = vmul.f32 %v5172_v28, %v1135_v30 }
 0x28d   : > { %v5743_v13 = vpop.permute.xlu0 %1921  ;;  %v5745_v40 = vpop.permute.xlu2 %979 }
 0x28e   : > { %v5747_v20 = vpop.permute.xlu1 %1349 }
 0x293   : > { %1679 = vrot.lane.b32.xlu0 %v4976_v10, %s4631_s27  ;;  %1663 = vrot.lane.b32.xlu2 %v4989_v16, %s4631_s27  ;;  %v1134_v16 = vsel %vm471_vm0, %v5635_v5, %v5553_v39  ;;  %v1177_v39 = vadd.f32 %v5178_v36, %v1156_v18 }
 0x294   : > { %1925 = vrot.lane.b32.xlu1 %v4961_v3, %s4625_s21  ;;  %v1154_v1 = vmul.f32 %v5172_v28, %v1134_v16  ;;  %v1131_v16 = vsel %vm471_vm0, %v5377_v47, %v5239_v45 }
 0x295   : > { %v5759_v38 = vpop.permute.xlu0 %1119  ;;  %v5765_v46 = vpop.permute.xlu2 %1243 }
 0x296   : > { %8303 = vst [vmem:[#allocation63_spill] sm:$0xff] %v5759_v38  ;;  %v1136_v12 = vsel %vm471_vm0, %v5759_v38, %v5733_v24  ;;  %v5767_v10 = vpop.permute.xlu1 %1225  ;;  %v1133_v24 = vsel %vm471_vm0, %v5615_v49, %v5533_v50 }
 0x297   : > { %v1158_v60 = vmul.f32 %v5172_v28, %v1136_v12  ;;  %v1132_v12 = vsel %vm471_vm0, %v5379_v41, %v5515_v37  ;;  %v1152_v30 = vmul.f32 %v5172_v28, %v1133_v24  ;;  %v1130_v37 = vsel %vm471_vm0, %v5343_v34, %v5208_v63  ;;  %v2207_v63 = vld [vmem:[%s8138_s6 + $0x30] sm:$0xff] }
 0x298   : > { %v1150_v41 = vmul.f32 %v5172_v28, %v1132_v12  ;;  %v1148_v24 = vmul.f32 %v5172_v28, %v1131_v16  ;;  %v1146_v34 = vmul.f32 %v5172_v28, %v1130_v37 }
 0x299   : > { %v1179_v38 = vadd.f32 %v5178_v36, %v1158_v60  ;;  %v1173_v45 = vadd.f32 %v5178_v36, %v1152_v30 }
 0x29a   : > { %v1171_v12 = vadd.f32 %v5178_v36, %v1150_v41  ;;  %v1169_v16 = vadd.f32 %v5178_v36, %v1148_v24  ;;  %v1167_v28 = vadd.f32 %v5178_v36, %v1146_v34  ;;  %v1010_v24 = vsel %vm430_vm3, %v5671_v48, %v5623_v57  ;;  %v8305_v48 = vld [vmem:[#allocation26_spill] sm:$0xff] }
 0x29b   : > { %2246 = vperm.xlu0 %4524, %v2208_v61   ;;  %1677 = vrot.lane.b32.xlu2 %v4961_v3, %s4631_s27  ;;  %v1175_v61 = vadd.f32 %v5178_v36, %v1154_v1  ;;  %v2205_v1 = vld [vmem:[%s8138_s6 + $0x20] sm:$0xff]  ;;  %v1009_v57 = vsel %vm430_vm3, %v5569_v25, %v5509_v32  ;;  %v1007_v32 = vsel %vm430_vm3, %v5434_v17, %v5359_v42 }
 0x29c   : > { %1661 = vrot.lane.b32.xlu1 %v4959_v2, %s4631_s27  ;;  %2274 = vmatpush.msra.mxu2 %v1179_v38  ;;  %v1028_v25 = vmul.f32 %v5142_v7, %v1009_v57  ;;  %v1574_v42 = vsel %vm598_vm7, %v5613_v26, %v5695_v14  ;;  %v1383_v17 = vsel %vm549_vm6, %v5655_v11, %v5747_v20 }
 0x29d   : > { %v5798_v60 = vpop.permute.xlu0 %1351  ;;  %v5811_v47 = vpop.permute.xlu2 %1551 }
 0x29e   : > { %v1550_v3 = vpop.permute.xlu1 %1549  ;;  %2275 = vmatpush.msra.mxu2 %v1177_v39  ;;  %8304 = vst [vmem:[#allocation64_spill] sm:$0xff] %v5811_v47  ;;  %v2206_v39 = vld [vmem:[%s8138_s6 + $0x28] sm:$0xff]  ;;  %v1049_v14 = vadd.f32 %v8305_v48, %v1028_v25 }
 0x29f   : > { %v1583_v18 = vsel %vm598_vm7, %v5697_v8, %v1550_v3 }
 0x2a0   : > { %v1605_v38 = vmul.f32 %v5271_v22, %v1583_v18  ;;  %2276 = vmatpush.msra.mxu2 %v1175_v61  ;;  %v1011_v61 = vsel %vm430_vm3, %v5731_v31, %v5721_v29  ;;  %v8319_v22 = vld [vmem:[#allocation36_spill] sm:$0xff] }
 0x2a2   : > { %v1626_v30 = vadd.f32 %v5283_v55, %v1605_v38  ;;  %2277 = vmatpush.msra.mxu2 %v1173_v45  ;;  %v1032_v38 = vmul.f32 %v5142_v7, %v1011_v61  ;;  %v1030_v61 = vmul.f32 %v5142_v7, %v1010_v24  ;;  %v2105_v55 = vld [vmem:[#allocation3 + $0x180] sm:$0xff] }
 0x2a3   : > { %2231 = vperm.xlu0 %4524, %v2205_v1   ;;  %2236 = vperm.xlu2 %4523, %v2206_v39   ;;  %v2202_v39 = vld [vmem:[%s8138_s6 + $0x8] sm:$0xff] }
 0x2a4   : > { %1642 = vst [vmem:[#allocation3 + $0x2e8] sm:$0xff] %v1626_v30  ;;  %2241 = vperm.xlu1 %4522, %v2207_v63   ;;  %2278 = vmatpush.msra.mxu2 %v1171_v12  ;;  %v2203_v63 = vld [vmem:[%s8138_s6 + $0x10] sm:$0xff]  ;;  %v2204_v12 = vld [vmem:[%s8138_s6 + $0x18] sm:$0xff]  ;;  %v2073_v30 = vld [vmem:[#allocation3 + $0x80] sm:$0xff] }
 0x2a5   : > { %v5831_v18 = vpop.permute.xlu0 %995 }
 0x2a6   : > { %v1012_v41 = vsel %vm430_vm3, %v5831_v18, %v5745_v40  ;;  %v5838_v37 = vpop.permute.xlu1 %1797  ;;  %2279 = vmatpush.msra.mxu2 %v1169_v16  ;;  %v1008_v16 = vsel %vm430_vm3, %v5507_v33, %v5494_v56  ;;  %v1575_v56 = vsel %vm598_vm7, %v1550_v3, %v5697_v8 }
 0x2a7   : > { %v1034_v45 = vmul.f32 %v5142_v7, %v1012_v41  ;;  %v1831_v36 = vsel %vm676_vm9, %v5715_v52, %v5838_v37  ;;  %v1026_v33 = vmul.f32 %v5142_v7, %v1008_v16  ;;  %v2201_v16 = vld [vmem:[%s8138_s6] sm:$0xff] }
 0x2a8   : > { %v1853_v1 = vmul.f32 %v5313_v9, %v1831_v36  ;;  %2280 = vmatpush.msra.mxu2 %v1167_v28  ;;  %v5870_v28 = vpop.permute.xlu2 %1923  ;;  %v1051_v36 = vadd.f32 %v8305_v48, %v1030_v61 }
 0x2a9   : > { %v1055_v34 = vadd.f32 %v8305_v48, %v1034_v45  ;;  %v1053_v45 = vadd.f32 %v8305_v48, %v1032_v38  ;;  %v1024_v38 = vmul.f32 %v5142_v7, %v1007_v32  ;;  %v1573_v7 = vsel %vm598_vm7, %v5593_v44, %v5657_v0 }
 0x2aa   : > { %v1874_v41 = vadd.f32 %v5321_v19, %v1853_v1  ;;  %2281 = vmatpush.msra.mxu2 %v2073_v30  ;;  %v1604_v1 = vmul.f32 %v5269_v21, %v1575_v56  ;;  %v1047_v61 = vadd.f32 %v8305_v48, %v1026_v33  ;;  %v1381_v0 = vsel %vm549_vm6, %v5627_v35, %v5551_v23  ;;  %v8307_v33 = vld [vmem:[#allocation47_spill] sm:$0xff] }
 0x2ab   : > { %2216 = vperm.xlu0 %4524, %v2202_v39   ;;  %2221 = vperm.xlu2 %4523, %v2203_v63   ;;  %v1382_v63 = vsel %vm549_vm6, %v5653_v6, %v5571_v59  ;;  %v1600_v25 = vmul.f32 %v5269_v21, %v1573_v7  ;;  %v1045_v56 = vadd.f32 %v8305_v48, %v1024_v38 }
 0x2ac   : > { %1890 = vst [vmem:[#allocation3 + $0x3e8] sm:$0xff] %v1874_v41  ;;  %2226 = vperm.xlu1 %4522, %v2204_v12   ;;  %2282 = vmatpush.msra.mxu2 %v1055_v34  ;;  %v1602_v34 = vmul.f32 %v5269_v21, %v1574_v42  ;;  %v1404_v12 = vmul.f32 %v5202_v58, %v1383_v17  ;;  %v8309_v17 = vld [vmem:[#allocation51_spill] sm:$0xff] }
 0x2ad   : > { %v5883_v24 = vpop.permute.xlu0 %1567  ;;  %v1572_v41 = vsel %vm598_vm7, %v5577_v51, %v5462_v43  ;;  %v1402_v32 = vmul.f32 %v5202_v58, %v1382_v63  ;;  %v1400_v51 = vmul.f32 %v5202_v58, %v1381_v0 }
 0x2ae   : > { %8306 = vst [vmem:[#allocation26_spill] sm:$0xff] %v5883_v24  ;;  %v1576_v8 = vsel %vm598_vm7, %v5811_v47, %v5883_v24  ;;  %v5898_v3 = vpop.permute.xlu1 %1367  ;;  %2283 = vmatpush.msra.mxu2 %v1053_v45  ;;  %v1625_v45 = vadd.f32 %v5281_v53, %v1604_v1  ;;  %v1623_v1 = vadd.f32 %v5281_v53, %v1602_v34  ;;  %v8321_v24 = vld [vmem:[#allocation53_spill] sm:$0xff]  ;;  %v8322_v47 = vld [vmem:[#allocation46_spill] sm:$0xff] }
 0x2af   : > { %v1606_v39 = vmul.f32 %v5269_v21, %v1576_v8  ;;  %v1384_v26 = vsel %vm549_vm6, %v5898_v3, %v5798_v60  ;;  %v8310_v8 = vld [vmem:[#allocation44_spill] sm:$0xff]  ;;  %v1425_v48 = vadd.f32 %v5210_v4, %v1404_v12  ;;  %v1423_v7 = vadd.f32 %v5210_v4, %v1402_v32 }
 0x2b0   : > { %v1406_v57 = vmul.f32 %v5202_v58, %v1384_v26  ;;  %2284 = vmatpush.msra.mxu2 %v1051_v36  ;;  %v8308_v36 = vld [vmem:[#allocation43_spill] sm:$0xff]  ;;  %v5945_v43 = vpop.permute.xlu2 %1675  ;;  %v1598_v26 = vmul.f32 %v5269_v21, %v1572_v41  ;;  %v5959_v12 = vld [vmem:[#allocation6] sm:$0xff]  ;;  %v5974_v41 = vld [vmem:[%s8134_s2 + $0x10] ss:$8 sm:$0x3] }
 0x2b1   : > { %v1627_v30 = vadd.f32 %v5281_v53, %v1606_v39  ;;  %v1571_v42 = vsel %vm598_vm7, %v8308_v36, %v8307_v33  ;;  %v1380_v39 = vsel %vm549_vm6, %v8310_v8, %v8309_v17  ;;  %8311 = vst [vmem:[#allocation47_spill] sm:$0xff] %v5959_v12  ;;  %v2109_v17 = vld [vmem:[#allocation3 + $0x1a0] sm:$0xff]  ;;  %v8312_v8 = vld [vmem:[#allocation49_spill] sm:$0xff] }
 0x2b2   : > { %v1427_v44 = vadd.f32 %v5210_v4, %v1406_v57  ;;  %2285 = vmatpush.msra.mxu2 %v1049_v14  ;;  %v1398_v63 = vmul.f32 %v5202_v58, %v1380_v39  ;;  %v1621_v57 = vadd.f32 %v5281_v53, %v1600_v25  ;;  %v1596_v34 = vmul.f32 %v5269_v21, %v1571_v42  ;;  %v2057_v58 = vld [vmem:[#allocation3] sm:$0xff] }
 0x2b3   : > { %2356 = vmatpush.msrb.mxu0 %v1627_v30  ;;  %v2059_v30 = vld [vmem:[#allocation3 + $0x10] sm:$0xff]  ;;  %v1619_v0 = vadd.f32 %v5281_v53, %v1598_v26  ;;  %v4525_v25 = vld [vmem:[%s8133_s1 + $0x4] ss:$8 sm:$0x3] }
 0x2b4   : > { %2211 = vperm.xlu1 %4522, %v2201_v16   ;;  %2286 = vmatpush.msra.mxu2 %v1047_v61  ;;  %v1421_v16 = vadd.f32 %v5210_v4, %v1400_v51  ;;  %v5965_v61 = vld [vmem:[%s8133_s1 + $0x10] ss:$8 sm:$0x3]  ;;  %v1617_v21 = vadd.f32 %v5281_v53, %v1596_v34  ;;  %v6005_v51 = vperm.slane %v5974_v41, 0 }
 0x2b5   : > { %v5950_v38 = vpop.permute.xlu0 %1799  ;;  %2315 = vmatpush.msra.mxu3 %v1427_v44  ;;  %2357 = vmatpush.msrb.mxu0 %v1625_v45  ;;  %v1419_v44 = vadd.f32 %v5210_v4, %v1398_v63  ;;  %v5977_v32 = vperm.slane %v5965_v61, 0  ;;  %v5982_v45 = vperm.slane %v4525_v25, 0  ;;  %v2139_v26 = vld [vmem:[#allocation3 + $0x290] sm:$0xff]  ;;  %v4526_v63 = vld [vmem:[%s8134_s2 + $0x4] ss:$8 sm:$0x3] }
 0x2b6   : > { %v5953_v14 = vpop.permute.xlu1 %1937  ;;  %2287 = vmatpush.msra.mxu2 %v1045_v56  ;;  %v1259_v56 = vsel %vm510_vm5, %v5673_v62, %v5767_v10 }
 0x2b7   : > { %2316 = vmatpush.msra.mxu3 %v1425_v48  ;;  %2358 = vmatpush.msrb.mxu0 %v1623_v1  ;;  %v1947_v4 = vsel %vm715_vm4, %v5743_v13, %v5953_v14  ;;  %v1482_v39 = vmul.f32 %v5982_v45, %v8312_v8  ;;  %v2137_v8 = vld [vmem:[#allocation3 + $0x280] sm:$0xff] }
 0x2b8   : > { %2288 = vmatpush.msra.mxu2 %v2059_v30  ;;  %v5994_v33 = vpop.permute.xlu2 %1935  ;;  %v1976_v34 = vmul.f32 %v5977_v32, %v1947_v4 }
 0x2b9   : > { %2317 = vmatpush.msra.mxu3 %v1423_v7  ;;  %2359 = vmatpush.msrb.mxu0 %v1621_v57  ;;  %v6015_v7 = vperm.slane %v4526_v63, 0  ;;  %v8313_v57 = vld [vmem:[#allocation54_spill] sm:$0xff] }
 0x2ba   : > { %2289 = vmatpush.msra.mxu2 %v2057_v58  ;;  %v1258_v30 = vsel %vm510_vm5, %v8313_v57, %v5703_v15  ;;  %v8317_v63 = vld [vmem:[#allocation50_spill] sm:$0xff] }
 0x2bb   : > { %2318 = vmatpush.msra.mxu3 %v1421_v16  ;;  %2290 = vmatmul.f32.vlgmr.msra.gmra.mxu2 %v5959_v12  ;;  %v8314_v16 = vld [vmem:[#allocation32_spill] sm:$0xff]  ;;  %v1257_v4 = vsel %vm510_vm5, %v8317_v63, %v5639_v54  ;;  %v8318_v12 = vld [vmem:[#allocation34_spill] sm:$0xff]  ;;  %v1256_v54 = vsel %vm510_vm5, %v8322_v47, %v8321_v24  ;;  %v8323_v24 = vld [vmem:[#allocation23_spill] sm:$0xff] }
 0x2bc   : > { %2360 = vmatpush.msrb.mxu0 %v1619_v0  ;;  %v2107_v0 = vld [vmem:[#allocation3 + $0x190] sm:$0xff] }
 0x2bd   : > { %v5988_v53 = vpop.permute.xlu0 %1939  ;;  %2319 = vmatpush.msra.mxu3 %v1419_v44  ;;  %v6023_v44 = vld [vmem:[#allocation6 + $0x28] sm:$0xff] }
 0x2be   : > { %v1948_v36 = vsel %vm715_vm4, %v5870_v28, %v5988_v53  ;;  %v6000_v42 = vpop.permute.xlu1 %1227  ;;  %2361 = vmatpush.msrb.mxu0 %v1617_v21  ;;  %8315 = vst [vmem:[#allocation43_spill] sm:$0xff] %v6023_v44  ;;  %v8316_v21 = vld [vmem:[#allocation45_spill] sm:$0xff] }
 0x2bf   : > { %v1978_v1 = vmul.f32 %v5977_v32, %v1948_v36  ;;  %v1260_v48 = vsel %vm510_vm5, %v5765_v46, %v6000_v42  ;;  %2320 = vmatpush.msra.mxu3 %v2109_v17  ;;  %v1480_v25 = vmul.f32 %v5982_v45, %v8316_v21  ;;  %v1280_v36 = vmul.f32 %v8314_v16, %v1259_v56 }
 0x2c0   : > { %v1282_v58 = vmul.f32 %v8314_v16, %v1260_v48  ;;  %2362 = vmatpush.msrb.mxu0 %v2139_v26  ;;  %v1503_v26 = vadd.f32 %v6015_v7, %v1482_v39  ;;  %v1478_v21 = vmul.f32 %v5982_v45, %v8319_v22  ;;  %v1278_v56 = vmul.f32 %v8314_v16, %v1258_v30 }
 0x2c1   : > { %v1999_v17 = vadd.f32 %v6005_v51, %v1978_v1  ;;  %2321 = vmatpush.msra.mxu3 %v2107_v0  ;;  %v8320_v1 = vld [vmem:[#allocation24_spill] sm:$0xff]  ;;  %v1501_v39 = vadd.f32 %v6015_v7, %v1480_v25  ;;  %v1276_v22 = vmul.f32 %v8314_v16, %v1257_v4  ;;  %v1823_v30 = vsel %vm676_vm9, %v5838_v37, %v5715_v52  ;;  %v8326_v37 = vld [vmem:[#allocation57_spill] sm:$0xff] }
 0x2c2   : > { %v1303_v48 = vadd.f32 %v8318_v12, %v1282_v58  ;;  %2363 = vmatpush.msrb.mxu0 %v2137_v8  ;;  %v1476_v0 = vmul.f32 %v5982_v45, %v8320_v1  ;;  %v1997_v58 = vadd.f32 %v6005_v51, %v1976_v34  ;;  %v1499_v47 = vadd.f32 %v6015_v7, %v1478_v21  ;;  %v8324_v25 = vld [vmem:[#allocation20_spill] sm:$0xff]  ;;  %v8327_v21 = vld [vmem:[#allocation39_spill] sm:$0xff] }
 0x2c3   : > { %2322 = vmatpush.msra.mxu3 %v2105_v55  ;;  %2293 = vmatmul.f32.gmra.mxu2 %v6023_v44  ;;  %v1301_v55 = vadd.f32 %v8318_v12, %v1280_v36  ;;  %v1474_v34 = vmul.f32 %v5982_v45, %v8323_v24  ;;  %v1472_v36 = vmul.f32 %v5982_v45, %v8324_v25  ;;  %v8325_v52 = vld [vmem:[#allocation60_spill] sm:$0xff]  ;;  %v8328_v24 = vld [vmem:[#allocation59_spill] sm:$0xff] }
 0x2c4   : > { %2364 = vmatpush.msrb.mxu0 %v1503_v26  ;;  %2446 = vmatpush.msrb.mxu2 %v1999_v17  ;;  %v1274_v17 = vmul.f32 %v8314_v16, %v1256_v54  ;;  %v1299_v4 = vadd.f32 %v8318_v12, %v1278_v56  ;;  %v1852_v1 = vmul.f32 %v8327_v21, %v1823_v30  ;;  %v6077_v56 = vld [vmem:[#allocation6 + $0x50] sm:$0xff]  ;;  %v8329_v25 = vld [vmem:[#allocation56_spill] sm:$0xff] }
 0x2c5   : > { %v6053_v8 = vpop.permute.xlu0 %1691  ;;  %2323 = vmatpush.msra.mxu3 %v1303_v48  ;;  %v1822_v48 = vsel %vm676_vm9, %v8326_v37, %v8325_v52  ;;  %v1497_v16 = vadd.f32 %v6015_v7, %v1476_v0  ;;  %v1297_v54 = vadd.f32 %v8318_v12, %v1276_v22  ;;  %v1821_v52 = vsel %vm676_vm9, %v8329_v25, %v8328_v24  ;;  %v8333_v22 = vld [vmem:[#allocation41_spill] sm:$0xff] }
 0x2c6   : > { %v6055_v63 = vpop.permute.xlu1 %1815  ;;  %2365 = vmatpush.msrb.mxu0 %v1501_v39  ;;  %2447 = vmatpush.msrb.mxu2 %v1997_v58  ;;  %v6073_v58 = vpop.permute.xlu2 %1917  ;;  %v1468_v37 = vmul.f32 %v5982_v45, %v4959_v2  ;;  %v1850_v44 = vmul.f32 %v8327_v21, %v1822_v48  ;;  %v1495_v9 = vadd.f32 %v6015_v7, %v1474_v34  ;;  %v8334_v48 = vld [vmem:[#allocation63_spill] sm:$0xff]  ;;  %v8335_v25 = vld [vmem:[#allocation61_spill] sm:$0xff] }
 0x2c7   : > { %v1824_v26 = vsel %vm676_vm9, %v5950_v38, %v6055_v63  ;;  %2324 = vmatpush.msra.mxu3 %v1301_v55  ;;  %v8330_v55 = vld [vmem:[#allocation15_spill] sm:$0xff]  ;;  %v1376_v24 = vsel %vm549_vm6, %v5798_v60, %v5898_v3  ;;  %v1493_v2 = vadd.f32 %v6015_v7, %v1472_v36  ;;  %v1873_v34 = vadd.f32 %v8333_v22, %v1852_v1  ;;  %v8337_v1 = vld [vmem:[#allocation62_spill] sm:$0xff] }
 0x2c8   : > { %v1854_v39 = vmul.f32 %v8327_v21, %v1824_v26  ;;  %2366 = vmatpush.msrb.mxu0 %v1499_v47  ;;  %v1470_v30 = vmul.f32 %v5982_v45, %v8330_v55  ;;  %v8331_v26 = vld [vmem:[#allocation48_spill] sm:$0xff]  ;;  %v8332_v47 = vld [vmem:[#allocation55_spill] sm:$0xff]  ;;  %v1848_v45 = vmul.f32 %v8327_v21, %v1821_v52  ;;  %v1375_v60 = vsel %vm549_vm6, %v5747_v20, %v5655_v11 }
 0x2c9   : > { %2325 = vmatpush.msra.mxu3 %v1299_v4  ;;  %v1820_v0 = vsel %vm676_vm9, %v8332_v47, %v8331_v26  ;;  %v1295_v4 = vadd.f32 %v8318_v12, %v1274_v17  ;;  %v1489_v17 = vadd.f32 %v6015_v7, %v1468_v37  ;;  %v2093_v55 = vld [vmem:[#allocation3 + $0x120] sm:$0xff] }
 0x2ca   : > { %v1875_v19 = vadd.f32 %v8333_v22, %v1854_v39  ;;  %2367 = vmatpush.msrb.mxu0 %v1497_v16  ;;  %v1128_v39 = vsel %vm471_vm0, %v8335_v25, %v8334_v48  ;;  %v1846_v12 = vmul.f32 %v8327_v21, %v1820_v0  ;;  %v1491_v36 = vadd.f32 %v6015_v7, %v1470_v30  ;;  %v8339_v11 = vld [vmem:[#allocation52_spill] sm:$0xff]  ;;  %v8341_v25 = vld [vmem:[#allocation31_spill] sm:$0xff] }
 0x2cb   : > { %2326 = vmatpush.msra.mxu3 %v1297_v54  ;;  %2296 = vmatmul.f32.gmra.mxu2 %v6077_v56  ;;  %v1871_v16 = vadd.f32 %v8333_v22, %v1850_v44  ;;  %v8336_v54 = vld [vmem:[#allocation58_spill] sm:$0xff]  ;;  %v1126_v20 = vsel %vm471_vm0, %v8339_v11, %v5635_v5  ;;  %v1374_v7 = vsel %vm549_vm6, %v5571_v59, %v5653_v6  ;;  %v8340_v44 = vld [vmem:[#allocation28_spill] sm:$0xff] }
 0x2cc   : > { %2368 = vmatpush.msrb.mxu0 %v1495_v9  ;;  %2397 = vmatpush.msrb.mxu1 %v1875_v19  ;;  %v1127_v9 = vsel %vm471_vm0, %v8337_v1, %v8336_v54  ;;  %v8338_v19 = vld [vmem:[#allocation30_spill] sm:$0xff]  ;;  %v1159_v30 = vmul.f32 %v8340_v44, %v1128_v39  ;;  %v1869_v26 = vadd.f32 %v8333_v22, %v1848_v45  ;;  %v6157_v45 = vld [vmem:[#allocation6 + $0x8] sm:$0xff] }
 0x2cd   : > { %v6113_v3 = vpop.permute.xlu0 %1673  ;;  %2327 = vmatpush.msra.mxu3 %v1295_v4  ;;  %v1407_v21 = vmul.f32 %v8338_v19, %v1376_v24  ;;  %v1405_v47 = vmul.f32 %v8338_v19, %v1375_v60  ;;  %v2091_v5 = vld [vmem:[#allocation3 + $0x110] sm:$0xff]  ;;  %v6141_v4 = vld [vmem:[#allocation6 + $0x78] sm:$0xff]  ;;  %v1125_v59 = vsel %vm471_vm0, %v5533_v50, %v5615_v49  ;;  %v1373_v6 = vsel %vm549_vm6, %v5551_v23, %v5627_v35 }
 0x2ce   : > { %v6123_v52 = vpop.permute.xlu1 %1919  ;;  %2369 = vmatpush.msrb.mxu0 %v1493_v2  ;;  %2398 = vmatpush.msrb.mxu1 %v1873_v34  ;;  %v1157_v24 = vmul.f32 %v8340_v44, %v1127_v9  ;;  %v6155_v2 = vld [vmem:[%s8133_s1 + $0x6] ss:$8 sm:$0x3]  ;;  %v1403_v48 = vmul.f32 %v8338_v19, %v1374_v7  ;;  %v6161_v49 = vpop.permute.xlu2 %1687  ;;  %v1867_v23 = vadd.f32 %v8333_v22, %v1846_v12 }
 0x2cf   : > { %v1946_v37 = vsel %vm715_vm4, %v6123_v52, %v5994_v33  ;;  %2328 = vmatpush.msra.mxu3 %v2093_v55  ;;  %v1428_v39 = vadd.f32 %v8341_v25, %v1407_v21  ;;  %v2089_v34 = vld [vmem:[#allocation3 + $0x100] sm:$0xff]  ;;  %v1155_v35 = vmul.f32 %v8340_v44, %v1126_v20  ;;  %v8342_v60 = vld [vmem:[#allocation29_spill] sm:$0xff]  ;;  %v1426_v54 = vadd.f32 %v8341_v25, %v1405_v47  ;;  %v6194_v20 = vld [vmem:[#allocation6 + $0x10] sm:$0xff] }
 0x2d0   : > { %v1974_v0 = vmul.f32 %v5977_v32, %v1946_v37  ;;  %2370 = vmatpush.msrb.mxu0 %v1491_v36  ;;  %2399 = vmatpush.msrb.mxu1 %v1871_v16  ;;  %v1180_v36 = vadd.f32 %v8342_v60, %v1159_v30  ;;  %v1401_v16 = vmul.f32 %v8338_v19, %v1373_v6  ;;  %v6171_v1 = vperm.slane %v6155_v2, 0  ;;  %v6179_v12 = vld [vmem:[%s8134_s2 + $0x6] ss:$8 sm:$0x3]  ;;  %v2171_v6 = vld [vmem:[#allocation3 + $0x390] sm:$0xff] }
 0x2d1   : > { %2329 = vmatpush.msra.mxu3 %v2091_v5  ;;  %v1178_v22 = vadd.f32 %v8342_v60, %v1157_v24  ;;  %v1700_v9 = vsel %vm637_vm8, %v5945_v43, %v6053_v8  ;;  %v1424_v21 = vadd.f32 %v8341_v25, %v1403_v48  ;;  %v1176_v7 = vadd.f32 %v8342_v60, %v1155_v35  ;;  %v2173_v37 = vld [vmem:[#allocation3 + $0x3a0] sm:$0xff]  ;;  %v6210_v24 = vld [vmem:[#allocation6 + $0x30] sm:$0xff] }
 0x2d2   : > { %v1995_v50 = vadd.f32 %v6005_v51, %v1974_v0  ;;  %2371 = vmatpush.msrb.mxu0 %v1489_v17  ;;  %2400 = vmatpush.msrb.mxu1 %v1869_v26  ;;  %v1153_v17 = vmul.f32 %v8340_v44, %v1125_v59  ;;  %v1422_v26 = vadd.f32 %v8341_v25, %v1401_v16  ;;  %v6204_v47 = vperm.slane %v6179_v12, 0  ;;  %v6207_v5 = vld [vmem:[#allocation6 + $0xa0] sm:$0xff] }
 0x2d3   : > { %2330 = vmatpush.msra.mxu3 %v2089_v34  ;;  %2299 = vmatmul.f32.gmra.mxu2 %v6141_v4  ;;  %v1730_v0 = vmul.f32 %v6171_v1, %v1700_v9  ;;  %v1252_v34 = vsel %vm510_vm5, %v6000_v42, %v5765_v46  ;;  %v1251_v46 = vsel %vm510_vm5, %v5767_v10, %v5673_v62  ;;  %v6247_v62 = vld [vmem:[#allocation6 + $0x38] sm:$0xff] }
 0x2d4   : > { %2331 = vmatmul.f32.vlgmr.msra.gmra.mxu3 %v6157_v45  ;;  %2520 = vmatpush.msra.mxu0 %v1428_v39  ;;  %v1174_v59 = vadd.f32 %v8342_v60, %v1153_v17  ;;  %v2169_v39 = vld [vmem:[#allocation3 + $0x380] sm:$0xff]  ;;  %v2080_v60 = vld [vmem:[#allocation3 + $0xb8] sm:$0xff]  ;;  %v2110_v17 = vld [vmem:[#allocation3 + $0x1a8] sm:$0xff] }
 0x2d5   : > { %v6185_v19 = vpop.permute.xlu0 %1933  ;;  %2479 = vmatpush.msrb.mxu3 %v1180_v36  ;;  %2401 = vmatpush.msrb.mxu1 %v1867_v23  ;;  %v1751_v23 = vadd.f32 %v6204_v47, %v1730_v0  ;;  %v2112_v36 = vld [vmem:[#allocation3 + $0x1b8] sm:$0xff] }
 0x2d6   : > { %v1945_v55 = vsel %vm715_vm4, %v6073_v58, %v6185_v19  ;;  %v6192_v11 = vpop.permute.xlu1 %1689  ;;  %2448 = vmatpush.msrb.mxu2 %v1995_v50  ;;  %2521 = vmatpush.msra.mxu0 %v1426_v54  ;;  %v1004_v50 = vsel %vm430_vm3, %v5745_v40, %v5831_v18  ;;  %v6225_v35 = vpop.permute.xlu2 %1669  ;;  %v1003_v40 = vsel %vm430_vm3, %v5721_v29, %v5731_v31  ;;  %v2078_v54 = vld [vmem:[#allocation3 + $0xa8] sm:$0xff]  ;;  %v2076_v10 = vld [vmem:[#allocation3 + $0x98] sm:$0xff] }
 0x2d7   : > { %v1972_v44 = vmul.f32 %v5977_v32, %v1945_v55  ;;  %v1699_v30 = vsel %vm637_vm8, %v6113_v3, %v6192_v11  ;;  %2480 = vmatpush.msrb.mxu3 %v1178_v22  ;;  %2402 = vmatpush.msrb.mxu1 %v2173_v37  ;;  %v8343_v22 = vld [vmem:[#allocation25_spill] sm:$0xff] }
 0x2d8   : > { %2522 = vmatpush.msra.mxu0 %v1424_v21  ;;  %v1728_v25 = vmul.f32 %v6171_v1, %v1699_v30  ;;  %v1035_v9 = vmul.f32 %v8343_v22, %v1004_v50  ;;  %v8344_v21 = vld [vmem:[#allocation33_spill] sm:$0xff]  ;;  %v1033_v30 = vmul.f32 %v8343_v22, %v1003_v40  ;;  %v8346_v50 = vld [vmem:[#allocation35_spill] sm:$0xff] }
 0x2d9   : > { %2481 = vmatpush.msrb.mxu3 %v1176_v7  ;;  %2372 = vmatmul.f32.vlgmr.msrb.gmra.mxu0 %v6194_v20  ;;  %v1993_v48 = vadd.f32 %v6005_v51, %v1972_v44  ;;  %v1283_v55 = vmul.f32 %v8344_v21, %v1252_v34  ;;  %v2108_v7 = vld [vmem:[#allocation3 + $0x198] sm:$0xff]  ;;  %v1250_v44 = vsel %vm510_vm5, %v5703_v15, %v8313_v57  ;;  %v6255_v37 = vld [vmem:[#allocation6 + $0xc8] sm:$0xff] }
 0x2da   : > { %2403 = vmatpush.msrb.mxu1 %v2171_v6  ;;  %2523 = vmatpush.msra.mxu0 %v1422_v26  ;;  %v1749_v18 = vadd.f32 %v6204_v47, %v1728_v25  ;;  %v6257_v26 = vld [vmem:[#allocation6 + $0x58] sm:$0xff]  ;;  %v1281_v0 = vmul.f32 %v8344_v21, %v1251_v46  ;;  %v2074_v6 = vld [vmem:[#allocation3 + $0x88] sm:$0xff]  ;;  %v1279_v57 = vmul.f32 %v8344_v21, %v1250_v44 }
 0x2db   : > { %2482 = vmatpush.msrb.mxu3 %v1174_v59  ;;  %2302 = vmatmul.f32.gmra.mxu2 %v6207_v5  ;;  %v8345_v25 = vld [vmem:[#allocation27_spill] sm:$0xff]  ;;  %v1304_v15 = vadd.f32 %v8346_v50, %v1283_v55  ;;  %v6283_v21 = vld [vmem:[#allocation6 + $0x60] sm:$0xff] }
 0x2dc   : > { %2404 = vmatpush.msrb.mxu1 %v2169_v39  ;;  %2334 = vmatmul.f32.gmra.mxu3 %v6210_v24  ;;  %v1056_v39 = vadd.f32 %v8345_v25, %v1035_v9  ;;  %v1054_v34 = vadd.f32 %v8345_v25, %v1033_v30  ;;  %v2068_v9 = vld [vmem:[#allocation3 + $0x58] sm:$0xff]  ;;  %v2098_v44 = vld [vmem:[#allocation3 + $0x148] sm:$0xff]  ;;  %v1956_v30 = vsel %vm715_vm4, %v5988_v53, %v5870_v28 }
 0x2dd   : > { %v6228_v16 = vpop.permute.xlu0 %1915  ;;  %2483 = vmatpush.msrb.mxu3 %v2080_v60  ;;  %2524 = vmatpush.msra.mxu0 %v2112_v36  ;;  %v1302_v60 = vadd.f32 %v8346_v50, %v1281_v0  ;;  %v6298_v0 = vperm.slane %v5965_v61, 1  ;;  %v1955_v25 = vsel %vm715_vm4, %v5953_v14, %v5743_v13  ;;  %v2062_v53 = vld [vmem:[#allocation3 + $0x28] sm:$0xff] }
 0x2de   : > { %v6239_v42 = vpop.permute.xlu1 %1671  ;;  %2405 = vmatpush.msrb.mxu1 %v1751_v23  ;;  %2449 = vmatpush.msrb.mxu2 %v1993_v48  ;;  %v2106_v48 = vld [vmem:[#allocation3 + $0x188] sm:$0xff]  ;;  %v6271_v36 = vpop.permute.xlu2 %1929 }
 0x2df   : > { %v1698_v31 = vsel %vm637_vm8, %v6239_v42, %v6161_v49  ;;  %2484 = vmatpush.msrb.mxu3 %v2078_v54  ;;  %2525 = vmatpush.msra.mxu0 %v2110_v17  ;;  %v1300_v17 = vadd.f32 %v8346_v50, %v1279_v57  ;;  %v1979_v28 = vmul.f32 %v6298_v0, %v1956_v30  ;;  %v2094_v50 = vld [vmem:[#allocation3 + $0x128] sm:$0xff] }
 0x2e0   : > { %v1726_v29 = vmul.f32 %v6171_v1, %v1698_v31  ;;  %2406 = vmatpush.msrb.mxu1 %v1749_v18  ;;  %v6286_v31 = vld [vmem:[#allocation6 + $0xf0] sm:$0xff]  ;;  %v6316_v14 = vld [vmem:[#allocation6 + $0x88] sm:$0xff] }
 0x2e1   : > { %2485 = vmatpush.msrb.mxu3 %v2076_v10  ;;  %2526 = vmatpush.msra.mxu0 %v2108_v7  ;;  %v6288_v10 = vld [vmem:[#allocation6 + $0x80] sm:$0xff] }
 0x2e2   : > { %v1747_v59 = vadd.f32 %v6204_v47, %v1726_v29  ;;  %2375 = vmatmul.f32.gmra.mxu0 %v6247_v62  ;;  %v2066_v29 = vld [vmem:[#allocation3 + $0x48] sm:$0xff] }
 0x2e3   : > { %2486 = vmatpush.msrb.mxu3 %v2074_v6  ;;  %2527 = vmatpush.msra.mxu0 %v2106_v48  ;;  %v2064_v6 = vld [vmem:[#allocation3 + $0x38] sm:$0xff] }
 0x2e4   : > { %2305 = vmatmul.f32.gmra.mxu2 %v6255_v37  ;;  %2337 = vmatmul.f32.gmra.mxu3 %v6257_v26  ;;  %v2096_v48 = vld [vmem:[#allocation3 + $0x138] sm:$0xff] }
 0x2e5   : > { %v6268_v23 = vpop.permute.xlu0 %1685  ;;  %2487 = vmatpush.msrb.mxu3 %v1056_v39  ;;  %2528 = vmatpush.msra.mxu0 %v1304_v15  ;;  %v1954_v15 = vsel %vm715_vm4, %v5994_v33, %v6123_v52  ;;  %v6327_v52 = vld [vmem:[#allocation6 + $0x118] sm:$0xff] }
 0x2e6   : > { %v1697_v40 = vsel %vm637_vm8, %v6225_v35, %v6268_v23  ;;  %v1932_v46 = vpop.permute.xlu1 %1931  ;;  %2407 = vmatpush.msrb.mxu1 %v1747_v59  ;;  %v1912_v57 = vpop.permute.xlu2 %1911 }
 0x2e7   : > { %v1724_v18 = vmul.f32 %v6171_v1, %v1697_v40  ;;  %v1944_v54 = vsel %vm715_vm4, %v6228_v16, %v1932_v46  ;;  %2488 = vmatpush.msrb.mxu3 %v1054_v34  ;;  %2529 = vmatpush.msra.mxu0 %v1302_v60  ;;  %v6319_v34 = vperm.slane %v5974_v41, 1  ;;  %v1977_v60 = vmul.f32 %v6298_v0, %v1955_v25  ;;  %v2060_v40 = vld [vmem:[#allocation3 + $0x18] sm:$0xff] }
 0x2e8   : > { %v1970_v22 = vmul.f32 %v5977_v32, %v1944_v54  ;;  %v1953_v54 = vsel %vm715_vm4, %v6185_v19, %v6073_v58  ;;  %v1975_v41 = vmul.f32 %v6298_v0, %v1954_v15  ;;  %v1952_v58 = vsel %vm715_vm4, %v1932_v46, %v6228_v16 }
 0x2e9   : > { %v1745_v55 = vadd.f32 %v6204_v47, %v1724_v18  ;;  %2489 = vmatpush.msrb.mxu3 %v2068_v9  ;;  %2530 = vmatpush.msra.mxu0 %v1300_v17  ;;  %v2092_v18 = vld [vmem:[#allocation3 + $0x118] sm:$0xff]  ;;  %v2000_v17 = vadd.f32 %v6319_v34, %v1979_v28  ;;  %v2090_v9 = vld [vmem:[#allocation3 + $0x108] sm:$0xff]  ;;  %v1998_v19 = vadd.f32 %v6319_v34, %v1977_v60 }
 0x2ea   : > { %v1991_v7 = vadd.f32 %v6005_v51, %v1970_v22  ;;  %2378 = vmatmul.f32.gmra.mxu0 %v6283_v21  ;;  %v2058_v22 = vld [vmem:[#allocation3 + $0x8] sm:$0xff]  ;;  %v1996_v16 = vadd.f32 %v6319_v34, %v1975_v41  ;;  %v1971_v46 = vmul.f32 %v6298_v0, %v1952_v58  ;;  %v6358_v28 = vld [vmem:[#allocation6 + $0xb0] sm:$0xff] }
 0x2eb   : > { %2490 = vmatpush.msrb.mxu3 %v2066_v29  ;;  %2531 = vmatpush.msra.mxu0 %v2098_v44  ;;  %v1973_v29 = vmul.f32 %v6298_v0, %v1953_v54 }
 0x2ec   : > { %2308 = vmatmul.f32.gmra.mxu2 %v6286_v31  ;;  %2340 = vmatmul.f32.gmra.mxu3 %v6288_v10  ;;  %v1992_v60 = vadd.f32 %v6319_v34, %v1971_v46  ;;  %v8347_v46 = vld [vmem:[#allocation40_spill] sm:$0xff] }
 0x2ed   : > { %v6300_v59 = vpop.permute.xlu0 %1667  ;;  %2408 = vmatpush.msrb.mxu1 %v1745_v55  ;;  %2491 = vmatpush.msrb.mxu3 %v2064_v6  ;;  %v6331_v55 = vld [vmem:[#allocation6 + $0xa8] sm:$0xff] }
 0x2ee   : > { %v1914_v39 = vpop.permute.xlu1 %1913  ;;  %2532 = vmatpush.msra.mxu0 %v2096_v48  ;;  %2450 = vmatpush.msrb.mxu2 %v1991_v7  ;;  %v6363_v15 = vpop.permute.xlu2 %1681 }
 0x2ef   : > { %v1943_v61 = vsel %vm715_vm4, %v1914_v39, %v6271_v36  ;;  %2492 = vmatpush.msrb.mxu3 %v2062_v53  ;;  %v1951_v44 = vsel %vm715_vm4, %v6271_v36, %v1914_v39 }
 0x2f0   : > { %v1968_v13 = vmul.f32 %v5977_v32, %v1943_v61  ;;  %2533 = vmatpush.msra.mxu0 %v2094_v50  ;;  %v1994_v61 = vadd.f32 %v6319_v34, %v1973_v29  ;;  %v1969_v53 = vmul.f32 %v6298_v0, %v1951_v44  ;;  %v1832_v29 = vsel %vm676_vm9, %v6055_v63, %v5950_v38 }
 0x2f1   : > { %2493 = vmatpush.msrb.mxu3 %v2060_v40 }
 0x2f2   : > { %v1989_v33 = vadd.f32 %v6005_v51, %v1968_v13  ;;  %2534 = vmatpush.msra.mxu0 %v2092_v18  ;;  %v1990_v18 = vadd.f32 %v6319_v34, %v1969_v53 }
 0x2f3   : > { %2381 = vmatmul.f32.gmra.mxu0 %v6316_v14  ;;  %2494 = vmatpush.msrb.mxu3 %v2058_v22 }
 0x2f4   : > { %2535 = vmatpush.msra.mxu0 %v2090_v9  ;;  %2311 = vmatmul.f32.gmra.mxu2 %v6327_v52  ;;  %v6381_v9 = vld [vmem:[#allocation6 + $0xd8] sm:$0xff] }
 0x2f5   : > { %v1928_v7 = vpop.permute.xlu0 %1927  ;;  %2651 = vmatpush.msra.mxu3 %v2000_v17  ;;  %2451 = vmatpush.msrb.mxu2 %v1989_v33 }
 0x2f6   : > { %v1942_v30 = vsel %vm715_vm4, %v1912_v57, %v1928_v7  ;;  %v6345_v6 = vpop.permute.xlu1 %1683  ;;  %2343 = vmatmul.f32.gmra.mxu3 %v6331_v55  ;;  %v1950_v36 = vsel %vm715_vm4, %v1928_v7, %v1912_v57  ;;  %v6368_v57 = vld [vmem:[#allocation6 + $0xd0] sm:$0xff]  ;;  %v6391_v7 = vpop.permute.xlu2 %1663 }
 0x2f7   : > { %v1966_v48 = vmul.f32 %v5977_v32, %v1942_v30  ;;  %v1696_v25 = vsel %vm637_vm8, %v6300_v59, %v6345_v6  ;;  %2652 = vmatpush.msra.mxu3 %v1998_v19  ;;  %v1967_v40 = vmul.f32 %v6298_v0, %v1950_v36  ;;  %v6384_v19 = vld [vmem:[#allocation6 + $0xf8] sm:$0xff] }
 0x2f8   : > { %v1722_v39 = vmul.f32 %v6171_v1, %v1696_v25 }
 0x2f9   : > { %v1987_v50 = vadd.f32 %v6005_v51, %v1966_v48  ;;  %2653 = vmatpush.msra.mxu3 %v1996_v16  ;;  %v1988_v17 = vadd.f32 %v6319_v34, %v1967_v40  ;;  %v1855_v48 = vmul.f32 %v8347_v46, %v1832_v29  ;;  %v6436_v46 = vld [vmem:[#allocation6 + $0x128] sm:$0xff] }
 0x2fa   : > { %v1743_v13 = vadd.f32 %v6204_v47, %v1722_v39 }
 0x2fb   : > { %2654 = vmatpush.msra.mxu3 %v1994_v61  ;;  %2384 = vmatmul.f32.gmra.mxu0 %v6358_v28  ;;  %v6408_v61 = vld [vmem:[#allocation6 + $0x100] sm:$0xff] }
 0x2fc   : > { %2409 = vmatpush.msrb.mxu1 %v1743_v13  ;;  %2452 = vmatpush.msrb.mxu2 %v1987_v50 }
 0x2fd   : > { %v1910_v54 = vpop.permute.xlu0 %1909  ;;  %2655 = vmatpush.msra.mxu3 %v1992_v60  ;;  %v8348_v60 = vld [vmem:[#allocation42_spill] sm:$0xff] }
 0x2fe   : > { %v6372_v33 = vpop.permute.xlu1 %1665  ;;  %2346 = vmatmul.f32.gmra.mxu3 %v6368_v57  ;;  %v1876_v40 = vadd.f32 %v8348_v60, %v1855_v48  ;;  %v1734_v60 = vperm.slane %v6179_v12, 1  ;;  %v1705_v12 = vsel %vm637_vm8, %v6268_v23, %v6225_v35  ;;  %v2144_v23 = vld [vmem:[#allocation3 + $0x2b8] sm:$0xff] }
 0x2ff   : > { %v1695_v41 = vsel %vm637_vm8, %v6372_v33, %v6363_v15  ;;  %2656 = vmatpush.msra.mxu3 %v1990_v18  ;;  %v6414_v18 = vld [vmem:[#allocation6 + $0x120] sm:$0xff] }
 0x300   : > { %v1720_v22 = vmul.f32 %v6171_v1, %v1695_v41  ;;  %v2182_v41 = vld [vmem:[#allocation3 + $0x3e8] sm:$0xff] }
 0x301   : > { %2657 = vmatpush.msra.mxu3 %v1988_v17 }
 0x302   : > { %v1741_v58 = vadd.f32 %v6204_v47, %v1720_v22 }
 0x303   : > { %2387 = vmatmul.f32.gmra.mxu0 %v6381_v9 }
 0x304   : > { %2410 = vmatpush.msrb.mxu1 %v1741_v58  ;;  %v8351_v58 = vld [vmem:[#allocation37_spill] sm:$0xff] }
 0x305   : > { %v6393_v44 = vpop.permute.xlu0 %1679 }
 0x306   : > { %v1694_v30 = vsel %vm637_vm8, %v6391_v7, %v6393_v44  ;;  %v1926_v16 = vpop.permute.xlu1 %1925  ;;  %2349 = vmatmul.f32.gmra.mxu3 %v6384_v19 }
 0x307   : > { %v1718_v25 = vmul.f32 %v6171_v1, %v1694_v30  ;;  %v1941_v38 = vsel %vm715_vm4, %v1910_v54, %v1926_v16  ;;  %v1949_v63 = vsel %vm715_vm4, %v1926_v16, %v1910_v54  ;;  %v6417_v54 = vld [vmem:[#allocation6 + $0x20] sm:$0xff]  ;;  %v2180_v16 = vld [vmem:[#allocation3 + $0x3d8] sm:$0xff] }
 0x308   : > { %v1964_v36 = vmul.f32 %v5977_v32, %v1941_v38  ;;  %v1965_v39 = vmul.f32 %v6298_v0, %v1949_v63  ;;  %v8349_v32 = vld [vmem:[#allocation64_spill] sm:$0xff]  ;;  %v8350_v0 = vld [vmem:[#allocation26_spill] sm:$0xff]  ;;  %v6439_v38 = vld [vmem:[#allocation6 + $0x18] sm:$0xff]  ;;  %v6442_v63 = vperm.slane %v6155_v2, 1  ;;  %v1707_v2 = vsel %vm637_vm8, %v6192_v11, %v6113_v3 }
 0x309   : > { %v1739_v53 = vadd.f32 %v6204_v47, %v1718_v25  ;;  %v1584_v17 = vsel %vm598_vm7, %v8350_v0, %v8349_v32  ;;  %v2178_v25 = vld [vmem:[#allocation3 + $0x3c8] sm:$0xff]  ;;  %v2172_v3 = vld [vmem:[#allocation3 + $0x398] sm:$0xff] }
 0x30a   : > { %v1985_v50 = vadd.f32 %v6005_v51, %v1964_v36  ;;  %v1986_v13 = vadd.f32 %v6319_v34, %v1965_v39  ;;  %v6423_v51 = vpop.permute.xlu2 %1677  ;;  %v1607_v29 = vmul.f32 %v8351_v58, %v1584_v17  ;;  %v8352_v36 = vld [vmem:[#allocation38_spill] sm:$0xff]  ;;  %v1729_v11 = vmul.f32 %v6442_v63, %v1707_v2  ;;  %v2170_v0 = vld [vmem:[#allocation3 + $0x388] sm:$0xff] }
 0x30b   : > { %2390 = vmatmul.f32.gmra.mxu0 %v6408_v61  ;;  %2411 = vmatpush.msrb.mxu1 %v1739_v53  ;;  %v2176_v53 = vld [vmem:[#allocation3 + $0x3b8] sm:$0xff]  ;;  %v6471_v17 = vld [vmem:[#allocation6 + $0x40] sm:$0xff]  ;;  %v1725_v35 = vmul.f32 %v6442_v63, %v1705_v12 }
 0x30c   : > { %2453 = vmatpush.msrb.mxu2 %v1985_v50  ;;  %2658 = vmatpush.msra.mxu3 %v1986_v13  ;;  %v1628_v39 = vadd.f32 %v8352_v36, %v1607_v29  ;;  %v8353_v50 = vld [vmem:[#allocation47_spill] sm:$0xff]  ;;  %v2174_v13 = vld [vmem:[#allocation3 + $0x3a8] sm:$0xff]  ;;  %v1750_v58 = vadd.f32 %v1734_v60, %v1729_v11  ;;  %v6481_v29 = vld [vmem:[#allocation6 + $0x70] sm:$0xff] }
 0x30d   : > { %4444 = vmatmul.msk.f32.vlgmr.msrb.gmra.mxu2 %vm2249_vm11, %v6417_v54  ;;  %v2148_v32 = vld [vmem:[#allocation3 + $0x2d8] sm:$0xff] }
 0x30e   : > { %2602 = vmatpush.msra.mxu2 %v1876_v40  ;;  %v6425_v34 = vpop.permute.xlu1 %1661  ;;  %2352 = vmatmul.f32.gmra.mxu3 %v6414_v18  ;;  %v1706_v40 = vsel %vm637_vm8, %v6161_v49, %v6239_v42  ;;  %v2146_v42 = vld [vmem:[#allocation3 + $0x2c8] sm:$0xff]  ;;  %v2040_v11 = vld [vmem:[#allocation6 + $0xb8] sm:$0xff]  ;;  %v2051_v12 = vld [vmem:[#allocation6 + $0x110] sm:$0xff] }
 0x30f   : > { %v1693_v22 = vsel %vm637_vm8, %v6425_v34, %v6423_v51  ;;  %v1727_v49 = vmul.f32 %v6442_v63, %v1706_v40  ;;  %v1701_v36 = vsel %vm637_vm8, %v6423_v51, %v6425_v34  ;;  %v8355_v51 = vld [vmem:[#allocation22_spill] sm:$0xff]  ;;  %v8359_v40 = vld [vmem:[#allocation16_spill] sm:$0xff] }
 0x310   : > { %2603 = vmatpush.msra.mxu2 %v2182_v41  ;;  %v1716_v30 = vmul.f32 %v6171_v1, %v1693_v22  ;;  %v1708_v1 = vsel %vm637_vm8, %v6053_v8, %v5945_v43  ;;  %v2150_v8 = vld [vmem:[#allocation3 + $0x2e8] sm:$0xff]  ;;  %v1704_v22 = vsel %vm637_vm8, %v6345_v6, %v6300_v59  ;;  %v1717_v2 = vmul.f32 %v6442_v63, %v1701_v36 }
 0x311   : > { %v1731_v43 = vmul.f32 %v6442_v63, %v1708_v1  ;;  %v1723_v59 = vmul.f32 %v6442_v63, %v1704_v22  ;;  %v2142_v6 = vld [vmem:[#allocation3 + $0x2a8] sm:$0xff] }
 0x312   : > { %2604 = vmatpush.msra.mxu2 %v2180_v16  ;;  %v1737_v48 = vadd.f32 %v6204_v47, %v1716_v30  ;;  %v6451_v47 = vld [vmem:[#allocation6 + $0x48] sm:$0xff]  ;;  %v8354_v30 = vld [vmem:[#allocation43_spill] sm:$0xff]  ;;  %v1748_v16 = vadd.f32 %v1734_v60, %v1727_v49 }
 0x313   : > { %2393 = vmatmul.f32.gmra.mxu0 %v6436_v46  ;;  %v1752_v41 = vadd.f32 %v1734_v60, %v1731_v43  ;;  %v1744_v1 = vadd.f32 %v1734_v60, %v1723_v59  ;;  %v8357_v43 = vld [vmem:[#allocation19_spill] sm:$0xff] }
 0x314   : > { %2605 = vmatpush.msra.mxu2 %v2178_v25  ;;  %2412 = vmatpush.msrb.mxu1 %v1737_v48  ;;  %v1702_v48 = vsel %vm637_vm8, %v6393_v44, %v6391_v7  ;;  %v1746_v25 = vadd.f32 %v1734_v60, %v1725_v35  ;;  %v2138_v44 = vld [vmem:[#allocation3 + $0x288] sm:$0xff] }
 0x315   : > { %2413 = vmatmul.f32.vlgmr.msrb.gmra.mxu1 %v6439_v38  ;;  %4445 = vmatmul.msk.f32.gmra.mxu2 %vm2249_vm11, %v6451_v47  ;;  %v1719_v7 = vmul.f32 %v6442_v63, %v1702_v48 }
 0x316   : > { %2606 = vmatpush.msra.mxu2 %v2176_v53  ;;  %2495 = vmatmul.f32.vlgmr.msrb.gmra.mxu3 %v8353_v50  ;;  %v6506_v50 = vld [vmem:[#allocation6 + $0x98] sm:$0xff] }
 0x317   : > { %2561 = vmatpush.msra.mxu1 %v1628_v39  ;;  %v6500_v39 = vld [vmem:[#allocation6 + $0x68] sm:$0xff]  ;;  %v1740_v34 = vadd.f32 %v1734_v60, %v1719_v7 }
 0x318   : > { %2607 = vmatpush.msra.mxu2 %v2174_v13  ;;  %v8356_v13 = vld [vmem:[#allocation21_spill] sm:$0xff] }
 0x319   : > { %2562 = vmatpush.msra.mxu1 %v2150_v8  ;;  %v8358_v8 = vld [vmem:[#allocation17_spill] sm:$0xff] }
 0x31a   : > { %2608 = vmatpush.msra.mxu2 %v2172_v3  ;;  %v8360_v3 = vld [vmem:[#allocation18_spill] sm:$0xff] }
 0x31b   : > { %2563 = vmatpush.msra.mxu1 %v2148_v32  ;;  %2536 = vmatmul.f32.vlgmr.msra.gmra.mxu0 %v6157_v45  ;;  %v1703_v45 = vsel %vm637_vm8, %v6363_v15, %v6372_v33  ;;  %v2140_v33 = vld [vmem:[#allocation3 + $0x298] sm:$0xff]  ;;  %v8362_v32 = vld [vmem:[#allocation13_spill] sm:$0xff] }
 0x31c   : > { %2609 = vmatpush.msra.mxu2 %v2170_v0  ;;  %v1721_v15 = vmul.f32 %v6442_v63, %v1703_v45  ;;  %v2035_v63 = vld [vmem:[#allocation6 + $0x90] sm:$0xff]  ;;  %v2050_v0 = vld [vmem:[#allocation6 + $0x108] sm:$0xff] }
 0x31d   : > { %2564 = vmatpush.msra.mxu1 %v2146_v42  ;;  %4446 = vmatmul.msk.f32.gmra.mxu2 %vm2249_vm11, %v6481_v29 }
 0x31e   : > { %2416 = vmatmul.f32.gmra.mxu1 %v6471_v17  ;;  %2610 = vmatpush.msra.mxu2 %v1752_v41  ;;  %v1742_v53 = vadd.f32 %v1734_v60, %v1721_v15 }
 0x31f   : > { %2498 = vmatmul.f32.gmra.mxu3 %v8354_v30  ;;  %2565 = vmatpush.msra.mxu1 %v2144_v23 }
 0x320   : > { %2611 = vmatpush.msra.mxu2 %v1750_v58 }
 0x321   : > { %2566 = vmatpush.msra.mxu1 %v2142_v6 }
 0x322   : > { %2612 = vmatpush.msra.mxu2 %v1748_v16 }
 0x323   : > { %2567 = vmatpush.msra.mxu1 %v2140_v33  ;;  %2539 = vmatmul.f32.gmra.mxu0 %v6210_v24  ;;  %v1738_v24 = vadd.f32 %v1734_v60, %v1717_v2  ;;  %v8361_v60 = vld [vmem:[#allocation14_spill] sm:$0xff]  ;;  %v6605_v33 = vld [vmem:[%s8134_s2 + $0x4] ss:$8 sm:$0x3] }
 0x324   : > { %2613 = vmatpush.msra.mxu2 %v1746_v25  ;;  %v6599_v25 = vld [vmem:[%s8133_s1 + $0x4] ss:$8 sm:$0x3] }
 0x325   : > { %2568 = vmatpush.msra.mxu1 %v2138_v44  ;;  %4447 = vmatmul.msk.f32.gmra.mxu2 %vm2249_vm11, %v6506_v50  ;;  %v6613_v44 = vperm.slane %v6605_v33, 0 }
 0x326   : > { %2419 = vmatmul.f32.gmra.mxu1 %v6500_v39  ;;  %2614 = vmatpush.msra.mxu2 %v1744_v1  ;;  %v6608_v1 = vperm.slane %v6599_v25, 0 }
 0x327   : > { %2501 = vmatmul.f32.gmra.mxu3 %v6077_v56  ;;  %2569 = vmatpush.msra.mxu1 %v8355_v51  ;;  %v2041_v56 = vld [vmem:[#allocation6 + $0xc0] sm:$0xff] }
 0x328   : > { %2615 = vmatpush.msra.mxu2 %v1742_v53 }
 0x329   : > { %2570 = vmatpush.msra.mxu1 %v8356_v13 }
 0x32a   : > { %2616 = vmatpush.msra.mxu2 %v1740_v34 }
 0x32b   : > { %2571 = vmatpush.msra.mxu1 %v8357_v43  ;;  %2542 = vmatmul.f32.gmra.mxu0 %v6257_v26  ;;  %v2046_v26 = vld [vmem:[#allocation6 + $0xe8] sm:$0xff] }
 0x32c   : > { %2617 = vmatpush.msra.mxu2 %v1738_v24 }
 0x32d   : > { %2572 = vmatpush.msra.mxu1 %v8358_v8  ;;  %4448 = vmatmul.msk.f32.gmra.mxu2 %vm2249_vm11, %v2041_v56 }
 0x32e   : > { %2422 = vmatmul.f32.gmra.mxu1 %v2035_v63 }
 0x32f   : > { %2504 = vmatmul.f32.gmra.mxu3 %v6141_v4  ;;  %2573 = vmatpush.msra.mxu1 %v8359_v40  ;;  %v2045_v4 = vld [vmem:[#allocation6 + $0xe0] sm:$0xff] }
 0x331   : > { %2574 = vmatpush.msra.mxu1 %v8360_v3 }
 0x333   : > { %2575 = vmatpush.msra.mxu1 %v8361_v60  ;;  %2545 = vmatmul.f32.gmra.mxu0 %v6288_v10  ;;  %v2056_v10 = vld [vmem:[#allocation6 + $0x138] sm:$0xff] }
 0x335   : > { %2576 = vmatpush.msra.mxu1 %v8362_v32  ;;  %4449 = vmatmul.msk.f32.gmra.mxu2 %vm2249_vm11, %v2046_v26 }
 0x336   : > { %2425 = vmatmul.f32.gmra.mxu1 %v2040_v11 }
 0x337   : > { %2507 = vmatmul.f32.gmra.mxu3 %v6207_v5  ;;  %v2055_v5 = vld [vmem:[#allocation6 + $0x130] sm:$0xff] }
 0x33b   : > { %2548 = vmatmul.f32.gmra.mxu0 %v6331_v55 }
 0x33d   : > { %4450 = vmatmul.msk.f32.gmra.mxu2 %vm2249_vm11, %v2051_v12 }
 0x33e   : > { %2428 = vmatmul.f32.gmra.mxu1 %v2045_v4  ;;  %v2291_v41 = vpop.f32.mrf.mxu2 }
 0x33f   : > { %2510 = vmatmul.f32.gmra.mxu3 %v6255_v37 }
 0x343   : > { %2551 = vmatmul.f32.gmra.mxu0 %v6368_v57 }
 0x345   : > { %4451 = vmatmul.msk.f32.gmra.mxu2 %vm2249_vm11, %v2056_v10 }
 0x346   : > { %2431 = vmatmul.f32.gmra.mxu1 %v2050_v0  ;;  %v2294_v55 = vpop.f32.mrf.mxu2 }
 0x347   : > { %2513 = vmatmul.f32.gmra.mxu3 %v6286_v31 }
 0x34b   : > { %2554 = vmatmul.f32.gmra.mxu0 %v6384_v19 }
 0x34d   : > { %2618 = vmatmul.f32.vlgmr.msra.gmra.mxu2 %v6439_v38 }
 0x34e   : > { %2434 = vmatmul.f32.gmra.mxu1 %v2055_v5  ;;  %v6538_v37 = vpop.f32.mrf.mxu2 }
 0x34f   : > { %2516 = vmatmul.f32.gmra.mxu3 %v6327_v52 }
 0x353   : > { %2557 = vmatmul.f32.gmra.mxu0 %v6414_v18 }
 0x355   : > { %2621 = vmatmul.f32.gmra.mxu2 %v6471_v17 }
 0x356   : > { %2577 = vmatmul.f32.vlgmr.msra.gmra.mxu1 %v6194_v20  ;;  %v6545_v57 = vpop.f32.mrf.mxu2 }
 0x357   : > { %4452 = vmatmul.msk.f32.vlgmr.msra.gmra.mxu3 %vm2249_vm11, %v6417_v54  ;;  %v2332_v31 = vpop.f32.mrf.mxu3 }
 0x35d   : > { %2624 = vmatmul.f32.gmra.mxu2 %v6500_v39 }
 0x35e   : > { %2580 = vmatmul.f32.gmra.mxu1 %v6247_v62  ;;  %v6552_v19 = vpop.f32.mrf.mxu2  ;;  %v2373_v62 = vpop.f32.mrf.mxu0 }
 0x35f   : > { %4453 = vmatmul.msk.f32.gmra.mxu3 %vm2249_vm11, %v6451_v47  ;;  %v2335_v52 = vpop.f32.mrf.mxu3 }
 0x365   : > { %2627 = vmatmul.f32.gmra.mxu2 %v2035_v63 }
 0x366   : > { %2583 = vmatmul.f32.gmra.mxu1 %v6283_v21  ;;  %v6562_v21 = vpop.permute.xlu1 %2241  ;;  %v2376_v47 = vpop.f32.mrf.mxu0 }
 0x367   : > { %4454 = vmatmul.msk.f32.gmra.mxu3 %vm2249_vm11, %v6481_v29  ;;  %v6550_v20 = vpop.f32.mrf.mxu3  ;;  %v6559_v54 = vpop.f32.mrf.mxu2 }
 0x36d   : > { %2630 = vmatmul.f32.gmra.mxu2 %v2040_v11 }
 0x36e   : > { %2586 = vmatmul.f32.gmra.mxu1 %v6316_v14  ;;  %v6568_v14 = vpop.permute.xlu0 %2246  ;;  %v6573_v49 = vpop.permute.xlu1 %2226 }
 0x36f   : > { %4455 = vmatmul.msk.f32.gmra.mxu3 %vm2249_vm11, %v6506_v50  ;;  %v6557_v18 = vpop.f32.mrf.mxu3  ;;  %v6571_v17 = vpop.f32.mrf.mxu2 }
 0x370   : > { %v2379_v42 = vpop.f32.mrf.mxu0 }
 0x375   : > { %2633 = vmatmul.f32.gmra.mxu2 %v2045_v4 }
 0x376   : > { %2589 = vmatmul.f32.gmra.mxu1 %v6358_v28  ;;  %v6579_v22 = vpop.permute.xlu0 %2231  ;;  %v6585_v35 = vpop.permute.xlu1 %2211 }
 0x377   : > { %4456 = vmatmul.msk.f32.gmra.mxu3 %vm2249_vm11, %v2041_v56  ;;  %v2292_v23 = vadd.f32 %v2291_v41, %v6585_v35 }
 0x378   : > { %v2382_v45 = vpop.f32.mrf.mxu0 }
 0x379   : > { %v6565_v38 = vpop.f32.mrf.mxu3  ;;  %v2333_v29 = vadd.f32 %v2332_v31, %v2292_v23 }
 0x37b   : > { %v2374_v30 = vadd.f32 %v2373_v62, %v2333_v29  ;;  %v2304_v62 = vadd.f32 %v6552_v19, %v6579_v22 }
 0x37d   : > { %2636 = vmatmul.f32.gmra.mxu2 %v2050_v0  ;;  %v2345_v29 = vadd.f32 %v6565_v38, %v2304_v62 }
 0x37e   : > { %2592 = vmatmul.f32.gmra.mxu1 %v6381_v9  ;;  %v6581_v9 = vpop.f32.mrf.mxu2  ;;  %v6594_v6 = vpop.permute.xlu0 %2216 }
 0x37f   : > { %4457 = vmatmul.msk.f32.gmra.mxu3 %vm2249_vm11, %v2046_v26  ;;  %v2295_v15 = vadd.f32 %v2294_v55, %v6594_v6 }
 0x380   : > { %v2385_v53 = vpop.f32.mrf.mxu0 }
 0x381   : > { %v6575_v28 = vpop.f32.mrf.mxu3  ;;  %v2336_v36 = vadd.f32 %v2335_v52, %v2295_v15 }
 0x383   : > { %v2377_v2 = vadd.f32 %v2376_v47, %v2336_v36 }
 0x385   : > { %2639 = vmatmul.f32.gmra.mxu2 %v2055_v5 }
 0x386   : > { %2595 = vmatmul.f32.gmra.mxu1 %v6408_v61  ;;  %v6590_v61 = vpop.permute.xlu2 %2236 }
 0x387   : > { %4458 = vmatmul.msk.f32.gmra.mxu3 %vm2249_vm11, %v2051_v12  ;;  %v2301_v12 = vadd.f32 %v6545_v57, %v6573_v49  ;;  %v2307_v38 = vadd.f32 %v6559_v54, %v6590_v61 }
 0x388   : > { %v2388_v26 = vpop.f32.mrf.mxu0 }
 0x389   : > { %v6583_v58 = vpop.f32.mrf.mxu3  ;;  %v2342_v5 = vadd.f32 %v6557_v18, %v2301_v12 }
 0x38b   : > { %v2383_v31 = vadd.f32 %v2382_v45, %v2342_v5 }
 0x38e   : > { %2598 = vmatmul.f32.gmra.mxu1 %v6436_v46  ;;  %v6623_v34 = vpop.permute.xlu2 %2221 }
 0x38f   : > { %4459 = vmatmul.msk.f32.gmra.mxu3 %vm2249_vm11, %v2056_v10  ;;  %v2298_v24 = vadd.f32 %v6538_v37, %v6623_v34 }
 0x390   : > { %v2455_v59 = vpop.f32.mrf.mxu2  ;;  %v2391_v23 = vpop.f32.mrf.mxu0 }
 0x391   : > { %v6592_v16 = vpop.f32.mrf.mxu3  ;;  %v2339_v56 = vadd.f32 %v6550_v20, %v2298_v24 }
 0x392   : > { %v2414_v48 = vpop.f32.mrf.mxu1 }
 0x393   : > { %v2415_v46 = vadd.f32 %v2414_v48, %v2374_v30  ;;  %v2380_v60 = vadd.f32 %v2379_v42, %v2339_v56 }
 0x395   : > { %v2456_v39 = vadd.f32 %v2455_v59, %v2415_v46  ;;  %v2386_v59 = vadd.f32 %v2385_v53, %v2345_v29  ;;  %v2348_v53 = vadd.f32 %v6575_v28, %v2307_v38  ;;  %v2310_v28 = vadd.f32 %v6571_v17, %v6562_v21 }
 0x397   : > { %v6610_v7 = vmax.f32 %v2456_v39, 0.0  ;;  %v2389_v24 = vadd.f32 %v2388_v26, %v2348_v53 }
 0x398   : > { %v2458_v63 = vpop.f32.mrf.mxu2 }
 0x399   : > { %v3235_v50 = vmul.f32 %v6608_v1, %v6610_v7  ;;  %v6617_v51 = vpop.f32.mrf.mxu3  ;;  %3104 = vrot.lane.b32.xlu0 %v6610_v7, %s4629_s25  ;;  %3304 = vrot.lane.b32.xlu2 %v6610_v7, %s4630_s26 }
 0x39a   : > { %2856 = vrot.lane.b32.xlu1 %v6610_v7, %s4627_s8 }
 0x39b   : > { %v2417_v13 = vpop.f32.mrf.mxu1  ;;  %v3256_v8 = vadd.f32 %v6613_v44, %v3235_v50  ;;  %v2394_v50 = vpop.f32.mrf.mxu0 }
 0x39c   : > { %v2418_v43 = vadd.f32 %v2417_v13, %v2377_v2 }
 0x39d   : > { %3272 = vst [vmem:[#allocation3 + $0x200] sm:$0xff] %v3256_v8 }
 0x39e   : > { %v2459_v40 = vadd.f32 %v2458_v63, %v2418_v43 }
 0x3a0   : > { %v6631_v3 = vmax.f32 %v2459_v40, 0.0  ;;  %v2461_v41 = vpop.f32.mrf.mxu2 }
 0x3a1   : > { %3552 = vrot.lane.b32.xlu2 %v6610_v7, %s4632_s28 }
 0x3a2   : > { %v3237_v11 = vmul.f32 %v6608_v1, %v6631_v3  ;;  %v6635_v32 = vpop.f32.mrf.mxu3  ;;  %3106 = vrot.lane.b32.xlu0 %v6631_v3, %s4629_s25  ;;  %2732 = vrot.lane.b32.xlu1 %v6610_v7, %s4626_s22 }
 0x3a3   : > { %v2420_v4 = vpop.f32.mrf.mxu1 }
 0x3a4   : > { %v2421_v0 = vadd.f32 %v2420_v4, %v2380_v60  ;;  %v3258_v10 = vadd.f32 %v6613_v44, %v3237_v11  ;;  %v2351_v60 = vadd.f32 %v6583_v58, %v2310_v28  ;;  %v2537_v4 = vpop.f32.mrf.mxu0  ;;  %v2313_v58 = vadd.f32 %v6581_v9, %v6568_v14 }
 0x3a6   : > { %v2462_v55 = vadd.f32 %v2461_v41, %v2421_v0  ;;  %3274 = vst [vmem:[#allocation3 + $0x210] sm:$0xff] %v3258_v10  ;;  %v2392_v12 = vadd.f32 %v2391_v23, %v2351_v60 }
 0x3a8   : > { %v6647_v37 = vmax.f32 %v2462_v55, 0.0  ;;  %v2464_v47 = vpop.f32.mrf.mxu2 }
 0x3a9   : > { %2858 = vrot.lane.b32.xlu2 %v6631_v3, %s4627_s8 }
 0x3aa   : > { %v3239_v52 = vmul.f32 %v6608_v1, %v6647_v37  ;;  %v6651_v20 = vpop.f32.mrf.mxu3  ;;  %2860 = vrot.lane.b32.xlu0 %v6647_v37, %s4627_s8  ;;  %3554 = vrot.lane.b32.xlu1 %v6631_v3, %s4632_s28 }
 0x3ab   : > { %v2423_v57 = vpop.f32.mrf.mxu1 }
 0x3ac   : > { %v2424_v18 = vadd.f32 %v2423_v57, %v2383_v31  ;;  %v3260_v42 = vadd.f32 %v6613_v44, %v3239_v52  ;;  %v2354_v31 = vadd.f32 %v6592_v16, %v2313_v58  ;;  %v2540_v9 = vpop.f32.mrf.mxu0 }
 0x3ae   : > { %v2465_v45 = vadd.f32 %v2464_v47, %v2424_v18  ;;  %3276 = vst [vmem:[#allocation3 + $0x220] sm:$0xff] %v3260_v42  ;;  %v2395_v62 = vadd.f32 %v2394_v50, %v2354_v31 }
 0x3b0   : > { %v6663_v30 = vmax.f32 %v2465_v45, 0.0  ;;  %v2467_v36 = vpop.f32.mrf.mxu2  ;;  %v2497_v45 = vadd.f32 %v6617_v51, %v6585_v35 }
 0x3b1   : > { %2734 = vrot.lane.b32.xlu2 %v6631_v3, %s4626_s22 }
 0x3b2   : > { %v3241_v48 = vmul.f32 %v6608_v1, %v6663_v30  ;;  %v6667_v15 = vpop.f32.mrf.mxu3  ;;  %2736 = vrot.lane.b32.xlu0 %v6647_v37, %s4626_s22  ;;  %3556 = vrot.lane.b32.xlu1 %v6647_v37, %s4632_s28 }
 0x3b3   : > { %v2426_v19 = vpop.f32.mrf.mxu1  ;;  %v2506_v58 = vadd.f32 %v6667_v15, %v6573_v49 }
 0x3b4   : > { %v2427_v46 = vadd.f32 %v2426_v19, %v2386_v59  ;;  %v3262_v39 = vadd.f32 %v6613_v44, %v3241_v48  ;;  %v2538_v19 = vadd.f32 %v2537_v4, %v2497_v45  ;;  %v2543_v53 = vpop.f32.mrf.mxu0 }
 0x3b6   : > { %v2468_v2 = vadd.f32 %v2467_v36, %v2427_v46  ;;  %3278 = vst [vmem:[#allocation3 + $0x230] sm:$0xff] %v3262_v39 }
 0x3b8   : > { %v6679_v13 = vmax.f32 %v2468_v2, 0.0  ;;  %v2470_v56 = vpop.f32.mrf.mxu2 }
 0x3b9   : > { %3306 = vrot.lane.b32.xlu2 %v6631_v3, %s4630_s26 }
 0x3ba   : > { %v3243_v43 = vmul.f32 %v6608_v1, %v6679_v13  ;;  %v6683_v63 = vpop.f32.mrf.mxu3  ;;  %3108 = vrot.lane.b32.xlu0 %v6647_v37, %s4629_s25  ;;  %3432 = vrot.lane.b32.xlu1 %v6647_v37, %s4631_s27 }
 0x3bb   : > { %v2429_v54 = vpop.f32.mrf.mxu1 }
 0x3bc   : > { %v2430_v8 = vadd.f32 %v2429_v54, %v2389_v24  ;;  %v3264_v40 = vadd.f32 %v6613_v44, %v3243_v43  ;;  %v6746_v54 = vperm.slane %v6599_v25, 1 }
 0x3be   : > { %v2471_v11 = vadd.f32 %v2470_v56, %v2430_v8  ;;  %3280 = vst [vmem:[#allocation3 + $0x240] sm:$0xff] %v3264_v40  ;;  %v6753_v8 = vperm.slane %v6605_v33, 1  ;;  %v2503_v56 = vadd.f32 %v6651_v20, %v6623_v34  ;;  %v2546_v40 = vpop.f32.mrf.mxu0 }
 0x3c0   : > { %v6695_v26 = vmax.f32 %v2471_v11, 0.0  ;;  %v2473_v5 = vpop.f32.mrf.mxu2  ;;  %v2544_v4 = vadd.f32 %v2543_v53, %v2503_v56 }
 0x3c1   : > { %3308 = vrot.lane.b32.xlu2 %v6647_v37, %s4630_s26 }
 0x3c2   : > { %v3245_v0 = vmul.f32 %v6608_v1, %v6695_v26  ;;  %v6699_v41 = vpop.f32.mrf.mxu3  ;;  %3310 = vrot.lane.b32.xlu0 %v6663_v30, %s4630_s26  ;;  %2862 = vrot.lane.b32.xlu1 %v6663_v30, %s4627_s8 }
 0x3c3   : > { %v2432_v17 = vpop.f32.mrf.mxu1  ;;  %v2512_v53 = vadd.f32 %v6699_v41, %v6590_v61 }
 0x3c4   : > { %v2433_v10 = vadd.f32 %v2432_v17, %v2392_v12  ;;  %v3266_v55 = vadd.f32 %v6613_v44, %v3245_v0 }
 0x3c6   : > { %v2474_v52 = vadd.f32 %v2473_v5, %v2433_v10  ;;  %3282 = vst [vmem:[#allocation3 + $0x250] sm:$0xff] %v3266_v55  ;;  %v2549_v55 = vpop.f32.mrf.mxu0 }
 0x3c8   : > { %v6711_v57 = vmax.f32 %v2474_v52, 0.0  ;;  %v2476_v23 = vpop.f32.mrf.mxu2  ;;  %v2547_v52 = vadd.f32 %v2546_v40, %v2506_v58 }
 0x3c9   : > { %2984 = vrot.lane.b32.xlu2 %v6647_v37, %s4628_s24 }
 0x3ca   : > { %v3247_v18 = vmul.f32 %v6608_v1, %v6711_v57  ;;  %v6715_v47 = vpop.f32.mrf.mxu3  ;;  %3110 = vrot.lane.b32.xlu0 %v6663_v30, %s4629_s25  ;;  %2738 = vrot.lane.b32.xlu1 %v6663_v30, %s4626_s22 }
 0x3cb   : > { %v2435_v16 = vpop.f32.mrf.mxu1  ;;  %v2515_v40 = vadd.f32 %v6715_v47, %v6562_v21 }
 0x3cc   : > { %v2436_v42 = vadd.f32 %v2435_v16, %v2395_v62  ;;  %v3268_v29 = vadd.f32 %v6613_v44, %v3247_v18 }
 0x3ce   : > { %v2477_v59 = vadd.f32 %v2476_v23, %v2436_v42  ;;  %3284 = vst [vmem:[#allocation3 + $0x260] sm:$0xff] %v3268_v29  ;;  %v2509_v42 = vadd.f32 %v6683_v63, %v6579_v22 }
 0x3d0   : > { %v6726_v48 = vmax.f32 %v2477_v59, 0.0  ;;  %v2619_v36 = vpop.f32.mrf.mxu2  ;;  %v2550_v59 = vadd.f32 %v2549_v55, %v2509_v42 }
 0x3d1   : > { %2986 = vrot.lane.b32.xlu2 %v6663_v30, %s4628_s24 }
 0x3d2   : > { %v3249_v38 = vmul.f32 %v6608_v1, %v6726_v48  ;;  %v6730_v46 = vpop.f32.mrf.mxu3  ;;  %3684 = vrot.lane.b32.xlu0 %v6679_v13, %s4625_s21  ;;  %3558 = vrot.lane.b32.xlu1 %v6663_v30, %s4632_s28  ;;  %v2500_v1 = vadd.f32 %v6635_v32, %v6594_v6 }
 0x3d3   : > { %v2578_v35 = vpop.f32.mrf.mxu1  ;;  %v2518_v58 = vadd.f32 %v6730_v46, %v6568_v14 }
 0x3d4   : > { %v2579_v51 = vadd.f32 %v2578_v35, %v2538_v19  ;;  %v3270_v39 = vadd.f32 %v6613_v44, %v3249_v38  ;;  %v2541_v50 = vadd.f32 %v2540_v9, %v2500_v1  ;;  %v2552_v38 = vpop.f32.mrf.mxu0 }
 0x3d6   : > { %3286 = vst [vmem:[#allocation3 + $0x270] sm:$0xff] %v3270_v39  ;;  %v2620_v2 = vadd.f32 %v2619_v36, %v2579_v51 }
 0x3d8   : > { %v2622_v6 = vpop.f32.mrf.mxu2 }
 0x3d9   : > { %2864 = vrot.lane.b32.xlu2 %v6679_v13, %s4627_s8 }
 0x3da   : > { %v2660_v24 = vpop.f32.mrf.mxu3  ;;  %2866 = vrot.lane.b32.xlu0 %v6695_v26, %s4627_s8  ;;  %3434 = vrot.lane.b32.xlu1 %v6663_v30, %s4631_s27 }
 0x3db   : > { %v2661_v43 = vadd.f32 %v2660_v24, %v2620_v2  ;;  %v2581_v44 = vpop.f32.mrf.mxu1  ;;  %v2553_v24 = vadd.f32 %v2552_v38, %v2512_v53 }
 0x3dc   : > { %v2582_v28 = vadd.f32 %v2581_v44, %v2541_v50 }
 0x3dd   : > { %v6750_v32 = vmax.f32 %v2661_v43, 0.0 }
 0x3de   : > { %v2623_v25 = vadd.f32 %v2622_v6, %v2582_v28  ;;  %v2555_v6 = vpop.f32.mrf.mxu0 }
 0x3df   : > { %8363 = vst [vmem:[#allocation51_spill] sm:$0xff] %v6750_v32  ;;  %v3236_v60 = vmul.f32 %v6746_v54, %v6750_v32 }
 0x3e0   : > { %v2625_v0 = vpop.f32.mrf.mxu2 }
 0x3e1   : > { %v3257_v11 = vadd.f32 %v6753_v8, %v3236_v60  ;;  %2740 = vrot.lane.b32.xlu2 %v6679_v13, %s4626_s22 }
 0x3e2   : > { %v2663_v12 = vpop.f32.mrf.mxu3  ;;  %3562 = vrot.lane.b32.xlu0 %v6695_v26, %s4632_s28  ;;  %3312 = vrot.lane.b32.xlu1 %v6679_v13, %s4630_s26 }
 0x3e3   : > { %v2664_v33 = vadd.f32 %v2663_v12, %v2623_v25  ;;  %v2584_v34 = vpop.f32.mrf.mxu1  ;;  %3273 = vst [vmem:[#allocation3 + $0x208] sm:$0xff] %v3257_v11 }
 0x3e4   : > { %v2585_v20 = vadd.f32 %v2584_v34, %v2544_v4  ;;  %v2556_v4 = vadd.f32 %v2555_v6, %v2515_v40 }
 0x3e5   : > { %v6766_v17 = vmax.f32 %v2664_v33, 0.0 }
 0x3e6   : > { %v2626_v5 = vadd.f32 %v2625_v0, %v2585_v20 }
 0x3e7   : > { %v3238_v10 = vmul.f32 %v6746_v54, %v6766_v17 }
 0x3e8   : > { %v2628_v9 = vpop.f32.mrf.mxu2 }
 0x3e9   : > { %v3259_v31 = vadd.f32 %v6753_v8, %v3238_v10  ;;  %3560 = vrot.lane.b32.xlu2 %v6679_v13, %s4632_s28  ;;  %v2558_v10 = vpop.f32.mrf.mxu0 }
 0x3ea   : > { %v2666_v62 = vpop.f32.mrf.mxu3  ;;  %3686 = vrot.lane.b32.xlu0 %v6695_v26, %s4625_s21  ;;  %3112 = vrot.lane.b32.xlu1 %v6679_v13, %s4629_s25 }
 0x3eb   : > { %v2667_v18 = vadd.f32 %v2666_v62, %v2626_v5  ;;  %v2587_v49 = vpop.f32.mrf.mxu1  ;;  %3275 = vst [vmem:[#allocation3 + $0x218] sm:$0xff] %v3259_v31 }
 0x3ec   : > { %v2588_v15 = vadd.f32 %v2587_v49, %v2547_v52  ;;  %v2559_v52 = vadd.f32 %v2558_v10, %v2518_v58 }
 0x3ed   : > { %v6779_v16 = vmax.f32 %v2667_v18, 0.0 }
 0x3ee   : > { %v2629_v29 = vadd.f32 %v2628_v9, %v2588_v15 }
 0x3ef   : > { %v3240_v23 = vmul.f32 %v6746_v54, %v6779_v16 }
 0x3f0   : > { %v2631_v36 = vpop.f32.mrf.mxu2 }
 0x3f1   : > { %v3261_v45 = vadd.f32 %v6753_v8, %v3240_v23  ;;  %2988 = vrot.lane.b32.xlu2 %v6679_v13, %s4628_s24 }
 0x3f2   : > { %v2669_v19 = vpop.f32.mrf.mxu3  ;;  %3316 = vrot.lane.b32.xlu0 %v6711_v57, %s4630_s26  ;;  %3436 = vrot.lane.b32.xlu1 %v6679_v13, %s4631_s27 }
 0x3f3   : > { %v2670_v35 = vadd.f32 %v2669_v19, %v2629_v29  ;;  %v2590_v22 = vpop.f32.mrf.mxu1  ;;  %3277 = vst [vmem:[#allocation3 + $0x228] sm:$0xff] %v3261_v45  ;;  %v6792_v51 = vpop.permute.xlu2 %3304 }
 0x3f4   : > { %v2591_v63 = vadd.f32 %v2590_v22, %v2550_v59 }
 0x3f5   : > { %v6794_v39 = vmax.f32 %v2670_v35, 0.0 }
 0x3f6   : > { %v2632_v2 = vadd.f32 %v2631_v36, %v2591_v63 }
 0x3f7   : > { %v3242_v1 = vmul.f32 %v6746_v54, %v6794_v39 }
 0x3f8   : > { %v2634_v28 = vpop.f32.mrf.mxu2 }
 0x3f9   : > { %v3263_v50 = vadd.f32 %v6753_v8, %v3242_v1  ;;  %3314 = vrot.lane.b32.xlu2 %v6695_v26, %s4630_s26 }
 0x3fa   : > { %v2672_v43 = vpop.f32.mrf.mxu3  ;;  %3116 = vrot.lane.b32.xlu0 %v6711_v57, %s4629_s25  ;;  %2742 = vrot.lane.b32.xlu1 %v6695_v26, %s4626_s22 }
 0x3fb   : > { %v2673_v13 = vadd.f32 %v2672_v43, %v2632_v2  ;;  %v2593_v44 = vpop.f32.mrf.mxu1  ;;  %3279 = vst [vmem:[#allocation3 + $0x238] sm:$0xff] %v3263_v50  ;;  %v6807_v41 = vpop.permute.xlu2 %3552 }
 0x3fc   : > { %v2594_v61 = vadd.f32 %v2593_v44, %v2553_v24 }
 0x3fd   : > { %v6809_v56 = vmax.f32 %v2673_v13, 0.0 }
 0x3fe   : > { %v2635_v25 = vadd.f32 %v2634_v28, %v2594_v61 }
 0x3ff   : > { %v3244_v60 = vmul.f32 %v6746_v54, %v6809_v56 }
 0x400   : > { %v2637_v20 = vpop.f32.mrf.mxu2 }
 0x401   : > { %v3265_v11 = vadd.f32 %v6753_v8, %v3244_v60  ;;  %3114 = vrot.lane.b32.xlu2 %v6695_v26, %s4629_s25 }
 0x402   : > { %v2675_v12 = vpop.f32.mrf.mxu3  ;;  %3688 = vrot.lane.b32.xlu0 %v6711_v57, %s4625_s21  ;;  %3438 = vrot.lane.b32.xlu1 %v6695_v26, %s4631_s27 }
 0x403   : > { %v2676_v33 = vadd.f32 %v2675_v12, %v2635_v25  ;;  %v2596_v34 = vpop.f32.mrf.mxu1  ;;  %3281 = vst [vmem:[#allocation3 + $0x248] sm:$0xff] %v3265_v11  ;;  %v6822_v47 = vpop.permute.xlu2 %2858 }
 0x404   : > { %v2597_v21 = vadd.f32 %v2596_v34, %v2556_v4 }
 0x405   : > { %v6824_v0 = vmax.f32 %v2676_v33, 0.0 }
 0x406   : > { %v2638_v55 = vadd.f32 %v2637_v20, %v2597_v21 }
 0x407   : > { %v3246_v5 = vmul.f32 %v6746_v54, %v6824_v0 }
 0x408   : > { %v2640_v23 = vpop.f32.mrf.mxu2 }
 0x409   : > { %v3267_v31 = vadd.f32 %v6753_v8, %v3246_v5  ;;  %2990 = vrot.lane.b32.xlu2 %v6695_v26, %s4628_s24 }
 0x40a   : > { %v2678_v62 = vpop.f32.mrf.mxu3  ;;  %2746 = vrot.lane.b32.xlu0 %v6726_v48, %s4626_s22  ;;  %2868 = vrot.lane.b32.xlu1 %v6711_v57, %s4627_s8 }
 0x40b   : > { %v2679_v18 = vadd.f32 %v2678_v62, %v2638_v55  ;;  %v2599_v14 = vpop.f32.mrf.mxu1  ;;  %3283 = vst [vmem:[#allocation3 + $0x258] sm:$0xff] %v3267_v31  ;;  %v6837_v49 = vpop.permute.xlu0 %3104 }
 0x40c   : > { %v2600_v46 = vadd.f32 %v2599_v14, %v2559_v52  ;;  %v6839_v15 = vpop.permute.xlu2 %2734  ;;  %v6843_v42 = vpop.permute.xlu1 %2856 }
 0x40d   : > { %v6841_v9 = vmax.f32 %v2679_v18, 0.0 }
 0x40e   : > { %v2641_v26 = vadd.f32 %v2640_v23, %v2600_v46 }
 0x40f   : > { %v3248_v29 = vmul.f32 %v6746_v54, %v6841_v9 }
 0x411   : > { %v3269_v45 = vadd.f32 %v6753_v8, %v3248_v29  ;;  %2744 = vrot.lane.b32.xlu2 %v6711_v57, %s4626_s22 }
 0x412   : > { %v2681_v59 = vpop.f32.mrf.mxu3  ;;  %3318 = vrot.lane.b32.xlu0 %v6726_v48, %s4630_s26  ;;  %3564 = vrot.lane.b32.xlu1 %v6711_v57, %s4632_s28 }
 0x413   : > { %v2682_v19 = vadd.f32 %v2681_v59, %v2641_v26  ;;  %3285 = vst [vmem:[#allocation3 + $0x268] sm:$0xff] %v3269_v45 }
 0x414   : > { %v6854_v38 = vpop.permute.xlu0 %3106  ;;  %v6856_v35 = vpop.permute.xlu2 %3306 }
 0x415   : > { %v6858_v22 = vmax.f32 %v2682_v19, 0.0  ;;  %v6860_v63 = vpop.permute.xlu1 %2732 }
 0x417   : > { %v3250_v36 = vmul.f32 %v6746_v54, %v6858_v22 }
 0x419   : > { %v3271_v53 = vadd.f32 %v6753_v8, %v3250_v36  ;;  %2992 = vrot.lane.b32.xlu2 %v6711_v57, %s4628_s24 }
 0x41a   : > { %3442 = vrot.lane.b32.xlu0 %v6726_v48, %s4631_s27  ;;  %3440 = vrot.lane.b32.xlu1 %v6711_v57, %s4631_s27 }
 0x41b   : > { %3287 = vst [vmem:[#allocation3 + $0x278] sm:$0xff] %v3271_v53 }
 0x41c   : > { %v6871_v1 = vpop.permute.xlu0 %2860  ;;  %v6873_v2 = vpop.permute.xlu2 %3308 }
 0x41d   : > { %v6875_v50 = vpop.permute.xlu1 %3554 }
 0x421   : > { %2870 = vrot.lane.b32.xlu2 %v6726_v48, %s4627_s8 }
 0x422   : > { %3690 = vrot.lane.b32.xlu0 %v6726_v48, %s4625_s21  ;;  %3118 = vrot.lane.b32.xlu1 %v6726_v48, %s4629_s25 }
 0x424   : > { %v6883_v54 = vpop.permute.xlu0 %2736  ;;  %v6885_v8 = vpop.permute.xlu2 %2984 }
 0x425   : > { %v6887_v57 = vpop.permute.xlu1 %3556 }
 0x429   : > { %3566 = vrot.lane.b32.xlu2 %v6726_v48, %s4632_s28 }
 0x42a   : > { %3320 = vrot.lane.b32.xlu0 %v6750_v32, %s4630_s26  ;;  %2994 = vrot.lane.b32.xlu1 %v6726_v48, %s4628_s24 }
 0x42c   : > { %v6895_v24 = vpop.permute.xlu0 %3108  ;;  %v6897_v43 = vpop.permute.xlu2 %2986 }
 0x42d   : > { %v6899_v13 = vpop.permute.xlu1 %3432 }
 0x431   : > { %2872 = vrot.lane.b32.xlu2 %v6750_v32, %s4627_s8 }
 0x432   : > { %3568 = vrot.lane.b32.xlu0 %v6750_v32, %s4632_s28  ;;  %3120 = vrot.lane.b32.xlu1 %v6750_v32, %s4629_s25 }
 0x434   : > { %v6907_v44 = vpop.permute.xlu0 %3310  ;;  %v6909_v61 = vpop.permute.xlu2 %2864 }
 0x435   : > { %8364 = vst [vmem:[#allocation44_spill] sm:$0xff] %v6909_v61  ;;  %v6911_v48 = vpop.permute.xlu1 %2862 }
 0x439   : > { %2748 = vrot.lane.b32.xlu2 %v6750_v32, %s4626_s22 }
 0x43a   : > { %2874 = vrot.lane.b32.xlu0 %v6766_v17, %s4627_s8  ;;  %3122 = vrot.lane.b32.xlu1 %v6766_v17, %s4629_s25 }
 0x43c   : > { %v6919_v28 = vpop.permute.xlu0 %3110  ;;  %v6921_v6 = vpop.permute.xlu2 %2740 }
 0x43d   : > { %8365 = vst [vmem:[#allocation49_spill] sm:$0xff] %v6921_v6  ;;  %v6923_v40 = vpop.permute.xlu1 %2738 }
 0x441   : > { %3570 = vrot.lane.b32.xlu2 %v6766_v17, %s4632_s28 }
 0x442   : > { %2750 = vrot.lane.b32.xlu0 %v6766_v17, %s4626_s22  ;;  %2876 = vrot.lane.b32.xlu1 %v6779_v16, %s4627_s8 }
 0x444   : > { %v6931_v60 = vpop.permute.xlu0 %3684  ;;  %v6933_v25 = vpop.permute.xlu2 %3560 }
 0x445   : > { %8366 = vst [vmem:[#allocation54_spill] sm:$0xff] %v6931_v60  ;;  %v6935_v11 = vpop.permute.xlu1 %3558 }
 0x446   : > { %8367 = vst [vmem:[#allocation32_spill] sm:$0xff] %v6933_v25 }
 0x449   : > { %3572 = vrot.lane.b32.xlu2 %v6779_v16, %s4632_s28 }
 0x44a   : > { %3322 = vrot.lane.b32.xlu0 %v6766_v17, %s4630_s26  ;;  %2752 = vrot.lane.b32.xlu1 %v6779_v16, %s4626_s22 }
 0x44c   : > { %v6943_v4 = vpop.permute.xlu0 %2866  ;;  %v6945_v12 = vpop.permute.xlu2 %2988 }
 0x44d   : > { %8368 = vst [vmem:[#allocation45_spill] sm:$0xff] %v6943_v4  ;;  %v6947_v33 = vpop.permute.xlu1 %3434 }
 0x44e   : > { %8369 = vst [vmem:[#allocation50_spill] sm:$0xff] %v6945_v12 }
 0x451   : > { %3448 = vrot.lane.b32.xlu2 %v6779_v16, %s4631_s27 }
 0x452   : > { %3324 = vrot.lane.b32.xlu0 %v6779_v16, %s4630_s26  ;;  %3124 = vrot.lane.b32.xlu1 %v6779_v16, %s4629_s25 }
 0x454   : > { %v6955_v34 = vpop.permute.xlu0 %3562  ;;  %v6957_v21 = vpop.permute.xlu2 %3314 }
 0x455   : > { %8370 = vst [vmem:[#allocation34_spill] sm:$0xff] %v6955_v34  ;;  %v6959_v20 = vpop.permute.xlu1 %3312 }
 0x456   : > { %8371 = vst [vmem:[#allocation36_spill] sm:$0xff] %v6957_v21 }
 0x459   : > { %2878 = vrot.lane.b32.xlu2 %v6794_v39, %s4627_s8 }
 0x45a   : > { %3000 = vrot.lane.b32.xlu0 %v6779_v16, %s4628_s24  ;;  %3326 = vrot.lane.b32.xlu1 %v6794_v39, %s4630_s26 }
 0x45c   : > { %v6967_v58 = vpop.permute.xlu0 %3686  ;;  %v6969_v10 = vpop.permute.xlu2 %3114 }
 0x45d   : > { %8372 = vst [vmem:[#allocation24_spill] sm:$0xff] %v6967_v58  ;;  %v6971_v5 = vpop.permute.xlu1 %3112 }
 0x45e   : > { %8373 = vst [vmem:[#allocation53_spill] sm:$0xff] %v6969_v10 }
 0x45f   : > { %8374 = vst [vmem:[#allocation46_spill] sm:$0xff] %v6971_v5 }
 0x461   : > { %2754 = vrot.lane.b32.xlu2 %v6794_v39, %s4626_s22 }
 0x462   : > { %3002 = vrot.lane.b32.xlu0 %v6794_v39, %s4628_s24  ;;  %3126 = vrot.lane.b32.xlu1 %v6794_v39, %s4629_s25 }
 0x464   : > { %v6979_v55 = vpop.permute.xlu0 %3316  ;;  %v6981_v31 = vpop.permute.xlu2 %2990 }
 0x465   : > { %8375 = vst [vmem:[#allocation23_spill] sm:$0xff] %v6979_v55  ;;  %v6983_v52 = vpop.permute.xlu1 %3436 }
 0x466   : > { %8376 = vst [vmem:[#allocation20_spill] sm:$0xff] %v6981_v31 }
 0x467   : > { %8377 = vst [vmem:[#allocation60_spill] sm:$0xff] %v6983_v52 }
 0x469   : > { %3574 = vrot.lane.b32.xlu2 %v6794_v39, %s4632_s28 }
 0x46a   : > { %2880 = vrot.lane.b32.xlu0 %v6809_v56, %s4627_s8  ;;  %3700 = vrot.lane.b32.xlu1 %v6809_v56, %s4625_s21 }
 0x46c   : > { %v6991_v62 = vpop.permute.xlu0 %3116  ;;  %v6993_v18 = vpop.permute.xlu2 %2744 }
 0x46d   : > { %8378 = vst [vmem:[#allocation57_spill] sm:$0xff] %v6991_v62  ;;  %v6995_v14 = vpop.permute.xlu1 %2742 }
 0x46e   : > { %8379 = vst [vmem:[#allocation39_spill] sm:$0xff] %v6993_v18 }
 0x46f   : > { %8380 = vst [vmem:[#allocation59_spill] sm:$0xff] %v6995_v14 }
 0x471   : > { %3450 = vrot.lane.b32.xlu2 %v6794_v39, %s4631_s27 }
 0x472   : > { %2756 = vrot.lane.b32.xlu0 %v6809_v56, %s4626_s22  ;;  %2882 = vrot.lane.b32.xlu1 %v6824_v0, %s4627_s8 }
 0x474   : > { %v7003_v46 = vpop.permute.xlu0 %3688  ;;  %v7005_v23 = vpop.permute.xlu2 %2992 }
 0x475   : > { %8381 = vst [vmem:[#allocation56_spill] sm:$0xff] %v7003_v46  ;;  %v7007_v29 = vpop.permute.xlu1 %3438 }
 0x476   : > { %8382 = vst [vmem:[#allocation15_spill] sm:$0xff] %v7005_v23 }
 0x477   : > { %8383 = vst [vmem:[#allocation48_spill] sm:$0xff] %v7007_v29 }
 0x479   : > { %3328 = vrot.lane.b32.xlu2 %v6809_v56, %s4630_s26 }
 0x47a   : > { %3576 = vrot.lane.b32.xlu0 %v6809_v56, %s4632_s28  ;;  %3578 = vrot.lane.b32.xlu1 %v6824_v0, %s4632_s28 }
 0x47c   : > { %v7015_v26 = vpop.permute.xlu0 %2746  ;;  %v7017_v45 = vpop.permute.xlu2 %2870 }
 0x47d   : > { %8384 = vst [vmem:[#allocation55_spill] sm:$0xff] %v7015_v26  ;;  %v7019_v59 = vpop.permute.xlu1 %2868  ;;  %v4460_v26 = vld [vmem:[%s8133_s1 + $0x1] ss:$8 sm:$0x3] }
 0x47e   : > { %8385 = vst [vmem:[#allocation41_spill] sm:$0xff] %v7017_v45  ;;  %v4461_v45 = vld [vmem:[%s8134_s2 + $0x1] ss:$8 sm:$0x3]  ;;  %v7043_v23 = vperm.slane %v4460_v26, 0 }
 0x47f   : > { %8386 = vst [vmem:[#allocation63_spill] sm:$0xff] %v7019_v59  ;;  %v7051_v18 = vperm.slane %v4461_v45, 0  ;;  %v7053_v46 = vperm.slane %v4461_v45, 1  ;;  %v2780_v45 = vld [vmem:[%s8133_s1] ss:$8 sm:$0x3] }
 0x480   : > { %v2781_v59 = vld [vmem:[%s8134_s2] ss:$8 sm:$0x3] }
 0x481   : > { %3128 = vrot.lane.b32.xlu2 %v6809_v56, %s4629_s25 }
 0x482   : > { %3004 = vrot.lane.b32.xlu0 %v6809_v56, %s4628_s24  ;;  %3702 = vrot.lane.b32.xlu1 %v6824_v0, %s4625_s21 }
 0x484   : > { %v7027_v19 = vpop.permute.xlu0 %3318  ;;  %v7029_v36 = vpop.permute.xlu2 %3566 }
 0x485   : > { %8387 = vst [vmem:[#allocation61_spill] sm:$0xff] %v7027_v19  ;;  %v7031_v53 = vpop.permute.xlu1 %3564  ;;  %v7045_v19 = vperm.slane %v4460_v26, 1 }
 0x486   : > { %8388 = vst [vmem:[#allocation58_spill] sm:$0xff] %v7029_v36 }
 0x487   : > { %8389 = vst [vmem:[#allocation62_spill] sm:$0xff] %v7031_v53 }
 0x489   : > { %3452 = vrot.lane.b32.xlu2 %v6809_v56, %s4631_s27 }
 0x48a   : > { %3330 = vrot.lane.b32.xlu0 %v6824_v0, %s4630_s26  ;;  %3332 = vrot.lane.b32.xlu1 %v6841_v9, %s4630_s26 }
 0x48c   : > { %v7049_v36 = vpop.permute.xlu0 %3442  ;;  %v2873_v31 = vpop.permute.xlu2 %2872 }
 0x48d   : > { %8390 = vst [vmem:[#allocation30_spill] sm:$0xff] %v7049_v36  ;;  %v2888_v62 = vsel %vm471_vm0, %v6843_v42, %v2873_v31  ;;  %v2896_v56 = vsel %vm471_vm0, %v2873_v31, %v6843_v42  ;;  %v7061_v26 = vpop.permute.xlu1 %3440  ;;  %v7077_v42 = vperm.slane %v2780_v45, 0  ;;  %v7079_v31 = vperm.slane %v2780_v45, 1 }
 0x48e   : > { %8391 = vst [vmem:[#allocation52_spill] sm:$0xff] %v7061_v26  ;;  %v2911_v53 = vmul.f32 %v7043_v23, %v2896_v56  ;;  %v2912_v10 = vmul.f32 %v7045_v19, %v2888_v62  ;;  %v7085_v62 = vperm.slane %v2781_v59, 0 }
 0x490   : > { %v2932_v36 = vadd.f32 %v7051_v18, %v2911_v53  ;;  %v2933_v55 = vadd.f32 %v7053_v46, %v2912_v10  ;;  %v7087_v53 = vperm.slane %v2781_v59, 1  ;;  %v4468_v59 = vld [vmem:[%s8133_s1 + $0x5] ss:$8 sm:$0x3] }
 0x491   : > { %2758 = vrot.lane.b32.xlu2 %v6824_v0, %s4626_s22 }
 0x492   : > { %2948 = vst [vmem:[#allocation3 + $0x80] sm:$0xff] %v2932_v36  ;;  %3130 = vrot.lane.b32.xlu0 %v6824_v0, %s4629_s25  ;;  %3132 = vrot.lane.b32.xlu1 %v6841_v9, %s4629_s25 }
 0x493   : > { %2949 = vst [vmem:[#allocation3 + $0x88] sm:$0xff] %v2933_v55 }
 0x494   : > { %v7083_v10 = vpop.permute.xlu0 %3690  ;;  %v2749_v36 = vpop.permute.xlu2 %2748 }
 0x495   : > { %8392 = vst [vmem:[#allocation28_spill] sm:$0xff] %v7083_v10  ;;  %v2764_v56 = vsel %vm430_vm3, %v6860_v63, %v2749_v36  ;;  %v2772_v45 = vsel %vm430_vm3, %v2749_v36, %v6860_v63  ;;  %v7095_v26 = vpop.permute.xlu1 %3118  ;;  %v4472_v10 = vld [vmem:[%s8133_s1 + $0x7] ss:$8 sm:$0x3] }
 0x496   : > { %8393 = vst [vmem:[#allocation31_spill] sm:$0xff] %v7095_v26  ;;  %v2787_v55 = vmul.f32 %v7077_v42, %v2772_v45  ;;  %v2788_v21 = vmul.f32 %v7079_v31, %v2764_v56  ;;  %v4469_v63 = vld [vmem:[%s8134_s2 + $0x5] ss:$8 sm:$0x3]  ;;  %v7117_v56 = vperm.slane %v4468_v59, 0  ;;  %v7119_v45 = vperm.slane %v4468_v59, 1 }
 0x497   : > { %v4473_v36 = vld [vmem:[%s8134_s2 + $0x7] ss:$8 sm:$0x3]  ;;  %v7127_v26 = vperm.slane %v4469_v63, 0 }
 0x498   : > { %v2808_v58 = vadd.f32 %v7085_v62, %v2787_v55  ;;  %v2809_v29 = vadd.f32 %v7087_v53, %v2788_v21  ;;  %v7121_v21 = vperm.slane %v4472_v10, 0  ;;  %v7123_v55 = vperm.slane %v4472_v10, 1 }
 0x499   : > { %3454 = vrot.lane.b32.xlu2 %v6824_v0, %s4631_s27  ;;  %v7131_v34 = vperm.slane %v4473_v36, 0 }
 0x49a   : > { %2824 = vst [vmem:[#allocation3] sm:$0xff] %v2808_v58  ;;  %3006 = vrot.lane.b32.xlu0 %v6824_v0, %s4628_s24  ;;  %3704 = vrot.lane.b32.xlu1 %v6841_v9, %s4625_s21  ;;  %v7129_v58 = vperm.slane %v4469_v63, 1  ;;  %v7133_v0 = vperm.slane %v4473_v36, 1 }
 0x49b   : > { %2825 = vst [vmem:[#allocation3 + $0x8] sm:$0xff] %v2809_v29 }
 0x49c   : > { %v3321_v12 = vpop.permute.xlu0 %3320  ;;  %8394 = vst [vmem:[#allocation29_spill] sm:$0xff] %v7131_v34  ;;  %v3571_v14 = vpop.permute.xlu2 %3570 }
 0x49d   : > { %8395 = vst [vmem:[#allocation25_spill] sm:$0xff] %v7133_v0  ;;  %v3336_v59 = vsel %vm598_vm7, %v6792_v51, %v3321_v12  ;;  %v3344_v29 = vsel %vm598_vm7, %v3321_v12, %v6792_v51  ;;  %v3585_v10 = vsel %vm676_vm9, %v6875_v50, %v3571_v14  ;;  %v3593_v63 = vsel %vm676_vm9, %v3571_v14, %v6875_v50  ;;  %v7147_v25 = vpop.permute.xlu1 %2994  ;;  %v4464_v50 = vld [vmem:[%s8133_s1 + $0x3] ss:$8 sm:$0x3] }
 0x49e   : > { %8396 = vst [vmem:[#allocation33_spill] sm:$0xff] %v7147_v25  ;;  %v3359_v36 = vmul.f32 %v7117_v56, %v3336_v59  ;;  %v3360_v4 = vmul.f32 %v7119_v45, %v3344_v29  ;;  %v3609_v52 = vmul.f32 %v7121_v21, %v3585_v10  ;;  %v3610_v6 = vmul.f32 %v7123_v55, %v3593_v63 }
 0x49f   : > { %v7169_v14 = vperm.slane %v4464_v50, 0  ;;  %v7171_v59 = vperm.slane %v4464_v50, 1 }
 0x4a0   : > { %v3380_v51 = vadd.f32 %v7127_v26, %v3359_v36  ;;  %v3381_v12 = vadd.f32 %v7129_v58, %v3360_v4  ;;  %v3630_v60 = vadd.f32 %v7131_v34, %v3609_v52  ;;  %v3631_v5 = vadd.f32 %v7133_v0, %v3610_v6  ;;  %v4465_v6 = vld [vmem:[%s8134_s2 + $0x3] ss:$8 sm:$0x3] }
 0x4a1   : > { %2884 = vrot.lane.b32.xlu2 %v6841_v9, %s4627_s8  ;;  %v7189_v50 = vperm.slane %v4465_v6, 0 }
 0x4a2   : > { %3396 = vst [vmem:[#allocation3 + $0x280] sm:$0xff] %v3380_v51  ;;  %2760 = vrot.lane.b32.xlu0 %v6841_v9, %s4626_s22  ;;  %3698 = vrot.lane.b32.xlu1 %v6794_v39, %s4625_s21 }
 0x4a3   : > { %3397 = vst [vmem:[#allocation3 + $0x288] sm:$0xff] %v3381_v12 }
 0x4a4   : > { %3646 = vst [vmem:[#allocation3 + $0x390] sm:$0xff] %v3630_v60  ;;  %v3569_v4 = vpop.permute.xlu0 %3568  ;;  %v3573_v52 = vpop.permute.xlu2 %3572 }
 0x4a5   : > { %3647 = vst [vmem:[#allocation3 + $0x398] sm:$0xff] %v3631_v5  ;;  %v3584_v29 = vsel %vm676_vm9, %v6807_v41, %v3569_v4  ;;  %v3592_v39 = vsel %vm676_vm9, %v3569_v4, %v6807_v41  ;;  %v3586_v60 = vsel %vm676_vm9, %v6887_v57, %v3573_v52  ;;  %v3594_v10 = vsel %vm676_vm9, %v3573_v52, %v6887_v57  ;;  %v3121_v63 = vpop.permute.xlu1 %3120  ;;  %v4470_v52 = vld [vmem:[%s8133_s1 + $0x6] ss:$8 sm:$0x3] }
 0x4a6   : > { %v3607_v36 = vmul.f32 %v7121_v21, %v3584_v29  ;;  %v3608_v5 = vmul.f32 %v7123_v55, %v3592_v39  ;;  %v3611_v51 = vmul.f32 %v7121_v21, %v3586_v60  ;;  %v3612_v12 = vmul.f32 %v7123_v55, %v3594_v10 }
 0x4a7   : > { %v7191_v41 = vperm.slane %v4465_v6, 1  ;;  %v3136_v4 = vsel %vm549_vm6, %v6837_v49, %v3121_v63  ;;  %v3144_v57 = vsel %vm549_vm6, %v3121_v63, %v6837_v49  ;;  %v4471_v49 = vld [vmem:[%s8134_s2 + $0x6] ss:$8 sm:$0x3]  ;;  %v7215_v63 = vperm.slane %v4470_v52, 0 }
 0x4a8   : > { %v3628_v29 = vadd.f32 %v7131_v34, %v3607_v36  ;;  %v3629_v39 = vadd.f32 %v7133_v0, %v3608_v5  ;;  %v3632_v60 = vadd.f32 %v7131_v34, %v3611_v51  ;;  %v3633_v6 = vadd.f32 %v7133_v0, %v3612_v12 }
 0x4a9   : > { %v3159_v10 = vmul.f32 %v7169_v14, %v3144_v57  ;;  %v3160_v25 = vmul.f32 %v7171_v59, %v3136_v4  ;;  %3580 = vrot.lane.b32.xlu2 %v6841_v9, %s4632_s28  ;;  %v7217_v36 = vperm.slane %v4470_v52, 1  ;;  %v7223_v4 = vperm.slane %v4471_v49, 0 }
 0x4aa   : > { %3644 = vst [vmem:[#allocation3 + $0x380] sm:$0xff] %v3628_v29  ;;  %3008 = vrot.lane.b32.xlu0 %v6841_v9, %s4628_s24  ;;  %3430 = vrot.lane.b32.xlu1 %v6631_v3, %s4631_s27  ;;  %v7225_v57 = vperm.slane %v4471_v49, 1 }
 0x4ab   : > { %3645 = vst [vmem:[#allocation3 + $0x388] sm:$0xff] %v3629_v39  ;;  %v3180_v5 = vadd.f32 %v7189_v50, %v3159_v10  ;;  %v3181_v51 = vadd.f32 %v7191_v41, %v3160_v25 }
 0x4ac   : > { %3648 = vst [vmem:[#allocation3 + $0x3a0] sm:$0xff] %v3632_v60  ;;  %v2875_v12 = vpop.permute.xlu0 %2874  ;;  %v3449_v29 = vpop.permute.xlu2 %3448 }
 0x4ad   : > { %8397 = vst [vmem:[#allocation27_spill] sm:$0xff] %v7225_v57  ;;  %v2889_v52 = vsel %vm471_vm0, %v6822_v47, %v2875_v12  ;;  %v2897_v39 = vsel %vm471_vm0, %v2875_v12, %v6822_v47  ;;  %v3462_v25 = vsel %vm637_vm8, %v6899_v13, %v3449_v29  ;;  %v3470_v60 = vsel %vm637_vm8, %v3449_v29, %v6899_v13  ;;  %v3123_v10 = vpop.permute.xlu1 %3122 }
 0x4ae   : > { %3649 = vst [vmem:[#allocation3 + $0x3a8] sm:$0xff] %v3633_v6  ;;  %v2913_v6 = vmul.f32 %v7043_v23, %v2897_v39  ;;  %v2914_v49 = vmul.f32 %v7045_v19, %v2889_v52  ;;  %v3487_v61 = vmul.f32 %v7215_v63, %v3462_v25  ;;  %v3488_v32 = vmul.f32 %v7217_v36, %v3470_v60 }
 0x4af   : > { %3196 = vst [vmem:[#allocation3 + $0x180] sm:$0xff] %v3180_v5  ;;  %v3137_v47 = vsel %vm549_vm6, %v6854_v38, %v3123_v10  ;;  %v3145_v12 = vsel %vm549_vm6, %v3123_v10, %v6854_v38 }
 0x4b0   : > { %3197 = vst [vmem:[#allocation3 + $0x188] sm:$0xff] %v3181_v51  ;;  %v2934_v13 = vadd.f32 %v7051_v18, %v2913_v6  ;;  %v2935_v5 = vadd.f32 %v7053_v46, %v2914_v49  ;;  %v3508_v29 = vadd.f32 %v7223_v4, %v3487_v61  ;;  %v3509_v52 = vadd.f32 %v7225_v57, %v3488_v32 }
 0x4b1   : > { %v3161_v39 = vmul.f32 %v7169_v14, %v3145_v12  ;;  %v3162_v51 = vmul.f32 %v7171_v59, %v3137_v47  ;;  %3456 = vrot.lane.b32.xlu2 %v6841_v9, %s4631_s27 }
 0x4b2   : > { %2950 = vst [vmem:[#allocation3 + $0x90] sm:$0xff] %v2934_v13  ;;  %2886 = vrot.lane.b32.xlu0 %v6858_v22, %s4627_s8  ;;  %2762 = vrot.lane.b32.xlu1 %v6858_v22, %s4626_s22 }
 0x4b3   : > { %2951 = vst [vmem:[#allocation3 + $0x98] sm:$0xff] %v2935_v5  ;;  %v7260_v38 = vadd.f32 %v7189_v50, %v3161_v39  ;;  %v3183_v25 = vadd.f32 %v7191_v41, %v3162_v51 }
 0x4b4   : > { %3524 = vst [vmem:[#allocation3 + $0x320] sm:$0xff] %v3508_v29  ;;  %v2751_v32 = vpop.permute.xlu0 %2750  ;;  %v2879_v61 = vpop.permute.xlu2 %2878 }
 0x4b5   : > { %3525 = vst [vmem:[#allocation3 + $0x328] sm:$0xff] %v3509_v52  ;;  %v2765_v60 = vsel %vm430_vm3, %v6839_v15, %v2751_v32  ;;  %v2773_v9 = vsel %vm430_vm3, %v2751_v32, %v6839_v15  ;;  %v2891_v10 = vsel %vm471_vm0, %v6911_v48, %v2879_v61  ;;  %v2899_v6 = vsel %vm471_vm0, %v2879_v61, %v6911_v48  ;;  %v2877_v49 = vpop.permute.xlu1 %2876 }
 0x4b6   : > { %3198 = vst [vmem:[#allocation3 + $0x190] sm:$0xff] %v7260_v38  ;;  %v2789_v47 = vmul.f32 %v7077_v42, %v2773_v9  ;;  %v2790_v12 = vmul.f32 %v7079_v31, %v2765_v60  ;;  %v2917_v13 = vmul.f32 %v7043_v23, %v2899_v6  ;;  %v2918_v5 = vmul.f32 %v7045_v19, %v2891_v10 }
 0x4b7   : > { %3199 = vst [vmem:[#allocation3 + $0x198] sm:$0xff] %v3183_v25  ;;  %v2890_v15 = vsel %vm471_vm0, %v6871_v1, %v2877_v49  ;;  %v2898_v48 = vsel %vm471_vm0, %v2877_v49, %v6871_v1 }
 0x4b8   : > { %v2810_v29 = vadd.f32 %v7085_v62, %v2789_v47  ;;  %v2811_v52 = vadd.f32 %v7087_v53, %v2790_v12  ;;  %v7291_v39 = vadd.f32 %v7051_v18, %v2917_v13  ;;  %v2939_v51 = vadd.f32 %v7053_v46, %v2918_v5 }
 0x4b9   : > { %v2915_v32 = vmul.f32 %v7043_v23, %v2898_v48  ;;  %v2916_v25 = vmul.f32 %v7045_v19, %v2890_v15  ;;  %2982 = vrot.lane.b32.xlu2 %v6631_v3, %s4628_s24 }
 0x4ba   : > { %2826 = vst [vmem:[#allocation3 + $0x10] sm:$0xff] %v2810_v29  ;;  %3682 = vrot.lane.b32.xlu0 %v6663_v30, %s4625_s21  ;;  %3334 = vrot.lane.b32.xlu1 %v6858_v22, %s4630_s26 }
 0x4bb   : > { %2827 = vst [vmem:[#allocation3 + $0x18] sm:$0xff] %v2811_v52  ;;  %v7301_v1 = vadd.f32 %v7051_v18, %v2915_v32  ;;  %v2937_v61 = vadd.f32 %v7053_v46, %v2916_v25 }
 0x4bc   : > { %v3323_v60 = vpop.permute.xlu0 %3322  ;;  %v2755_v9 = vpop.permute.xlu2 %2754  ;;  %2955 = vst [vmem:[#allocation3 + $0xb8] sm:$0xff] %v2939_v51 }
 0x4bd   : > { %v3337_v10 = vsel %vm598_vm7, %v6856_v35, %v3323_v60  ;;  %v3345_v30 = vsel %vm598_vm7, %v3323_v60, %v6856_v35  ;;  %v2767_v6 = vsel %vm430_vm3, %v6923_v40, %v2755_v9  ;;  %v2775_v49 = vsel %vm430_vm3, %v2755_v9, %v6923_v40  ;;  %v2753_v47 = vpop.permute.xlu1 %2752  ;;  %2953 = vst [vmem:[#allocation3 + $0xa8] sm:$0xff] %v2937_v61 }
 0x4be   : > { %v3361_v12 = vmul.f32 %v7117_v56, %v3337_v10  ;;  %v3362_v13 = vmul.f32 %v7119_v45, %v3345_v30  ;;  %v2793_v5 = vmul.f32 %v7077_v42, %v2775_v49  ;;  %v2794_v15 = vmul.f32 %v7079_v31, %v2767_v6 }
 0x4bf   : > { %v2766_v35 = vsel %vm430_vm3, %v6883_v54, %v2753_v47  ;;  %v2774_v48 = vsel %vm430_vm3, %v2753_v47, %v6883_v54 }
 0x4c0   : > { %v7329_v40 = vadd.f32 %v7127_v26, %v3361_v12  ;;  %v3383_v29 = vadd.f32 %v7129_v58, %v3362_v13  ;;  %v7333_v52 = vadd.f32 %v7085_v62, %v2793_v5  ;;  %v2815_v51 = vadd.f32 %v7087_v53, %v2794_v15 }
 0x4c1   : > { %v2791_v32 = vmul.f32 %v7077_v42, %v2774_v48  ;;  %v2792_v25 = vmul.f32 %v7079_v31, %v2766_v35  ;;  %3446 = vrot.lane.b32.xlu2 %v6766_v17, %s4631_s27 }
 0x4c2   : > { %8398 = vst [vmem:[#allocation35_spill] sm:$0xff] %v7329_v40  ;;  %2998 = vrot.lane.b32.xlu0 %v6766_v17, %s4628_s24  ;;  %3696 = vrot.lane.b32.xlu1 %v6779_v16, %s4625_s21 }
 0x4c3   : > { %8399 = vst [vmem:[#allocation40_spill] sm:$0xff] %v7333_v52  ;;  %v2812_v54 = vadd.f32 %v7085_v62, %v2791_v32  ;;  %v2813_v61 = vadd.f32 %v7087_v53, %v2792_v25 }
 0x4c4   : > { %3398 = vst [vmem:[#allocation3 + $0x290] sm:$0xff] %v7329_v40  ;;  %v3325_v60 = vpop.permute.xlu0 %3324  ;;  %v3575_v9 = vpop.permute.xlu2 %3574  ;;  %v8442_v40 = vld [vmem:[#allocation56_spill] sm:$0xff] }
 0x4c5   : > { %3399 = vst [vmem:[#allocation3 + $0x298] sm:$0xff] %v3383_v29  ;;  %v3338_v10 = vsel %vm598_vm7, %v6873_v2, %v3325_v60  ;;  %v3346_v30 = vsel %vm598_vm7, %v3325_v60, %v6873_v2  ;;  %v3587_v6 = vsel %vm676_vm9, %v6935_v11, %v3575_v9  ;;  %v3595_v49 = vsel %vm676_vm9, %v3575_v9, %v6935_v11  ;;  %v3125_v16 = vpop.permute.xlu1 %3124  ;;  %v4462_v11 = vld [vmem:[%s8133_s1 + $0x2] ss:$8 sm:$0x3] }
 0x4c6   : > { %2831 = vst [vmem:[#allocation3 + $0x38] sm:$0xff] %v2815_v51  ;;  %v3363_v47 = vmul.f32 %v7117_v56, %v3338_v10  ;;  %v3364_v12 = vmul.f32 %v7119_v45, %v3346_v30  ;;  %v3613_v13 = vmul.f32 %v7121_v21, %v3587_v6  ;;  %v3614_v5 = vmul.f32 %v7123_v55, %v3595_v49 }
 0x4c7   : > { %2828 = vst [vmem:[#allocation3 + $0x20] sm:$0xff] %v2812_v54  ;;  %v3138_v2 = vsel %vm549_vm6, %v6895_v24, %v3125_v16  ;;  %v3146_v15 = vsel %vm549_vm6, %v3125_v16, %v6895_v24  ;;  %v4463_v24 = vld [vmem:[%s8134_s2 + $0x2] ss:$8 sm:$0x3]  ;;  %v7387_v54 = vperm.slane %v4462_v11, 0 }
 0x4c8   : > { %2829 = vst [vmem:[#allocation3 + $0x28] sm:$0xff] %v2813_v61  ;;  %v7373_v35 = vadd.f32 %v7127_v26, %v3363_v47  ;;  %v3385_v48 = vadd.f32 %v7129_v58, %v3364_v12  ;;  %v3634_v29 = vadd.f32 %v7131_v34, %v3613_v13  ;;  %v3635_v51 = vadd.f32 %v7133_v0, %v3614_v5 }
 0x4c9   : > { %v3163_v32 = vmul.f32 %v7169_v14, %v3146_v15  ;;  %v3164_v25 = vmul.f32 %v7171_v59, %v3138_v2  ;;  %3134 = vrot.lane.b32.xlu2 %v6858_v22, %s4629_s25  ;;  %v7389_v61 = vperm.slane %v4462_v11, 1  ;;  %v7397_v10 = vperm.slane %v4463_v24, 0 }
 0x4ca   : > { %8400 = vst [vmem:[#allocation42_spill] sm:$0xff] %v7373_v35  ;;  %3582 = vrot.lane.b32.xlu0 %v6858_v22, %s4632_s28  ;;  %3458 = vrot.lane.b32.xlu1 %v6858_v22, %s4631_s27  ;;  %v7399_v30 = vperm.slane %v4463_v24, 1  ;;  %v8455_v35 = vld [vmem:[#allocation41_spill] sm:$0xff] }
 0x4cb   : > { %3401 = vst [vmem:[#allocation3 + $0x2a8] sm:$0xff] %v3385_v48  ;;  %v7392_v60 = vadd.f32 %v7189_v50, %v3163_v32  ;;  %v3185_v9 = vadd.f32 %v7191_v41, %v3164_v25 }
 0x4cc   : > { %3650 = vst [vmem:[#allocation3 + $0x3b0] sm:$0xff] %v3634_v29  ;;  %v3001_v6 = vpop.permute.xlu0 %3000  ;;  %v3451_v49 = vpop.permute.xlu2 %3450  ;;  %v3868_v27 = vld [vmem:[#allocation3 + $0x298] sm:$0xff] }
 0x4cd   : > { %3651 = vst [vmem:[#allocation3 + $0x3b8] sm:$0xff] %v3635_v51  ;;  %v3014_v16 = vsel %vm510_vm5, %v6885_v8, %v3001_v6  ;;  %v3022_v47 = vsel %vm510_vm5, %v3001_v6, %v6885_v8  ;;  %v3463_v12 = vsel %vm637_vm8, %v6947_v33, %v3451_v49  ;;  %v3471_v13 = vsel %vm637_vm8, %v3451_v49, %v6947_v33  ;;  %v3327_v5 = vpop.permute.xlu1 %3326 }
 0x4ce   : > { %3200 = vst [vmem:[#allocation3 + $0x1a0] sm:$0xff] %v7392_v60  ;;  %v3039_v2 = vmul.f32 %v7387_v54, %v3022_v47  ;;  %v3040_v15 = vmul.f32 %v7389_v61, %v3014_v16  ;;  %v3489_v11 = vmul.f32 %v7215_v63, %v3463_v12  ;;  %v3490_v48 = vmul.f32 %v7217_v36, %v3471_v13 }
 0x4cf   : > { %3201 = vst [vmem:[#allocation3 + $0x1a8] sm:$0xff] %v3185_v9  ;;  %v3339_v8 = vsel %vm598_vm7, %v6907_v44, %v3327_v5  ;;  %v3347_v33 = vsel %vm598_vm7, %v3327_v5, %v6907_v44 }
 0x4d0   : > { %v7425_v29 = vadd.f32 %v7397_v10, %v3039_v2  ;;  %v3061_v51 = vadd.f32 %v7399_v30, %v3040_v15  ;;  %v3510_v32 = vadd.f32 %v7223_v4, %v3489_v11  ;;  %v3511_v25 = vadd.f32 %v7225_v57, %v3490_v48 }
 0x4d1   : > { %v3365_v24 = vmul.f32 %v7117_v56, %v3339_v8  ;;  %v3366_v9 = vmul.f32 %v7119_v45, %v3347_v33  ;;  %2980 = vrot.lane.b32.xlu2 %v6610_v7, %s4628_s24 }
 0x4d2   : > { %8401 = vst [vmem:[#allocation64_spill] sm:$0xff] %v7425_v29  ;;  %3680 = vrot.lane.b32.xlu0 %v6647_v37, %s4625_s21  ;;  %3706 = vrot.lane.b32.xlu1 %v6858_v22, %s4625_s21 }
 0x4d3   : > { %3076 = vst [vmem:[#allocation3 + $0x120] sm:$0xff] %v7425_v29  ;;  %v7438_v44 = vadd.f32 %v7127_v26, %v3365_v24  ;;  %v3387_v6 = vadd.f32 %v7129_v58, %v3366_v9  ;;  %v4474_v9 = vld [vmem:[%s8133_s1 + $0x10] ss:$8 sm:$0x3] }
 0x4d4   : > { %3077 = vst [vmem:[#allocation3 + $0x128] sm:$0xff] %v3061_v51  ;;  %v3003_v49 = vpop.permute.xlu0 %3002  ;;  %v3329_v16 = vpop.permute.xlu2 %3328 }
 0x4d5   : > { %3526 = vst [vmem:[#allocation3 + $0x330] sm:$0xff] %v3510_v32  ;;  %v3015_v37 = vsel %vm510_vm5, %v6897_v43, %v3003_v49  ;;  %v3023_v47 = vsel %vm510_vm5, %v3003_v49, %v6897_v43  ;;  %v3340_v12 = vsel %vm598_vm7, %v6959_v20, %v3329_v16  ;;  %v3348_v13 = vsel %vm598_vm7, %v3329_v16, %v6959_v20  ;;  %v3127_v5 = vpop.permute.xlu1 %3126 }
 0x4d6   : > { %3527 = vst [vmem:[#allocation3 + $0x338] sm:$0xff] %v3511_v25  ;;  %v3041_v2 = vmul.f32 %v7387_v54, %v3023_v47  ;;  %v3042_v15 = vmul.f32 %v7389_v61, %v3015_v37  ;;  %v3367_v11 = vmul.f32 %v7117_v56, %v3340_v12  ;;  %v3368_v48 = vmul.f32 %v7119_v45, %v3348_v13  ;;  %v4475_v47 = vld [vmem:[%s8134_s2 + $0x10] ss:$8 sm:$0x3] }
 0x4d7   : > { %3403 = vst [vmem:[#allocation3 + $0x2b8] sm:$0xff] %v3387_v6  ;;  %v3139_v43 = vsel %vm549_vm6, %v6919_v28, %v3127_v5  ;;  %v3147_v8 = vsel %vm549_vm6, %v3127_v5, %v6919_v28  ;;  %v8403_v28 = vld [vmem:[#allocation51_spill] sm:$0xff]  ;;  %v7491_v12 = vperm.slane %v4474_v9, 0  ;;  %v7493_v13 = vperm.slane %v4474_v9, 1 }
 0x4d8   : > { %v7466_v20 = vadd.f32 %v7397_v10, %v3041_v2  ;;  %v3063_v33 = vadd.f32 %v7399_v30, %v3042_v15  ;;  %v7470_v51 = vadd.f32 %v7127_v26, %v3367_v11  ;;  %v3389_v32 = vadd.f32 %v7129_v58, %v3368_v48  ;;  %v8405_v15 = vld [vmem:[#allocation46_spill] sm:$0xff] }
 0x4d9   : > { %v3165_v25 = vmul.f32 %v7169_v14, %v3147_v8  ;;  %v3166_v24 = vmul.f32 %v7171_v59, %v3139_v43  ;;  %3010 = vrot.lane.b32.xlu2 %v6858_v22, %s4628_s24  ;;  %v8404_v22 = vld [vmem:[#allocation44_spill] sm:$0xff]  ;;  %v7513_v9 = vperm.slane %v4475_v47, 1 }
 0x4da   : > { %8402 = vst [vmem:[#allocation26_spill] sm:$0xff] %v7466_v20  ;;  %2996 = vrot.lane.b32.xlu0 %v8403_v28, %s4628_s24  ;;  %3428 = vrot.lane.b32.xlu1 %v6610_v7, %s4631_s27  ;;  %v8427_v20 = vld [vmem:[#allocation36_spill] sm:$0xff] }
 0x4db   : > { %3079 = vst [vmem:[#allocation3 + $0x138] sm:$0xff] %v3063_v33  ;;  %v7483_v6 = vadd.f32 %v7189_v50, %v3165_v25  ;;  %v3187_v49 = vadd.f32 %v7191_v41, %v3166_v24  ;;  %v7511_v24 = vperm.slane %v4475_v47, 0 }
 0x4dc   : > { %v2881_v16 = vpop.permute.xlu0 %2880  ;;  %v3129_v37 = vpop.permute.xlu2 %3128  ;;  %3405 = vst [vmem:[#allocation3 + $0x2c8] sm:$0xff] %v3389_v32 }
 0x4dd   : > { %v2892_v5 = vsel %vm471_vm0, %v8404_v22, %v2881_v16  ;;  %v2900_v2 = vsel %vm471_vm0, %v2881_v16, %v8404_v22  ;;  %v3140_v11 = vsel %vm549_vm6, %v8405_v15, %v3129_v37  ;;  %v3148_v48 = vsel %vm549_vm6, %v3129_v37, %v8405_v15  ;;  %v3701_v43 = vpop.permute.xlu1 %3700  ;;  %3203 = vst [vmem:[#allocation3 + $0x1b8] sm:$0xff] %v3187_v49  ;;  %v8406_v16 = vld [vmem:[#allocation54_spill] sm:$0xff] }
 0x4de   : > { %v2919_v8 = vmul.f32 %v7043_v23, %v2900_v2  ;;  %v2920_v33 = vmul.f32 %v7045_v19, %v2892_v5  ;;  %v3167_v32 = vmul.f32 %v7169_v14, %v3148_v48  ;;  %v3168_v25 = vmul.f32 %v7171_v59, %v3140_v11 }
 0x4df   : > { %v3712_v22 = vsel %vm715_vm4, %v8406_v16, %v3701_v43  ;;  %v3720_v37 = vsel %vm715_vm4, %v3701_v43, %v8406_v16  ;;  %v8409_v16 = vld [vmem:[#allocation60_spill] sm:$0xff] }
 0x4e0   : > { %v7522_v2 = vadd.f32 %v7051_v18, %v2919_v8  ;;  %v2941_v5 = vadd.f32 %v7053_v46, %v2920_v33  ;;  %v7526_v15 = vadd.f32 %v7189_v50, %v3167_v32  ;;  %v3189_v49 = vadd.f32 %v7191_v41, %v3168_v25  ;;  %v8408_v32 = vld [vmem:[#allocation49_spill] sm:$0xff] }
 0x4e1   : > { %v3739_v47 = vmul.f32 %v7491_v12, %v3712_v22  ;;  %v3740_v11 = vmul.f32 %v7493_v13, %v3720_v37  ;;  %3444 = vrot.lane.b32.xlu2 %v8403_v28, %s4631_s27 }
 0x4e2   : > { %3678 = vrot.lane.b32.xlu0 %v6631_v3, %s4625_s21  ;;  %2957 = vst [vmem:[#allocation3 + $0xc8] sm:$0xff] %v2941_v5  ;;  %3694 = vrot.lane.b32.xlu1 %v6766_v17, %s4625_s21 }
 0x4e3   : > { %v7536_v48 = vadd.f32 %v7511_v24, %v3739_v47  ;;  %v3761_v43 = vadd.f32 %v7513_v9, %v3740_v11  ;;  %3205 = vst [vmem:[#allocation3 + $0x1c8] sm:$0xff] %v3189_v49 }
 0x4e4   : > { %v2757_v8 = vpop.permute.xlu0 %2756  ;;  %v3453_v33 = vpop.permute.xlu2 %3452 }
 0x4e5   : > { %8407 = vst [vmem:[#allocation37_spill] sm:$0xff] %v7536_v48  ;;  %v2768_v25 = vsel %vm430_vm3, %v8408_v32, %v2757_v8  ;;  %v2776_v3 = vsel %vm430_vm3, %v2757_v8, %v8408_v32  ;;  %v3464_v22 = vsel %vm637_vm8, %v8409_v16, %v3453_v33  ;;  %v3472_v37 = vsel %vm637_vm8, %v3453_v33, %v8409_v16  ;;  %v2883_v17 = vpop.permute.xlu1 %2882  ;;  %v8410_v48 = vld [vmem:[#allocation45_spill] sm:$0xff]  ;;  %v3929_v16 = vld [vmem:[#allocation5] sm:$0x1] }
 0x4e6   : > { %v2795_v5 = vmul.f32 %v7077_v42, %v2776_v3  ;;  %v2796_v49 = vmul.f32 %v7079_v31, %v2768_v25  ;;  %v3491_v47 = vmul.f32 %v7215_v63, %v3464_v22  ;;  %v3492_v11 = vmul.f32 %v7217_v36, %v3472_v37  ;;  %3777 = vst [vmem:[#allocation3 + $0x448] sm:$0xff] %v3761_v43 }
 0x4e7   : > { %v2893_v8 = vsel %vm471_vm0, %v8410_v48, %v2883_v17  ;;  %v2901_v32 = vsel %vm471_vm0, %v2883_v17, %v8410_v48 }
 0x4e8   : > { %v7564_v33 = vadd.f32 %v7085_v62, %v2795_v5  ;;  %v2817_v3 = vadd.f32 %v7087_v53, %v2796_v49  ;;  %v7568_v25 = vadd.f32 %v7223_v4, %v3491_v47  ;;  %v3513_v22 = vadd.f32 %v7225_v57, %v3492_v11  ;;  %v8414_v47 = vld [vmem:[#allocation32_spill] sm:$0xff] }
 0x4e9   : > { %v2921_v43 = vmul.f32 %v7043_v23, %v2901_v32  ;;  %v2922_v37 = vmul.f32 %v7045_v19, %v2893_v8  ;;  %3676 = vrot.lane.b32.xlu2 %v6610_v7, %s4625_s21  ;;  %v8415_v7 = vld [vmem:[#allocation59_spill] sm:$0xff] }
 0x4ea   : > { %8411 = vst [vmem:[#allocation38_spill] sm:$0xff] %v7564_v33  ;;  %3692 = vrot.lane.b32.xlu0 %v8403_v28, %s4625_s21  ;;  %3932 = vperm.xlu1 %4522, %v3929_v16  }
 0x4eb   : > { %8412 = vst [vmem:[#allocation47_spill] sm:$0xff] %v7568_v25  ;;  %v7578_v48 = vadd.f32 %v7051_v18, %v2921_v43  ;;  %v7581_v17 = vadd.f32 %v7053_v46, %v2922_v37 }
 0x4ec   : > { %2833 = vst [vmem:[#allocation3 + $0x48] sm:$0xff] %v2817_v3  ;;  %v3577_v5 = vpop.permute.xlu0 %3576  ;;  %v2759_v49 = vpop.permute.xlu2 %2758 }
 0x4ed   : > { %8413 = vst [vmem:[#allocation43_spill] sm:$0xff] %v7581_v17  ;;  %v3588_v11 = vsel %vm676_vm9, %v8414_v47, %v3577_v5  ;;  %v3596_v28 = vsel %vm676_vm9, %v3577_v5, %v8414_v47  ;;  %v2769_v8 = vsel %vm430_vm3, %v8415_v7, %v2759_v49  ;;  %v2777_v32 = vsel %vm430_vm3, %v2759_v49, %v8415_v7  ;;  %v3579_v3 = vpop.permute.xlu1 %3578  ;;  %v8416_v17 = vld [vmem:[#allocation34_spill] sm:$0xff] }
 0x4ee   : > { %3529 = vst [vmem:[#allocation3 + $0x348] sm:$0xff] %v3513_v22  ;;  %v3615_v16 = vmul.f32 %v7121_v21, %v3588_v11  ;;  %v3616_v22 = vmul.f32 %v7123_v55, %v3596_v28  ;;  %v2797_v43 = vmul.f32 %v7077_v42, %v2777_v32  ;;  %v2798_v37 = vmul.f32 %v7079_v31, %v2769_v8 }
 0x4ef   : > { %v3589_v5 = vsel %vm676_vm9, %v8416_v17, %v3579_v3  ;;  %v3597_v47 = vsel %vm676_vm9, %v3579_v3, %v8416_v17 }
 0x4f0   : > { %v7606_v25 = vadd.f32 %v7131_v34, %v3615_v16  ;;  %v3637_v49 = vadd.f32 %v7133_v0, %v3616_v22  ;;  %v7610_v11 = vadd.f32 %v7085_v62, %v2797_v43  ;;  %v2819_v28 = vadd.f32 %v7087_v53, %v2798_v37  ;;  %v8421_v22 = vld [vmem:[#allocation50_spill] sm:$0xff] }
 0x4f1   : > { %v3617_v7 = vmul.f32 %v7121_v21, %v3589_v5  ;;  %v3618_v8 = vmul.f32 %v7123_v55, %v3597_v47  ;;  %v8422_v5 = vld [vmem:[#allocation48_spill] sm:$0xff] }
 0x4f2   : > { %8417 = vst [vmem:[#allocation22_spill] sm:$0xff] %v7606_v25 }
 0x4f3   : > { %8418 = vst [vmem:[#allocation21_spill] sm:$0xff] %v7610_v11  ;;  %v7616_v32 = vadd.f32 %v7131_v34, %v3617_v7  ;;  %v7619_v17 = vadd.f32 %v7133_v0, %v3618_v8 }
 0x4f4   : > { %3653 = vst [vmem:[#allocation3 + $0x3c8] sm:$0xff] %v3637_v49  ;;  %v3005_v3 = vpop.permute.xlu0 %3004  ;;  %v3455_v16 = vpop.permute.xlu2 %3454 }
 0x4f5   : > { %8419 = vst [vmem:[#allocation19_spill] sm:$0xff] %v7616_v32  ;;  %v3016_v43 = vsel %vm510_vm5, %v8421_v22, %v3005_v3  ;;  %v3024_v37 = vsel %vm510_vm5, %v3005_v3, %v8421_v22  ;;  %v3465_v47 = vsel %vm637_vm8, %v8422_v5, %v3455_v16  ;;  %v3473_v49 = vsel %vm637_vm8, %v3455_v16, %v8422_v5  ;;  %v3703_v7 = vpop.permute.xlu1 %3702  ;;  %v8423_v3 = vld [vmem:[#allocation24_spill] sm:$0xff] }
 0x4f6   : > { %8420 = vst [vmem:[#allocation17_spill] sm:$0xff] %v7619_v17  ;;  %v3043_v8 = vmul.f32 %v7387_v54, %v3024_v37  ;;  %v3493_v25 = vmul.f32 %v7215_v63, %v3465_v47  ;;  %v3494_v32 = vmul.f32 %v7217_v36, %v3473_v49  ;;  %v3713_v22 = vsel %vm715_vm4, %v8423_v3, %v3703_v7 }
 0x4f7   : > { %2835 = vst [vmem:[#allocation3 + $0x58] sm:$0xff] %v2819_v28  ;;  %v3044_v28 = vmul.f32 %v7389_v61, %v3016_v43  ;;  %v3721_v29 = vsel %vm715_vm4, %v3703_v7, %v8423_v3  ;;  %v3741_v47 = vmul.f32 %v7491_v12, %v3713_v22 }
 0x4f8   : > { %3655 = vst [vmem:[#allocation3 + $0x3d8] sm:$0xff] %v7619_v17  ;;  %v7645_v16 = vadd.f32 %v7397_v10, %v3043_v8  ;;  %v7649_v43 = vadd.f32 %v7223_v4, %v3493_v25  ;;  %v3515_v5 = vadd.f32 %v7225_v57, %v3494_v32  ;;  %v3742_v49 = vmul.f32 %v7493_v13, %v3721_v29 }
 0x4f9   : > { %v3065_v37 = vadd.f32 %v7399_v30, %v3044_v28  ;;  %v7655_v17 = vadd.f32 %v7511_v24, %v3741_v47  ;;  %v8428_v28 = vld [vmem:[#allocation63_spill] sm:$0xff] }
 0x4fa   : > { %8424 = vst [vmem:[#allocation16_spill] sm:$0xff] %v7645_v16  ;;  %v3763_v7 = vadd.f32 %v7513_v9, %v3742_v49 }
 0x4fb   : > { %8425 = vst [vmem:[#allocation18_spill] sm:$0xff] %v7649_v43 }
 0x4fc   : > { %3081 = vst [vmem:[#allocation3 + $0x148] sm:$0xff] %v3065_v37  ;;  %v3331_v3 = vpop.permute.xlu0 %3330  ;;  %v2885_v8 = vpop.permute.xlu2 %2884 }
 0x4fd   : > { %8426 = vst [vmem:[#allocation14_spill] sm:$0xff] %v7655_v17  ;;  %v3341_v25 = vsel %vm598_vm7, %v8427_v20, %v3331_v3  ;;  %v3349_v32 = vsel %vm598_vm7, %v3331_v3, %v8427_v20  ;;  %v2894_v29 = vsel %vm471_vm0, %v8428_v28, %v2885_v8  ;;  %v2902_v22 = vsel %vm471_vm0, %v2885_v8, %v8428_v28  ;;  %v3333_v37 = vpop.permute.xlu1 %3332  ;;  %v8429_v17 = vld [vmem:[#allocation23_spill] sm:$0xff] }
 0x4fe   : > { %3531 = vst [vmem:[#allocation3 + $0x358] sm:$0xff] %v3515_v5  ;;  %v3369_v47 = vmul.f32 %v7117_v56, %v3341_v25  ;;  %v3370_v5 = vmul.f32 %v7119_v45, %v3349_v32  ;;  %v2923_v49 = vmul.f32 %v7043_v23, %v2902_v22  ;;  %v2924_v43 = vmul.f32 %v7045_v19, %v2894_v29 }
 0x4ff   : > { %3779 = vst [vmem:[#allocation3 + $0x458] sm:$0xff] %v3763_v7  ;;  %v3342_v20 = vsel %vm598_vm7, %v8429_v17, %v3333_v37  ;;  %v3350_v3 = vsel %vm598_vm7, %v3333_v37, %v8429_v17 }
 0x500   : > { %v7681_v8 = vadd.f32 %v7127_v26, %v3369_v47  ;;  %v7684_v25 = vadd.f32 %v7129_v58, %v3370_v5  ;;  %v7687_v32 = vadd.f32 %v7051_v18, %v2923_v49  ;;  %v7690_v28 = vadd.f32 %v7053_v46, %v2924_v43  ;;  %v8433_v5 = vld [vmem:[#allocation53_spill] sm:$0xff] }
 0x501   : > { %v3371_v7 = vmul.f32 %v7117_v56, %v3342_v20  ;;  %v3372_v29 = vmul.f32 %v7119_v45, %v3350_v3  ;;  %v8434_v20 = vld [vmem:[#allocation62_spill] sm:$0xff] }
 0x502   : > { %8430 = vst [vmem:[#allocation13_spill] sm:$0xff] %v7684_v25 }
 0x503   : > { %8431 = vst [vmem:[#allocation51_spill] sm:$0xff] %v7690_v28  ;;  %v7696_v17 = vadd.f32 %v7127_v26, %v3371_v7  ;;  %v7699_v22 = vadd.f32 %v7129_v58, %v3372_v29 }
 0x504   : > { %3407 = vst [vmem:[#allocation3 + $0x2d8] sm:$0xff] %v7684_v25  ;;  %v3131_v37 = vpop.permute.xlu0 %3130  ;;  %v3581_v47 = vpop.permute.xlu2 %3580 }
 0x505   : > { %8432 = vst [vmem:[#allocation44_spill] sm:$0xff] %v7699_v22  ;;  %v3141_v49 = vsel %vm549_vm6, %v8433_v5, %v3131_v37  ;;  %v3149_v43 = vsel %vm549_vm6, %v3131_v37, %v8433_v5  ;;  %v3590_v3 = vsel %vm676_vm9, %v8434_v20, %v3581_v47  ;;  %v3598_v7 = vsel %vm676_vm9, %v3581_v47, %v8434_v20  ;;  %v3133_v29 = vpop.permute.xlu1 %3132  ;;  %v8435_v37 = vld [vmem:[#allocation57_spill] sm:$0xff] }
 0x506   : > { %v3169_v25 = vmul.f32 %v7169_v14, %v3149_v43  ;;  %v3170_v28 = vmul.f32 %v7171_v59, %v3141_v49  ;;  %v3619_v52 = vmul.f32 %v7121_v21, %v3590_v3  ;;  %v3620_v16 = vmul.f32 %v7123_v55, %v3598_v7  ;;  %3409 = vst [vmem:[#allocation3 + $0x2e8] sm:$0xff] %v7699_v22 }
 0x507   : > { %v3142_v5 = vsel %vm549_vm6, %v8435_v37, %v3133_v29  ;;  %v3150_v33 = vsel %vm549_vm6, %v3133_v29, %v8435_v37 }
 0x508   : > { %v7725_v47 = vadd.f32 %v7189_v50, %v3169_v25  ;;  %v7728_v43 = vadd.f32 %v7191_v41, %v3170_v28  ;;  %v7731_v49 = vadd.f32 %v7131_v34, %v3619_v52  ;;  %v7734_v20 = vadd.f32 %v7133_v0, %v3620_v16  ;;  %v8440_v28 = vld [vmem:[#allocation20_spill] sm:$0xff] }
 0x509   : > { %v3171_v3 = vmul.f32 %v7169_v14, %v3150_v33  ;;  %v3172_v7 = vmul.f32 %v7171_v59, %v3142_v5  ;;  %v8441_v16 = vld [vmem:[#allocation52_spill] sm:$0xff] }
 0x50a   : > { %8436 = vst [vmem:[#allocation46_spill] sm:$0xff] %v7728_v43 }
 0x50b   : > { %8437 = vst [vmem:[#allocation54_spill] sm:$0xff] %v7731_v49  ;;  %v7739_v22 = vadd.f32 %v7189_v50, %v3171_v3  ;;  %v7742_v29 = vadd.f32 %v7191_v41, %v3172_v7 }
 0x50c   : > { %8438 = vst [vmem:[#allocation49_spill] sm:$0xff] %v7734_v20  ;;  %v3007_v25 = vpop.permute.xlu0 %3006  ;;  %v3457_v37 = vpop.permute.xlu2 %3456 }
 0x50d   : > { %8439 = vst [vmem:[#allocation60_spill] sm:$0xff] %v7742_v29  ;;  %v3017_v52 = vsel %vm510_vm5, %v8440_v28, %v3007_v25  ;;  %v3025_v33 = vsel %vm510_vm5, %v3007_v25, %v8440_v28  ;;  %v3466_v5 = vsel %vm637_vm8, %v8441_v16, %v3457_v37  ;;  %v3474_v3 = vsel %vm637_vm8, %v3457_v37, %v8441_v16  ;;  %v3705_v7 = vpop.permute.xlu1 %3704 }
 0x50e   : > { %3657 = vst [vmem:[#allocation3 + $0x3e8] sm:$0xff] %v7734_v20  ;;  %v3045_v43 = vmul.f32 %v7387_v54, %v3025_v33  ;;  %v3046_v20 = vmul.f32 %v7389_v61, %v3017_v52  ;;  %v3495_v29 = vmul.f32 %v7215_v63, %v3466_v5  ;;  %v3496_v49 = vmul.f32 %v7217_v36, %v3474_v3 }
 0x50f   : > { %v3714_v25 = vsel %vm715_vm4, %v8442_v40, %v3705_v7  ;;  %v3722_v28 = vsel %vm715_vm4, %v3705_v7, %v8442_v40 }
 0x510   : > { %v7768_v11 = vadd.f32 %v7397_v10, %v3045_v43  ;;  %v7771_v37 = vadd.f32 %v7399_v30, %v3046_v20  ;;  %v7774_v52 = vadd.f32 %v7223_v4, %v3495_v29  ;;  %v7777_v33 = vadd.f32 %v7225_v57, %v3496_v49  ;;  %v8449_v20 = vld [vmem:[#allocation39_spill] sm:$0xff] }
 0x511   : > { %v3743_v16 = vmul.f32 %v7491_v12, %v3714_v25  ;;  %v3744_v5 = vmul.f32 %v7493_v13, %v3722_v28 }
 0x512   : > { %8443 = vst [vmem:[#allocation45_spill] sm:$0xff] %v7768_v11 }
 0x513   : > { %8444 = vst [vmem:[#allocation32_spill] sm:$0xff] %v7771_v37  ;;  %v7782_v3 = vadd.f32 %v7511_v24, %v3743_v16  ;;  %v7785_v40 = vadd.f32 %v7513_v9, %v3744_v5 }
 0x514   : > { %8445 = vst [vmem:[#allocation59_spill] sm:$0xff] %v7774_v52  ;;  %v2761_v43 = vpop.permute.xlu0 %2760  ;;  %v7787_v7 = vpop.permute.xlu2 %2982  ;;  %v8451_v52 = vld [vmem:[#allocation15_spill] sm:$0xff] }
 0x515   : > { %8446 = vst [vmem:[#allocation34_spill] sm:$0xff] %v7777_v33  ;;  %v2770_v29 = vsel %vm430_vm3, %v8449_v20, %v2761_v43  ;;  %v2778_v49 = vsel %vm430_vm3, %v2761_v43, %v8449_v20  ;;  %v3699_v25 = vpop.permute.xlu1 %3698 }
 0x516   : > { %8447 = vst [vmem:[#allocation50_spill] sm:$0xff] %v7782_v3  ;;  %v2799_v28 = vmul.f32 %v7077_v42, %v2778_v49  ;;  %v2800_v16 = vmul.f32 %v7079_v31, %v2770_v29 }
 0x517   : > { %8448 = vst [vmem:[#allocation48_spill] sm:$0xff] %v7785_v40 }
 0x518   : > { %v7798_v37 = vadd.f32 %v7085_v62, %v2799_v28  ;;  %v7801_v5 = vadd.f32 %v7087_v53, %v2800_v16 }
 0x51a   : > { %8450 = vst [vmem:[#allocation24_spill] sm:$0xff] %v7801_v5 }
 0x51c   : > { %v3009_v40 = vpop.permute.xlu0 %3008  ;;  %v3447_v33 = vpop.permute.xlu2 %3446 }
 0x51d   : > { %v3018_v3 = vsel %vm510_vm5, %v8451_v52, %v3009_v40  ;;  %v3026_v43 = vsel %vm510_vm5, %v3009_v40, %v8451_v52  ;;  %v3431_v20 = vpop.permute.xlu1 %3430 }
 0x51e   : > { %v3047_v49 = vmul.f32 %v7387_v54, %v3026_v43  ;;  %v3048_v29 = vmul.f32 %v7389_v61, %v3018_v3  ;;  %v3461_v28 = vsel %vm637_vm8, %v3431_v20, %v3447_v33  ;;  %v3469_v16 = vsel %vm637_vm8, %v3447_v33, %v3431_v20 }
 0x51f   : > { %v3485_v5 = vmul.f32 %v7215_v63, %v3461_v28  ;;  %v3486_v11 = vmul.f32 %v7217_v36, %v3469_v16 }
 0x520   : > { %v7818_v0 = vadd.f32 %v7397_v10, %v3047_v49  ;;  %v7821_v52 = vadd.f32 %v7399_v30, %v3048_v29  ;;  %v8456_v49 = vld [vmem:[#allocation31_spill] sm:$0xff] }
 0x521   : > { %v7824_v40 = vadd.f32 %v7223_v4, %v3485_v5  ;;  %v7827_v3 = vadd.f32 %v7225_v57, %v3486_v11 }
 0x522   : > { %8452 = vst [vmem:[#allocation36_spill] sm:$0xff] %v7821_v52 }
 0x523   : > { %8453 = vst [vmem:[#allocation63_spill] sm:$0xff] %v7824_v40  ;;  %v8457_v40 = vld [vmem:[#allocation55_spill] sm:$0xff] }
 0x524   : > { %8454 = vst [vmem:[#allocation23_spill] sm:$0xff] %v7827_v3  ;;  %v2887_v43 = vpop.permute.xlu0 %2886  ;;  %v3135_v34 = vpop.permute.xlu2 %3134 }
 0x525   : > { %v2895_v33 = vsel %vm471_vm0, %v8455_v35, %v2887_v43  ;;  %v2903_v20 = vsel %vm471_vm0, %v2887_v43, %v8455_v35  ;;  %v3143_v29 = vsel %vm549_vm6, %v8456_v49, %v3135_v34  ;;  %v3151_v5 = vsel %vm549_vm6, %v3135_v34, %v8456_v49  ;;  %v2763_v11 = vpop.permute.xlu1 %2762 }
 0x526   : > { %v2925_v28 = vmul.f32 %v7043_v23, %v2903_v20  ;;  %v2926_v16 = vmul.f32 %v7045_v19, %v2895_v33  ;;  %v3173_v3 = vmul.f32 %v7169_v14, %v3151_v5  ;;  %v3174_v52 = vmul.f32 %v7171_v59, %v3143_v29 }
 0x527   : > { %v2771_v35 = vsel %vm430_vm3, %v8457_v40, %v2763_v11  ;;  %v2779_v43 = vsel %vm430_vm3, %v2763_v11, %v8457_v40 }
 0x528   : > { %v2946_v57 = vadd.f32 %v7051_v18, %v2925_v28  ;;  %v7853_v34 = vadd.f32 %v7053_v46, %v2926_v16  ;;  %v3194_v23 = vadd.f32 %v7189_v50, %v3173_v3  ;;  %v7857_v19 = vadd.f32 %v7191_v41, %v3174_v52 }
 0x529   : > { %v2801_v14 = vmul.f32 %v7077_v42, %v2779_v43  ;;  %v2802_v59 = vmul.f32 %v7079_v31, %v2771_v35  ;;  %v8460_v43 = vld [vmem:[#allocation58_spill] sm:$0xff] }
 0x52a   : > { %3948 = vmatpush.msrb.mxu0 %v2946_v57  ;;  %3968 = vmatpush.msrb.mxu1 %v3194_v23 }
 0x52b   : > { %v2822_v33 = vadd.f32 %v7085_v62, %v2801_v14  ;;  %v7863_v40 = vadd.f32 %v7087_v53, %v2802_v59  ;;  %v8458_v53 = vld [vmem:[#allocation61_spill] sm:$0xff] }
 0x52c   : > { %v3683_v18 = vpop.permute.xlu0 %3682  ;;  %v7865_v20 = vpop.permute.xlu2 %2980  ;;  %3949 = vmatpush.msrb.mxu0 %v7687_v32  ;;  %3969 = vmatpush.msrb.mxu1 %v7739_v22 }
 0x52d   : > { %v3711_v46 = vsel %vm715_vm4, %v3683_v18, %v3699_v25  ;;  %v3719_v42 = vsel %vm715_vm4, %v3699_v25, %v3683_v18  ;;  %v3335_v31 = vpop.permute.xlu1 %3334  ;;  %v8461_v18 = vld [vmem:[#allocation30_spill] sm:$0xff] }
 0x52e   : > { %v3737_v50 = vmul.f32 %v7491_v12, %v3711_v46  ;;  %v3738_v62 = vmul.f32 %v7493_v13, %v3719_v42  ;;  %v3343_v41 = vsel %vm598_vm7, %v8458_v53, %v3335_v31  ;;  %v3351_v57 = vsel %vm598_vm7, %v3335_v31, %v8458_v53  ;;  %3950 = vmatpush.msrb.mxu0 %v7578_v48  ;;  %v8464_v31 = vld [vmem:[#allocation25_spill] sm:$0xff] }
 0x52f   : > { %v3373_v32 = vmul.f32 %v7117_v56, %v3343_v41  ;;  %v3374_v22 = vmul.f32 %v7119_v45, %v3351_v57  ;;  %3970 = vmatpush.msrb.mxu1 %v7725_v47  ;;  %v8466_v41 = vld [vmem:[#allocation27_spill] sm:$0xff]  ;;  %v8467_v57 = vld [vmem:[#allocation45_spill] sm:$0xff] }
 0x530   : > { %v7886_v25 = vadd.f32 %v7511_v24, %v3737_v50  ;;  %v7889_v52 = vadd.f32 %v7513_v9, %v3738_v62  ;;  %3951 = vmatpush.msrb.mxu0 %v7522_v2  ;;  %v8465_v62 = vld [vmem:[#allocation21_spill] sm:$0xff] }
 0x531   : > { %v3394_v3 = vadd.f32 %v7127_v26, %v3373_v32  ;;  %v7893_v49 = vadd.f32 %v7129_v58, %v3374_v22  ;;  %3971 = vmatpush.msrb.mxu1 %v7526_v15  ;;  %v8459_v58 = vld [vmem:[#allocation33_spill] sm:$0xff]  ;;  %v8468_v32 = vld [vmem:[#allocation35_spill] sm:$0xff] }
 0x532   : > { %3952 = vmatpush.msrb.mxu0 %v7291_v39  ;;  %v3865_v22 = vld [vmem:[#allocation3 + $0x280] sm:$0xff] }
 0x533   : > { %3972 = vmatpush.msrb.mxu1 %v7483_v6  ;;  %3988 = vmatpush.msrb.mxu2 %v3394_v3  ;;  %v8470_v3 = vld [vmem:[#allocation16_spill] sm:$0xff] }
 0x534   : > { %v2999_v56 = vpop.permute.xlu0 %2998  ;;  %v3011_v45 = vpop.permute.xlu2 %3010  ;;  %3953 = vmatpush.msrb.mxu0 %v7301_v1  ;;  %v3801_v1 = vld [vmem:[#allocation3 + $0x80] sm:$0xff] }
 0x535   : > { %v3013_v48 = vsel %vm510_vm5, %v7787_v7, %v2999_v56  ;;  %v3021_v26 = vsel %vm510_vm5, %v2999_v56, %v7787_v7  ;;  %v3019_v2 = vsel %vm510_vm5, %v8459_v58, %v3011_v45  ;;  %v3027_v39 = vsel %vm510_vm5, %v3011_v45, %v8459_v58  ;;  %v3697_v6 = vpop.permute.xlu1 %3696  ;;  %3973 = vmatpush.msrb.mxu1 %v7392_v60  ;;  %v3803_v7 = vld [vmem:[#allocation3 + $0x90] sm:$0xff]  ;;  %v3833_v60 = vld [vmem:[#allocation3 + $0x180] sm:$0xff] }
 0x536   : > { %v3037_v15 = vmul.f32 %v7387_v54, %v3021_v26  ;;  %v3038_v47 = vmul.f32 %v7389_v61, %v3013_v48  ;;  %v3049_v29 = vmul.f32 %v7387_v54, %v3027_v39  ;;  %v3050_v5 = vmul.f32 %v7389_v61, %v3019_v2  ;;  %3989 = vmatpush.msrb.mxu2 %v7696_v17  ;;  %v8471_v45 = vld [vmem:[#allocation40_spill] sm:$0xff]  ;;  %v8472_v48 = vld [vmem:[#allocation54_spill] sm:$0xff] }
 0x537   : > { %3954 = vmatpush.msrb.mxu0 %v3803_v7  ;;  %3974 = vmatpush.msrb.mxu1 %v7260_v38  ;;  %v7973_v26 = vld [vmem:[%s8139_s7] sm:$0x1f] }
 0x538   : > { %v7919_v11 = vadd.f32 %v7397_v10, %v3037_v15  ;;  %v7922_v28 = vadd.f32 %v7399_v30, %v3038_v47  ;;  %v3070_v16 = vadd.f32 %v7397_v10, %v3049_v29  ;;  %v7926_v35 = vadd.f32 %v7399_v30, %v3050_v5  ;;  %3990 = vmatpush.msrb.mxu2 %v7681_v8  ;;  %v8473_v15 = vld [vmem:[#allocation26_spill] sm:$0xff]  ;;  %v3789_v29 = vld [vmem:[#allocation3 + $0x20] sm:$0xff] }
 0x539   : > { %3955 = vmatpush.msrb.mxu0 %v3801_v1  ;;  %3975 = vmatpush.msrb.mxu1 %v3833_v60  ;;  %v4527_v47 = vld [vmem:[#allocation3 + $0x270] sm:$0xff] }
 0x53a   : > { %3074 = vst [vmem:[#allocation3 + $0x110] sm:$0xff] %v7919_v11  ;;  %3991 = vmatpush.msrb.mxu2 %v7470_v51 }
 0x53b   : > { %3075 = vst [vmem:[#allocation3 + $0x118] sm:$0xff] %v7922_v28  ;;  %3956 = vmatpush.msrb.mxu0 %v2822_v33  ;;  %3976 = vmatpush.msrb.mxu1 %v3070_v16  ;;  %v8474_v16 = vld [vmem:[#allocation28_spill] sm:$0xff] }
 0x53c   : > { %v3583_v17 = vpop.permute.xlu0 %3582  ;;  %3992 = vmatpush.msrb.mxu2 %v7438_v44  ;;  %v8462_v44 = vld [vmem:[#allocation42_spill] sm:$0xff] }
 0x53d   : > { %v3591_v23 = vsel %vm676_vm9, %v8460_v43, %v3583_v17  ;;  %v3599_v38 = vsel %vm676_vm9, %v3583_v17, %v8460_v43  ;;  %v3459_v8 = vpop.permute.xlu1 %3458  ;;  %3957 = vmatpush.msrb.mxu0 %v7798_v37  ;;  %3977 = vmatpush.msrb.mxu1 %v7818_v0  ;;  %v8469_v0 = vld [vmem:[#allocation38_spill] sm:$0xff]  ;;  %v8475_v43 = vld [vmem:[#allocation64_spill] sm:$0xff] }
 0x53e   : > { %v3621_v14 = vmul.f32 %v7121_v21, %v3591_v23  ;;  %v3622_v59 = vmul.f32 %v7123_v55, %v3599_v38  ;;  %v3467_v51 = vsel %vm637_vm8, %v8461_v18, %v3459_v8  ;;  %v3475_v33 = vsel %vm637_vm8, %v3459_v8, %v8461_v18  ;;  %3993 = vmatpush.msrb.mxu2 %v8462_v44  ;;  %v8463_v21 = vld [vmem:[#allocation29_spill] sm:$0xff]  ;;  %v4528_v23 = vld [vmem:[#allocation3 + $0x260] sm:$0xff]  ;;  %v8477_v44 = vld [vmem:[#allocation22_spill] sm:$0xff] }
 0x53f   : > { %v3497_v46 = vmul.f32 %v7215_v63, %v3467_v51  ;;  %v3498_v42 = vmul.f32 %v7217_v36, %v3475_v33  ;;  %3958 = vmatpush.msrb.mxu0 %v8465_v62  ;;  %3978 = vmatpush.msrb.mxu1 %v8467_v57  ;;  %v3787_v38 = vld [vmem:[#allocation3 + $0x10] sm:$0xff]  ;;  %v3937_v8 = vperm.slane %v7973_v26, 0  ;;  %v8476_v18 = vld [vmem:[#allocation19_spill] sm:$0xff]  ;;  %v3445_v62 = vpop.permute.xlu2 %3444 }
 0x540   : > { %v3642_v55 = vadd.f32 %v8463_v21, %v3621_v14  ;;  %v7955_v50 = vadd.f32 %v8464_v31, %v3622_v59  ;;  %3994 = vmatpush.msrb.mxu2 %v8468_v32  ;;  %v4530_v21 = vld [vmem:[#allocation3 + $0x240] sm:$0xff] }
 0x541   : > { %v7959_v53 = vadd.f32 %v7223_v4, %v3497_v46  ;;  %v7962_v37 = vadd.f32 %v8466_v41, %v3498_v42  ;;  %3959 = vmatpush.msrb.mxu0 %v8469_v0  ;;  %3979 = vmatpush.msrb.mxu1 %v8470_v3  ;;  %v4529_v46 = vld [vmem:[#allocation3 + $0x250] sm:$0xff]  ;;  %v3785_v42 = vld [vmem:[#allocation3] sm:$0xff] }
 0x542   : > { %4008 = vmatpush.msrb.mxu3 %v3642_v55  ;;  %3995 = vmatpush.msrb.mxu2 %v3865_v22  ;;  %v3903_v55 = vld [vmem:[#allocation3 + $0x3b0] sm:$0xff]  ;;  %v3901_v22 = vld [vmem:[#allocation3 + $0x3a0] sm:$0xff] }
 0x543   : > { %3960 = vmatpush.msrb.mxu0 %v8471_v45  ;;  %3980 = vmatpush.msrb.mxu1 %v8473_v15  ;;  %v4531_v0 = vld [vmem:[#allocation3 + $0x230] sm:$0xff] }
 0x544   : > { %v3681_v56 = vpop.permute.xlu0 %3680  ;;  %4009 = vmatpush.msrb.mxu3 %v8472_v48  ;;  %3996 = vmatpush.msrb.mxu2 %v4527_v47  ;;  %v3899_v15 = vld [vmem:[#allocation3 + $0x390] sm:$0xff]  ;;  %v3939_v47 = vperm.slane %v7973_v26, 2 }
 0x545   : > { %v3710_v58 = vsel %vm715_vm4, %v3681_v56, %v3697_v6  ;;  %v3718_v2 = vsel %vm715_vm4, %v3697_v6, %v3681_v56  ;;  %v3707_v39 = vpop.permute.xlu1 %3706  ;;  %3961 = vmatpush.msrb.mxu0 %v3789_v29  ;;  %3981 = vmatpush.msrb.mxu1 %v8475_v43 }
 0x546   : > { %v3735_v5 = vmul.f32 %v7491_v12, %v3710_v58  ;;  %v3736_v7 = vmul.f32 %v7493_v13, %v3718_v2  ;;  %v3715_v1 = vsel %vm715_vm4, %v8474_v16, %v3707_v39  ;;  %v3723_v60 = vsel %vm715_vm4, %v3707_v39, %v8474_v16  ;;  %3997 = vmatpush.msrb.mxu2 %v4528_v23  ;;  %v8478_v39 = vld [vmem:[#allocation50_spill] sm:$0xff]  ;;  %v8480_v16 = vld [vmem:[#allocation37_spill] sm:$0xff] }
 0x547   : > { %v3745_v6 = vmul.f32 %v7491_v12, %v3715_v1  ;;  %v3746_v17 = vmul.f32 %v7493_v13, %v3723_v60  ;;  %3962 = vmatpush.msrb.mxu0 %v3787_v38  ;;  %4010 = vmatpush.msrb.mxu3 %v8476_v18  ;;  %v8484_v38 = vld [vmem:[#allocation51_spill] sm:$0xff]  ;;  %v8485_v18 = vld [vmem:[#allocation13_spill] sm:$0xff] }
 0x548   : > { %v7993_v14 = vadd.f32 %v7511_v24, %v3735_v5  ;;  %v7996_v59 = vadd.f32 %v7513_v9, %v3736_v7  ;;  %3982 = vmatpush.msrb.mxu1 %v7919_v11  ;;  %3998 = vmatpush.msrb.mxu2 %v4529_v46  ;;  %v8479_v5 = vld [vmem:[#allocation14_spill] sm:$0xff]  ;;  %v3897_v7 = vld [vmem:[#allocation3 + $0x380] sm:$0xff] }
 0x549   : > { %v3766_v51 = vadd.f32 %v7511_v24, %v3745_v6  ;;  %v8001_v33 = vadd.f32 %v7513_v9, %v3746_v17  ;;  %3963 = vmatpush.msrb.mxu0 %v3785_v42  ;;  %4011 = vmatpush.msrb.mxu3 %v8477_v44  ;;  %v8481_v6 = vld [vmem:[#allocation59_spill] sm:$0xff]  ;;  %v3677_v44 = vpop.permute.xlu2 %3676 }
 0x54a   : > { %3999 = vmatpush.msrb.mxu2 %v4530_v21  ;;  %3964 = vmatmul.f32.vlgmr.msrb.gmra.mxu0 %v3937_v8  ;;  %v8486_v46 = vld [vmem:[#allocation47_spill] sm:$0xff]  ;;  %v3810_v21 = vld [vmem:[#allocation3 + $0xc8] sm:$0xff] }
 0x54b   : > { %4012 = vmatpush.msrb.mxu3 %v3903_v55  ;;  %4036 = vmatpush.msra.mxu0 %v3766_v51  ;;  %v3874_v51 = vld [vmem:[#allocation3 + $0x2c8] sm:$0xff]  ;;  %v8487_v42 = vld [vmem:[#allocation43_spill] sm:$0xff] }
 0x54c   : > { %v2997_v31 = vpop.permute.xlu0 %2996  ;;  %4000 = vmatpush.msrb.mxu2 %v4531_v0  ;;  %v3872_v55 = vld [vmem:[#allocation3 + $0x2b8] sm:$0xff] }
 0x54d   : > { %v3012_v11 = vsel %vm510_vm5, %v7865_v20, %v2997_v31  ;;  %v3020_v57 = vsel %vm510_vm5, %v2997_v31, %v7865_v20  ;;  %v3429_v32 = vpop.permute.xlu1 %3428  ;;  %4013 = vmatpush.msrb.mxu3 %v3901_v22  ;;  %v4532_v20 = vld [vmem:[#allocation3 + $0x220] sm:$0xff]  ;;  %4037 = vmatpush.msra.mxu0 %v8478_v39  ;;  %v3808_v0 = vld [vmem:[#allocation3 + $0xb8] sm:$0xff]  ;;  %v3870_v22 = vld [vmem:[#allocation3 + $0x2a8] sm:$0xff] }
 0x54e   : > { %v3035_v3 = vmul.f32 %v7387_v54, %v3020_v57  ;;  %v3036_v56 = vmul.f32 %v7389_v61, %v3012_v11  ;;  %v3460_v45 = vsel %vm637_vm8, %v3429_v32, %v3445_v62  ;;  %v3468_v48 = vsel %vm637_vm8, %v3445_v62, %v3429_v32  ;;  %4001 = vmatpush.msrb.mxu2 %v4532_v20  ;;  %v3885_v11 = vld [vmem:[#allocation3 + $0x320] sm:$0xff]  ;;  %v4536_v39 = vld [vmem:[#allocation3 + $0x268] sm:$0xff] }
 0x54f   : > { %v3483_v58 = vmul.f32 %v7215_v63, %v3460_v45  ;;  %v3484_v2 = vmul.f32 %v7217_v36, %v3468_v48  ;;  %4014 = vmatpush.msrb.mxu3 %v3899_v15  ;;  %v4533_v36 = vld [vmem:[#allocation3 + $0x210] sm:$0xff]  ;;  %4038 = vmatpush.msra.mxu0 %v8479_v5  ;;  %v3806_v45 = vld [vmem:[#allocation3 + $0xa8] sm:$0xff]  ;;  %v8488_v48 = vld [vmem:[#allocation63_spill] sm:$0xff]  ;;  %v3941_v20 = vperm.slane %v7973_v26, 4 }
 0x550   : > { %v3056_v54 = vadd.f32 %v7397_v10, %v3035_v3  ;;  %v8024_v61 = vadd.f32 %v7399_v30, %v3036_v56  ;;  %4002 = vmatpush.msrb.mxu2 %v4533_v36  ;;  %v3938_v10 = vperm.slane %v7973_v26, 1  ;;  %v4534_v30 = vld [vmem:[#allocation3 + $0x200] sm:$0xff]  ;;  %v8490_v15 = vld [vmem:[#allocation49_spill] sm:$0xff]  ;;  %v3796_v5 = vld [vmem:[#allocation3 + $0x58] sm:$0xff] }
 0x551   : > { %v8028_v29 = vadd.f32 %v7223_v4, %v3483_v58  ;;  %v8031_v63 = vadd.f32 %v8466_v41, %v3484_v2  ;;  %4015 = vmatpush.msrb.mxu3 %v3897_v7  ;;  %4039 = vmatpush.msra.mxu0 %v8480_v16  ;;  %v3940_v58 = vperm.slane %v7973_v26, 3  ;;  %v8489_v2 = vld [vmem:[#allocation60_spill] sm:$0xff]  ;;  %v8493_v36 = vld [vmem:[#allocation17_spill] sm:$0xff]  ;;  %v4539_v16 = vld [vmem:[#allocation3 + $0x238] sm:$0xff] }
 0x552   : > { %3072 = vst [vmem:[#allocation3 + $0x100] sm:$0xff] %v3056_v54  ;;  %3983 = vmatpush.msrb.mxu1 %v3056_v54  ;;  %4003 = vmatpush.msrb.mxu2 %v4534_v30  ;;  %v8491_v54 = vld [vmem:[#allocation46_spill] sm:$0xff]  ;;  %v3842_v7 = vld [vmem:[#allocation3 + $0x1c8] sm:$0xff] }
 0x553   : > { %3073 = vst [vmem:[#allocation3 + $0x108] sm:$0xff] %v8024_v61  ;;  %4004 = vmatmul.f32.vlgmr.msrb.gmra.mxu2 %v3939_v47  ;;  %4016 = vmatpush.msrb.mxu3 %v7959_v53  ;;  %v3794_v30 = vld [vmem:[#allocation3 + $0x48] sm:$0xff] }
 0x554   : > { %v3679_v4 = vpop.permute.xlu0 %3678  ;;  %4088 = vmatpush.msra.mxu2 %v7893_v49  ;;  %4040 = vmatpush.msra.mxu0 %v7886_v25  ;;  %v8482_v49 = vld [vmem:[#allocation44_spill] sm:$0xff]  ;;  %v8483_v25 = vld [vmem:[#allocation18_spill] sm:$0xff] }
 0x555   : > { %v3695_v41 = vpop.permute.xlu1 %3694  ;;  %3984 = vmatmul.f32.vlgmr.msrb.gmra.mxu1 %v3938_v10  ;;  %4017 = vmatpush.msrb.mxu3 %v8481_v6  ;;  %v3902_v6 = vld [vmem:[#allocation3 + $0x3a8] sm:$0xff] }
 0x556   : > { %v3709_v1 = vsel %vm715_vm4, %v3679_v4, %v3695_v41  ;;  %v3717_v60 = vsel %vm715_vm4, %v3695_v41, %v3679_v4  ;;  %4048 = vmatpush.msra.mxu1 %v7853_v34  ;;  %4089 = vmatpush.msra.mxu2 %v8482_v49  ;;  %v3887_v34 = vld [vmem:[#allocation3 + $0x330] sm:$0xff]  ;;  %v3904_v4 = vld [vmem:[#allocation3 + $0x3b8] sm:$0xff]  ;;  %v4170_v26 = vld [vmem:[#allocation8 + $0xa0] sm:$0xff] }
 0x557   : > { %v3733_v17 = vmul.f32 %v7491_v12, %v3709_v1  ;;  %v3734_v53 = vmul.f32 %v7493_v13, %v3717_v60  ;;  %4041 = vmatpush.msra.mxu0 %v7993_v14  ;;  %4018 = vmatpush.msrb.mxu3 %v8483_v25  ;;  %v3840_v41 = vld [vmem:[#allocation3 + $0x1b8] sm:$0xff]  ;;  %v4540_v60 = vld [vmem:[#allocation3 + $0x228] sm:$0xff] }
 0x558   : > { %4049 = vmatpush.msra.mxu1 %v8484_v38  ;;  %4090 = vmatpush.msra.mxu2 %v8485_v18  ;;  %v3792_v1 = vld [vmem:[#allocation3 + $0x38] sm:$0xff]  ;;  %v4542_v18 = vld [vmem:[#allocation3 + $0x208] sm:$0xff] }
 0x559   : > { %v3754_v43 = vadd.f32 %v7511_v24, %v3733_v17  ;;  %v8057_v23 = vadd.f32 %v7513_v9, %v3734_v53  ;;  %4019 = vmatpush.msrb.mxu3 %v8486_v46  ;;  %v3838_v17 = vld [vmem:[#allocation3 + $0x1a8] sm:$0xff]  ;;  %v4541_v49 = vld [vmem:[#allocation3 + $0x218] sm:$0xff] }
 0x55a   : > { %4050 = vmatpush.msra.mxu1 %v8487_v42  ;;  %4091 = vmatpush.msra.mxu2 %v3874_v51  ;;  %v3790_v53 = vld [vmem:[#allocation3 + $0x28] sm:$0xff]  ;;  %v3900_v25 = vld [vmem:[#allocation3 + $0x398] sm:$0xff] }
 0x55b   : > { %4020 = vmatpush.msrb.mxu3 %v3887_v34  ;;  %4042 = vmatpush.msra.mxu0 %v3754_v43  ;;  %v3836_v43 = vld [vmem:[#allocation3 + $0x198] sm:$0xff]  ;;  %v3898_v51 = vld [vmem:[#allocation3 + $0x388] sm:$0xff] }
 0x55c   : > { %v3693_v14 = vpop.permute.xlu0 %3692  ;;  %4051 = vmatpush.msra.mxu1 %v3810_v21  ;;  %4092 = vmatpush.msra.mxu2 %v3872_v55  ;;  %v3788_v38 = vld [vmem:[#allocation3 + $0x18] sm:$0xff]  ;;  %v3834_v46 = vld [vmem:[#allocation3 + $0x188] sm:$0xff] }
 0x55d   : > { %v3708_v31 = vsel %vm715_vm4, %v3677_v44, %v3693_v14  ;;  %v3716_v62 = vsel %vm715_vm4, %v3693_v14, %v3677_v44  ;;  %4021 = vmatpush.msrb.mxu3 %v3885_v11  ;;  %v3786_v42 = vld [vmem:[#allocation3 + $0x8] sm:$0xff]  ;;  %v8494_v34 = vld [vmem:[#allocation34_spill] sm:$0xff] }
 0x55e   : > { %v3731_v57 = vmul.f32 %v7491_v12, %v3708_v31  ;;  %v3732_v32 = vmul.f32 %v7493_v13, %v3716_v62  ;;  %4052 = vmatpush.msra.mxu1 %v3808_v0  ;;  %4093 = vmatpush.msra.mxu2 %v3870_v22  ;;  %v3804_v12 = vld [vmem:[#allocation3 + $0x98] sm:$0xff]  ;;  %v3866_v13 = vld [vmem:[#allocation3 + $0x288] sm:$0xff] }
 0x55f   : > { %4022 = vmatpush.msrb.mxu3 %v8488_v48  ;;  %v8495_v44 = vld [vmem:[#allocation48_spill] sm:$0xff]  ;;  %v3892_v21 = vld [vmem:[#allocation3 + $0x358] sm:$0xff]  ;;  %v4167_v48 = vld [vmem:[#allocation8 + $0x88] sm:$0xff] }
 0x560   : > { %v3752_v3 = vadd.f32 %v7511_v24, %v3731_v57  ;;  %v8071_v56 = vadd.f32 %v7513_v9, %v3732_v32  ;;  %4053 = vmatpush.msra.mxu1 %v3806_v45  ;;  %4094 = vmatpush.msra.mxu2 %v3868_v27  ;;  %v3802_v24 = vld [vmem:[#allocation3 + $0x88] sm:$0xff]  ;;  %v4535_v9 = vld [vmem:[#allocation3 + $0x278] sm:$0xff] }
 0x561   : > { %4023 = vmatpush.msrb.mxu3 %v8028_v29  ;;  %v8492_v29 = vld [vmem:[#allocation24_spill] sm:$0xff]  ;;  %v3924_v55 = vld [vmem:[#allocation3 + $0x458] sm:$0xff] }
 0x562   : > { %4043 = vmatpush.msra.mxu0 %v3752_v3  ;;  %4054 = vmatpush.msra.mxu1 %v3804_v12  ;;  %v8496_v14 = vld [vmem:[#allocation36_spill] sm:$0xff]  ;;  %v8498_v57 = vld [vmem:[#allocation23_spill] sm:$0xff]  ;;  %v4172_v22 = vld [vmem:[#allocation8 + $0xb0] sm:$0xff] }
 0x563   : > { %4095 = vmatpush.msra.mxu2 %v3866_v13  ;;  %4024 = vmatmul.f32.vlgmr.msrb.gmra.mxu3 %v3940_v58  ;;  %v3922_v31 = vld [vmem:[#allocation3 + $0x448] sm:$0xff]  ;;  %v4177_v32 = vld [vmem:[#allocation8 + $0xd8] sm:$0xff] }
 0x564   : > { %4068 = vmatpush.msrb.mxu0 %v7857_v19  ;;  %4055 = vmatpush.msra.mxu1 %v3802_v24  ;;  %v4537_v19 = vld [vmem:[#allocation3 + $0x258] sm:$0xff]  ;;  %v3886_v62 = vld [vmem:[#allocation3 + $0x328] sm:$0xff] }
 0x565   : > { %4096 = vmatpush.msra.mxu2 %v4535_v9  ;;  %4108 = vmatpush.msra.mxu3 %v7955_v50  ;;  %v4538_v50 = vld [vmem:[#allocation3 + $0x248] sm:$0xff]  ;;  %v4173_v3 = vld [vmem:[#allocation8 + $0xb8] sm:$0xff]  ;;  %v4160_v9 = vld [vmem:[#allocation8 + $0x50] sm:$0xff] }
 0x566   : > { %4069 = vmatpush.msrb.mxu0 %v8489_v2  ;;  %4056 = vmatpush.msra.mxu1 %v7863_v40  ;;  %v3906_v40 = vld [vmem:[#allocation3 + $0x3c8] sm:$0xff]  ;;  %v4169_v45 = vld [vmem:[#allocation8 + $0x98] sm:$0xff] }
 0x567   : > { %4097 = vmatpush.msra.mxu2 %v4536_v39  ;;  %4109 = vmatpush.msra.mxu3 %v8490_v15  ;;  %v3822_v11 = vld [vmem:[#allocation3 + $0x128] sm:$0xff]  ;;  %v4165_v12 = vld [vmem:[#allocation8 + $0x78] sm:$0xff]  ;;  %v4156_v15 = vld [vmem:[#allocation8 + $0x30] sm:$0xff] }
 0x568   : > { %4070 = vmatpush.msrb.mxu0 %v8491_v54  ;;  %4057 = vmatpush.msra.mxu1 %v8492_v29  ;;  %v4174_v0 = vld [vmem:[#allocation8 + $0xc0] sm:$0xff]  ;;  %v4163_v24 = vld [vmem:[#allocation8 + $0x68] sm:$0xff]  ;;  %v4161_v2 = vld [vmem:[#allocation8 + $0x58] sm:$0xff] }
 0x569   : > { %4098 = vmatpush.msra.mxu2 %v4537_v19  ;;  %4110 = vmatpush.msra.mxu3 %v8493_v36  ;;  %v4166_v27 = vld [vmem:[#allocation8 + $0x80] sm:$0xff]  ;;  %v4159_v39 = vld [vmem:[#allocation8 + $0x48] sm:$0xff]  ;;  %v4157_v54 = vld [vmem:[#allocation8 + $0x38] sm:$0xff] }
 0x56a   : > { %4476 = vmatmul.msk.f32.vlgmr.msra.gmra.mxu0 %vm2249_vm11, %v3941_v20  ;;  %4058 = vmatpush.msra.mxu1 %v3796_v5  ;;  %v4162_v13 = vld [vmem:[#allocation8 + $0x60] sm:$0xff]  ;;  %v4155_v19 = vld [vmem:[#allocation8 + $0x28] sm:$0xff]  ;;  %v4152_v36 = vld [vmem:[#allocation8 + $0x10] sm:$0xff] }
 0x56b   : > { %4099 = vmatpush.msra.mxu2 %v4538_v50  ;;  %4111 = vmatpush.msra.mxu3 %v3906_v40  ;;  %v4154_v29 = vld [vmem:[#allocation8 + $0x20] sm:$0xff]  ;;  %v4153_v5 = vld [vmem:[#allocation8 + $0x18] sm:$0xff]  ;;  %v4151_v40 = vld [vmem:[#allocation8 + $0x8] sm:$0xff] }
 0x56c   : > { %4071 = vmatpush.msrb.mxu0 %v3842_v7  ;;  %4059 = vmatpush.msra.mxu1 %v3794_v30  ;;  %v4150_v50 = vld [vmem:[#allocation8] sm:$0xff]  ;;  %v4212_v7 = vld [vmem:[#allocation8 + $0x1f0] sm:$0xff]  ;;  %v4213_v30 = vld [vmem:[#allocation8 + $0x1f8] sm:$0xff] }
 0x56d   : > { %4100 = vmatpush.msra.mxu2 %v4539_v16  ;;  %4112 = vmatpush.msra.mxu3 %v3904_v4  ;;  %v4210_v16 = vld [vmem:[#allocation8 + $0x1e0] sm:$0xff]  ;;  %v4211_v4 = vld [vmem:[#allocation8 + $0x1e8] sm:$0xff] }
 0x56e   : > { %4072 = vmatpush.msrb.mxu0 %v3840_v41  ;;  %4060 = vmatpush.msra.mxu1 %v3792_v1  ;;  %v4208_v41 = vld [vmem:[#allocation8 + $0x1d0] sm:$0xff]  ;;  %v4209_v1 = vld [vmem:[#allocation8 + $0x1d8] sm:$0xff] }
 0x56f   : > { %4101 = vmatpush.msra.mxu2 %v4540_v60  ;;  %4113 = vmatpush.msra.mxu3 %v3902_v6  ;;  %v4206_v60 = vld [vmem:[#allocation8 + $0x1c0] sm:$0xff]  ;;  %v4207_v6 = vld [vmem:[#allocation8 + $0x1c8] sm:$0xff] }
 0x570   : > { %4073 = vmatpush.msrb.mxu0 %v3838_v17  ;;  %4061 = vmatpush.msra.mxu1 %v3790_v53  ;;  %v4204_v17 = vld [vmem:[#allocation8 + $0x1b0] sm:$0xff]  ;;  %v4205_v53 = vld [vmem:[#allocation8 + $0x1b8] sm:$0xff] }
 0x571   : > { %4102 = vmatpush.msra.mxu2 %v4541_v49  ;;  %4114 = vmatpush.msra.mxu3 %v3900_v25  ;;  %v4202_v49 = vld [vmem:[#allocation8 + $0x1a0] sm:$0xff]  ;;  %v4203_v25 = vld [vmem:[#allocation8 + $0x1a8] sm:$0xff] }
 0x572   : > { %4074 = vmatpush.msrb.mxu0 %v3836_v43  ;;  %4062 = vmatpush.msra.mxu1 %v3788_v38  ;;  %v4200_v43 = vld [vmem:[#allocation8 + $0x190] sm:$0xff]  ;;  %v4201_v38 = vld [vmem:[#allocation8 + $0x198] sm:$0xff] }
 0x573   : > { %4103 = vmatpush.msra.mxu2 %v4542_v18  ;;  %4115 = vmatpush.msra.mxu3 %v3898_v51  ;;  %v4198_v18 = vld [vmem:[#allocation8 + $0x180] sm:$0xff]  ;;  %v4199_v51 = vld [vmem:[#allocation8 + $0x188] sm:$0xff] }
 0x574   : > { %4075 = vmatpush.msrb.mxu0 %v3834_v46  ;;  %4063 = vmatpush.msra.mxu1 %v3786_v42  ;;  %v3933_v46 = vpop.permute.xlu1 %3932  ;;  %v4196_v42 = vld [vmem:[#allocation8 + $0x170] sm:$0xff] }
 0x575   : > { %4104 = vmatmul.f32.vlgmr.msra.gmra.mxu2 %v3939_v47  ;;  %4116 = vmatpush.msra.mxu3 %v7962_v37  ;;  %v8497_v47 = vld [vmem:[#allocation32_spill] sm:$0xff] }
 0x576   : > { %4064 = vmatmul.f32.vlgmr.msra.gmra.mxu1 %v3937_v8  ;;  %4076 = vmatpush.msrb.mxu0 %v7926_v35  ;;  %v3890_v37 = vld [vmem:[#allocation3 + $0x348] sm:$0xff]  ;;  %v3824_v35 = vld [vmem:[#allocation3 + $0x138] sm:$0xff] }
 0x577   : > { %4136 = vmatpush.msrb.mxu1 %v8001_v33  ;;  %4117 = vmatpush.msra.mxu3 %v8494_v34  ;;  %v3826_v8 = vld [vmem:[#allocation3 + $0x148] sm:$0xff]  ;;  %v3888_v33 = vld [vmem:[#allocation3 + $0x338] sm:$0xff] }
 0x578   : > { %4077 = vmatpush.msrb.mxu0 %v8496_v14  ;;  %v4197_v34 = vld [vmem:[#allocation8 + $0x178] sm:$0xff]  ;;  %v4194_v14 = vld [vmem:[#allocation8 + $0x160] sm:$0xff] }
 0x579   : > { %4137 = vmatpush.msrb.mxu1 %v8495_v44  ;;  %4118 = vmatpush.msra.mxu3 %v3892_v21  ;;  %v4195_v21 = vld [vmem:[#allocation8 + $0x168] sm:$0xff] }
 0x57a   : > { %4078 = vmatpush.msrb.mxu0 %v8497_v47 }
 0x57b   : > { %4138 = vmatpush.msrb.mxu1 %v3924_v55  ;;  %4119 = vmatpush.msra.mxu3 %v3890_v37  ;;  %v3935_v55 = vperm.slane %v3933_v46, 0 }
 0x57c   : > { %4079 = vmatpush.msrb.mxu0 %v3826_v8  ;;  %v4192_v8 = vld [vmem:[#allocation8 + $0x150] sm:$0xff] }
 0x57d   : > { %4139 = vmatpush.msrb.mxu1 %v3922_v31  ;;  %4120 = vmatpush.msra.mxu3 %v3888_v33  ;;  %v4193_v33 = vld [vmem:[#allocation8 + $0x158] sm:$0xff] }
 0x57e   : > { %4080 = vmatpush.msrb.mxu0 %v3824_v35 }
 0x57f   : > { %4140 = vmatpush.msrb.mxu1 %v7889_v52  ;;  %4121 = vmatpush.msra.mxu3 %v3886_v62  ;;  %v4180_v52 = vld [vmem:[#allocation8 + $0xf0] sm:$0xff]  ;;  %v4190_v62 = vld [vmem:[#allocation8 + $0x140] sm:$0xff] }
 0x580   : > { %4081 = vmatpush.msrb.mxu0 %v3822_v11  ;;  %v4191_v11 = vld [vmem:[#allocation8 + $0x148] sm:$0xff] }
 0x581   : > { %4141 = vmatpush.msrb.mxu1 %v7996_v59  ;;  %4122 = vmatpush.msra.mxu3 %v8498_v57  ;;  %v4181_v59 = vld [vmem:[#allocation8 + $0xf8] sm:$0xff] }
 0x582   : > { %4082 = vmatpush.msrb.mxu0 %v7922_v28  ;;  %4260 = vmatpush.msrb.mxu2 %v4181_v59  ;;  %v4179_v28 = vld [vmem:[#allocation8 + $0xe8] sm:$0xff] }
 0x583   : > { %4142 = vmatpush.msrb.mxu1 %v8057_v23  ;;  %4123 = vmatpush.msra.mxu3 %v8031_v63  ;;  %v4178_v23 = vld [vmem:[#allocation8 + $0xe0] sm:$0xff]  ;;  %v4176_v63 = vld [vmem:[#allocation8 + $0xd0] sm:$0xff] }
 0x584   : > { %4124 = vmatmul.f32.vlgmr.msra.gmra.mxu3 %v3940_v58  ;;  %4083 = vmatpush.msrb.mxu0 %v8024_v61  ;;  %v4175_v61 = vld [vmem:[#allocation8 + $0xc8] sm:$0xff]  ;;  %v4164_v58 = vld [vmem:[#allocation8 + $0x70] sm:$0xff] }
 0x585   : > { %4143 = vmatpush.msrb.mxu1 %v8071_v56  ;;  %4084 = vmatmul.f32.vlgmr.msrb.gmra.mxu0 %v3938_v10  ;;  %v4171_v10 = vld [vmem:[#allocation8 + $0xa8] sm:$0xff]  ;;  %v4168_v56 = vld [vmem:[#allocation8 + $0x90] sm:$0xff] }
 0x586   : > { %4477 = vmatmul.msk.f32.vlgmr.msrb.gmra.mxu1 %vm2249_vm11, %v3941_v20  ;;  %4220 = vmatpush.msra.mxu0 %v4180_v52  ;;  %v4158_v20 = vld [vmem:[#allocation8 + $0x40] sm:$0xff] }
 0x587   : > { %4261 = vmatpush.msrb.mxu2 %v4179_v28  ;;  %4240 = vmatpush.msra.mxu1 %v4212_v7  ;;  %v4189_v28 = vld [vmem:[#allocation8 + $0x138] sm:$0xff] }
 0x588   : > { %4221 = vmatpush.msra.mxu0 %v4178_v23  ;;  %4280 = vmatpush.msrb.mxu3 %v4213_v30  ;;  %v4188_v23 = vld [vmem:[#allocation8 + $0x130] sm:$0xff] }
 0x589   : > { %4262 = vmatpush.msrb.mxu2 %v4177_v32  ;;  %4241 = vmatpush.msra.mxu1 %v4210_v16  ;;  %v4186_v32 = vld [vmem:[#allocation8 + $0x120] sm:$0xff] }
 0x58a   : > { %4222 = vmatpush.msra.mxu0 %v4176_v63  ;;  %4281 = vmatpush.msrb.mxu3 %v4211_v4 }
 0x58b   : > { %4263 = vmatpush.msrb.mxu2 %v4175_v61  ;;  %4242 = vmatpush.msra.mxu1 %v4208_v41 }
 0x58c   : > { %4223 = vmatpush.msra.mxu0 %v4174_v0  ;;  %4282 = vmatpush.msrb.mxu3 %v4209_v1  ;;  %v4187_v0 = vld [vmem:[#allocation8 + $0x128] sm:$0xff] }
 0x58d   : > { %4264 = vmatpush.msrb.mxu2 %v4173_v3  ;;  %4243 = vmatpush.msra.mxu1 %v4206_v60  ;;  %v4185_v3 = vld [vmem:[#allocation8 + $0x118] sm:$0xff] }
 0x58e   : > { %4224 = vmatpush.msra.mxu0 %v4172_v22  ;;  %4283 = vmatpush.msrb.mxu3 %v4207_v6  ;;  %v4184_v22 = vld [vmem:[#allocation8 + $0x110] sm:$0xff] }
 0x58f   : > { %4265 = vmatpush.msrb.mxu2 %v4171_v10  ;;  %4244 = vmatpush.msra.mxu1 %v4204_v17  ;;  %v4182_v10 = vld [vmem:[#allocation8 + $0x100] sm:$0xff] }
 0x590   : > { %4225 = vmatpush.msra.mxu0 %v4170_v26  ;;  %4284 = vmatpush.msrb.mxu3 %v4205_v53 }
 0x591   : > { %4266 = vmatpush.msrb.mxu2 %v4169_v45  ;;  %4245 = vmatpush.msra.mxu1 %v4202_v49 }
 0x592   : > { %4226 = vmatpush.msra.mxu0 %v4168_v56  ;;  %4285 = vmatpush.msrb.mxu3 %v4203_v25  ;;  %v4183_v56 = vld [vmem:[#allocation8 + $0x108] sm:$0xff] }
 0x593   : > { %4267 = vmatpush.msrb.mxu2 %v4167_v48  ;;  %4246 = vmatpush.msra.mxu1 %v4200_v43 }
 0x594   : > { %4227 = vmatpush.msra.mxu0 %v4166_v27  ;;  %4286 = vmatpush.msrb.mxu3 %v4201_v38 }
 0x595   : > { %4268 = vmatpush.msrb.mxu2 %v4165_v12  ;;  %4247 = vmatpush.msra.mxu1 %v4198_v18 }
 0x596   : > { %4228 = vmatpush.msra.mxu0 %v4164_v58  ;;  %4287 = vmatpush.msrb.mxu3 %v4199_v51 }
 0x597   : > { %4269 = vmatpush.msrb.mxu2 %v4163_v24  ;;  %4248 = vmatpush.msra.mxu1 %v4196_v42 }
 0x598   : > { %4229 = vmatpush.msra.mxu0 %v4162_v13  ;;  %4288 = vmatpush.msrb.mxu3 %v4197_v34 }
 0x599   : > { %4270 = vmatpush.msrb.mxu2 %v4161_v2  ;;  %4249 = vmatpush.msra.mxu1 %v4194_v14 }
 0x59a   : > { %4230 = vmatpush.msra.mxu0 %v4160_v9  ;;  %4289 = vmatpush.msrb.mxu3 %v4195_v21 }
 0x59b   : > { %4271 = vmatpush.msrb.mxu2 %v4159_v39  ;;  %4250 = vmatpush.msra.mxu1 %v4192_v8 }
 0x59c   : > { %4231 = vmatpush.msra.mxu0 %v4158_v20  ;;  %4290 = vmatpush.msrb.mxu3 %v4193_v33 }
 0x59d   : > { %4272 = vmatpush.msrb.mxu2 %v4157_v54  ;;  %4251 = vmatpush.msra.mxu1 %v4190_v62 }
 0x59e   : > { %4232 = vmatpush.msra.mxu0 %v4156_v15  ;;  %4291 = vmatpush.msrb.mxu3 %v4191_v11  ;;  %v4214_v15 = vld [vmem:[%s8142_s10] sm:$0x3] }
 0x59f   : > { %4273 = vmatpush.msrb.mxu2 %v4155_v19  ;;  %4252 = vmatpush.msra.mxu1 %v4188_v23  ;;  %v4217_v54 = vperm.slane %v4214_v15, 1  ;;  %v4216_v19 = vperm.slane %v4214_v15, 0 }
 0x5a0   : > { %4233 = vmatpush.msra.mxu0 %v4154_v29  ;;  %4292 = vmatpush.msrb.mxu3 %v4189_v28 }
 0x5a1   : > { %4274 = vmatpush.msrb.mxu2 %v4153_v5  ;;  %4253 = vmatpush.msra.mxu1 %v4186_v32 }
 0x5a2   : > { %4234 = vmatpush.msra.mxu0 %v4152_v36  ;;  %4293 = vmatpush.msrb.mxu3 %v4187_v0 }
 0x5a3   : > { %4275 = vmatpush.msrb.mxu2 %v4151_v40  ;;  %4254 = vmatpush.msra.mxu1 %v4184_v22 }
 0x5a4   : > { %4235 = vmatpush.msra.mxu0 %v4150_v50  ;;  %4294 = vmatpush.msrb.mxu3 %v4185_v3 }
 0x5a5   : > { %4255 = vmatpush.msra.mxu1 %v4182_v10 }
 0x5a6   : > { %4295 = vmatpush.msrb.mxu3 %v4183_v56 }
 0x5c7   : > { %v3965_v44 = vpop.f32.mrf.mxu0 }
 0x5c8   : > { %v3966_v37 = vadd.f32 %v3965_v44, %v3935_v55 }
 0x5d2   : > { %v3985_v47 = vpop.f32.mrf.mxu1 }
 0x5d3   : > { %v3986_v35 = vadd.f32 %v3985_v47, %v3966_v37 }
 0x5d6   : > { %v4005_v31 = vpop.f32.mrf.mxu2 }
 0x5d7   : > { %v4006_v57 = vadd.f32 %v4005_v31, %v3986_v35 }
 0x5e6   : > { %v4025_v52 = vpop.f32.mrf.mxu3 }
 0x5e7   : > { %v4045_v59 = vpop.f32.mrf.mxu0  ;;  %v4026_v63 = vadd.f32 %v4025_v52, %v4006_v57 }
 0x5e9   : > { %v4046_v61 = vadd.f32 %v4045_v59, %v4026_v63 }
 0x5eb   : > { %v4148_v26 = vmax.f32 %v4046_v61, 0.0 }
 0x5ed   : > { %4236 = vmatmul.f32.vlgmr.msra.gmra.mxu0 %v4148_v26  ;;  %4276 = vmatmul.f32.vlgmr.msrb.gmra.mxu2 %v4148_v26 }
 0x5f3   : > { %v4065_v45 = vpop.f32.mrf.mxu1 }
 0x5f4   : > { %v4066_v27 = vadd.f32 %v4065_v45, %v3935_v55 }
 0x5f8   : > { %v4105_v58 = vpop.f32.mrf.mxu2 }
 0x602   : > { %v4085_v48 = vpop.f32.mrf.mxu0 }
 0x603   : > { %v4086_v12 = vadd.f32 %v4085_v48, %v4066_v27  ;;  %v4145_v9 = vpop.f32.mrf.mxu1 }
 0x605   : > { %v4106_v13 = vadd.f32 %v4105_v58, %v4086_v12 }
 0x607   : > { %v4125_v24 = vpop.f32.mrf.mxu3 }
 0x608   : > { %v4126_v2 = vadd.f32 %v4125_v24, %v4106_v13 }
 0x60a   : > { %v4146_v20 = vadd.f32 %v4145_v9, %v4126_v2 }
 0x60c   : > { %v4149_v39 = vmax.f32 %v4146_v20, 0.0 }
 0x60e   : > { %4256 = vmatmul.f32.vlgmr.msra.gmra.mxu1 %v4149_v39  ;;  %4296 = vmatmul.f32.vlgmr.msrb.gmra.mxu3 %v4149_v39 }
 0x66a   : > { %v4237_v36 = vpop.f32.mrf.mxu0 }
 0x66b   : > { %v4238_v7 = vadd.f32 %v4237_v36, %v4216_v19 }
 0x670   : > { %v4277_v29 = vpop.f32.mrf.mxu2 }
 0x671   : > { %v4278_v5 = vadd.f32 %v4277_v29, %v4217_v54 }
 0x68b   : > { %v4257_v50 = vpop.f32.mrf.mxu1 }
 0x68c   : > { %v4258_v16 = vadd.f32 %v4257_v50, %v4238_v7 }
 0x691   : > { %v4297_v40 = vpop.f32.mrf.mxu3 }
 0x692   : > { %v4298_v30 = vadd.f32 %v4297_v40, %v4278_v5 }
 0x694   : > { %v4302_v4 = vrot.slane %v4298_v30, 7 }
 0x696   : > { %v4303_v41 = vsel %vm452_vm1, %v4258_v16, %v4302_v4 }
 0x697   : > { %4305 = vst.msk [vmem:[#allocation4] sm:$0x3] %vm4771_vm2, %v4303_v41 }
 0x69e   : > { %v4306_v60 = vld [vmem:[#allocation4] sm:$0x3] }
 0x69f   : > { %4307 = vst.msk [vmem:[%s417_s17] sm:$0x3] %vm4771_vm2, %v4306_v60 }
 0x6a0 PF: > { %s25_s19 = sadd.s32 1, %s4617_s19  }
 0x6a1   : > { %p22_p7 = scmp.ge.s32.totalorder %s25_s19, 4  }
 0x6a3   :  { %24 = sbr.rel (!%p22_p7) target bundleno = 5 (0x5), region = 127 }
 0x6a8   :  { %4327 = vsyncpa [#allocation7], 1 }
 0x6a9   :  { %4329 = vsyncpa [#allocation7 + $0x1], 1 }
 0x6aa   :  { %4330 = vsyncpa [#allocation9], 1 }

</bundles_post_ra>
